<compile_context>
chip_gen: v5e
topology: v5e:2x2
jax: 0.10.0
libtpu: 0.0.40
codegen_flags: <defaults>
</compile_context>

<pallas_src>
import functools

import jax
import jax.numpy as jnp
from jax.experimental import pallas as pl
from jax.experimental.pallas import tpu as pltpu

EPS = 1e-5
_MERGE_ROW_TILE = 1024


# ---------------------------------------------------------------------------
# Small helpers
# ---------------------------------------------------------------------------
def _itemsize(dt):
    return jnp.dtype(dt).itemsize


def _clamp_vmem(est_bytes):
    """Scoped-VMEM limit sized from the estimate, with headroom (review [5])."""
    return int(min(max(est_bytes + (4 << 20), 16 << 20), 64 << 20))


def _bn_apply(y, stats, gamma, beta, inv_count):
    """Normalize with global batch stats (row0=sum, row1=sumsq) + affine, f32."""
    mean = stats[0:1, :] * inv_count
    var = jnp.maximum(stats[1:2, :] * inv_count - mean * mean, 0.0)
    return (y - mean) * jax.lax.rsqrt(var + EPS) * gamma + beta


def _stats_rows(y):
    """Per-channel (sum, sum-of-squares) of a (rows, C) f32 block -> (2, C)."""
    return jnp.concatenate([jnp.sum(y, axis=0, keepdims=True),
                            jnp.sum(y * y, axis=0, keepdims=True)], axis=0)


def _conv3x3_taps(x2d, w_ref, H, W, cdtype):
    """3x3 'SAME' conv of one image as 9 accumulating MXU dots (review [1,2]).

    x2d:   (H*W, Cin) f32 (flattened rows, r = h*W + w).
    w_ref: (9, Cin, Cout) ref, kh-major tap order, MXU compute dtype.
    Returns (H*W, Cout) f32.
    """
    hw, cin = x2d.shape
    cout = w_ref.shape[-1]
    rtot = (H + 2) * W

    # H halo: one zero image-row above and below (aligned major-offset concat).
    zrow = jnp.zeros((W, cin), x2d.dtype)
    xp = jnp.concatenate([zrow, x2d, zrow], axis=0)          # ((H+2)*W, Cin)

    # W shifts via circular roll (XLU) + edge mask: the wrap-around rows are
    # exactly the w==0 / w==W-1 columns, which must be zero anyway.
    col = jax.lax.broadcasted_iota(jnp.int32, (H + 2, W, cin), 1)
    col = col.reshape(rtot, cin)
    x_l = jnp.where(col == 0, 0.0, pltpu.roll(xp, shift=1, axis=0))
    x_r = jnp.where(col == W - 1, 0.0, pltpu.roll(xp, shift=rtot - 1, axis=0))
    variants = (x_l.astype(cdtype), xp.astype(cdtype), x_r.astype(cdtype))

    acc = jnp.zeros((hw, cout), jnp.float32)
    for kh in range(3):
        for kw in range(3):
            tap = variants[kw][kh * W:kh * W + hw]           # aligned slice
            acc = acc + jnp.dot(tap, w_ref[kh * 3 + kw],
                                preferred_element_type=jnp.float32)
    return acc


# ---------------------------------------------------------------------------
# Kernels
# ---------------------------------------------------------------------------
def _conv1_kernel(*refs, H, W, has_shortcut, cdtype):
    """Per image: conv1 (3x3) [+ fused 1x1 shortcut conv] + partial BN stats."""
    if has_shortcut:
        x_ref, w1_ref, ws_ref, y1_ref, s1_ref, sc_ref, ssc_ref = refs
    else:
        x_ref, w1_ref, y1_ref, s1_ref = refs
        ws_ref = sc_ref = ssc_ref = None

    x = x_ref[0].astype(jnp.float32)                         # (H*W, Cin)

    y1 = _conv3x3_taps(x, w1_ref, H, W, cdtype)              # (H*W, Cout) f32
    y1s = y1.astype(y1_ref.dtype)                            # act dtype (bf16)
    y1_ref[0] = y1s
    s1_ref[0] = _stats_rows(y1s.astype(jnp.float32))         # f32 partial stats

    if has_shortcut:
        sc = jnp.dot(x.astype(cdtype), ws_ref[...],
                     preferred_element_type=jnp.float32)
        scs = sc.astype(sc_ref.dtype)
        sc_ref[0] = scs
        ssc_ref[0] = _stats_rows(scs.astype(jnp.float32))


def _conv2_kernel(y1_ref, s1_ref, g1_ref, b1_ref, w2_ref, y2_ref, s2_ref,
                  *, H, W, inv_count, cdtype):
    """BN1 (global stats) + ReLU fused with conv2 + partial BN2 stats."""
    y1 = y1_ref[0].astype(jnp.float32)                       # (H*W, C)
    h = jnp.maximum(
        _bn_apply(y1, s1_ref[...], g1_ref[...], b1_ref[...], inv_count), 0.0)

    y2 = _conv3x3_taps(h, w2_ref, H, W, cdtype)
    y2s = y2.astype(y2_ref.dtype)
    y2_ref[0] = y2s
    s2_ref[0] = _stats_rows(y2s.astype(jnp.float32))


def _merge_shortcut_kernel(y2_ref, s2_ref, g2_ref, b2_ref,
                           sc_ref, ssc_ref, gs_ref, bs_ref, out_ref,
                           *, inv_count):
    """out = relu(bn2(y2) + bn_s(shortcut))   (elementwise, f32)."""
    main = _bn_apply(y2_ref[...].astype(jnp.float32), s2_ref[...],
                     g2_ref[...], b2_ref[...], inv_count)
    sc = _bn_apply(sc_ref[...].astype(jnp.float32), ssc_ref[...],
                   gs_ref[...], bs_ref[...], inv_count)
    out_ref[...] = jnp.maximum(main + sc, 0.0).astype(out_ref.dtype)


def _merge_identity_kernel(y2_ref, s2_ref, g2_ref, b2_ref, x_ref, out_ref,
                           *, inv_count):
    """out = relu(bn2(y2) + x)   (identity shortcut)."""
    main = _bn_apply(y2_ref[...].astype(jnp.float32), s2_ref[...],
                     g2_ref[...], b2_ref[...], inv_count)
    out_ref[...] = jnp.maximum(main + x_ref[...].astype(jnp.float32),
                               0.0).astype(out_ref.dtype)


# ---------------------------------------------------------------------------
# pallas_call wrappers
# ---------------------------------------------------------------------------
def _call_conv1(xf, w1, ws, n, h, w, cout, cdtype, adtype):
    hw = h * w
    cin = xf.shape[-1]
    has_shortcut = ws is not None

    in_specs = [pl.BlockSpec((1, hw, cin), lambda i: (i, 0, 0)),
                pl.BlockSpec((9, cin, cout), lambda i: (0, 0, 0))]
    args = [xf, w1]
    out_shape = [jax.ShapeDtypeStruct((n, hw, cout), adtype),
                 jax.ShapeDtypeStruct((n, 2, cout), jnp.float32)]
    out_specs = [pl.BlockSpec((1, hw, cout), lambda i: (i, 0, 0)),
                 pl.BlockSpec((1, 2, cout), lambda i: (i, 0, 0))]
    if has_shortcut:
        in_specs.append(pl.BlockSpec((cin, cout), lambda i: (0, 0)))
        args.append(ws)
        out_shape += [jax.ShapeDtypeStruct((n, hw, cout), adtype),
                      jax.ShapeDtypeStruct((n, 2, cout), jnp.float32)]
        out_specs += [pl.BlockSpec((1, hw, cout), lambda i: (i, 0, 0)),
                      pl.BlockSpec((1, 2, cout), lambda i: (i, 0, 0))]

    # Rough per-step working-set estimate (blocks double-buffered + temps).
    io = (hw * cin * xf.dtype.itemsize + 9 * cin * cout * _itemsize(cdtype)
          + hw * cout * _itemsize(adtype) + 2 * cout * 4)
    if has_shortcut:
        io += (cin * cout * _itemsize(cdtype)
               + hw * cout * _itemsize(adtype) + 2 * cout * 4)
    tmp = 6 * (hw + 2 * w) * cin * 4 + 4 * hw * cout * 4

    kern = functools.partial(_conv1_kernel, H=h, W=w,
                             has_shortcut=has_shortcut, cdtype=cdtype)
    return pl.pallas_call(
        kern,
        out_shape=tuple(out_shape),
        grid_spec=pltpu.PrefetchScalarGridSpec(
            num_scalar_prefetch=0,
            grid=(n,),
            in_specs=in_specs,
            out_specs=tuple(out_specs)),
        compiler_params=pltpu.CompilerParams(
            dimension_semantics=("parallel",),          # per-image, no carry
            vmem_limit_bytes=_clamp_vmem(2 * io + tmp)),
    )(*args)


def _call_conv2(y1, s1, g1, b1, w2, n, h, w, cdtype, adtype):
    hw = h * w
    c = y1.shape[-1]
    kern = functools.partial(_conv2_kernel, H=h, W=w,
                             inv_count=1.0 / float(n * hw), cdtype=cdtype)

    io = (hw * c * (y1.dtype.itemsize + _itemsize(adtype))
          + 9 * c * c * _itemsize(cdtype) + 6 * c * 4)
    tmp = 6 * (hw + 2 * w) * c * 4 + 4 * hw * c * 4

    return pl.pallas_call(
        kern,
        out_shape=(jax.ShapeDtypeStruct((n, hw, c), adtype),
                   jax.ShapeDtypeStruct((n, 2, c), jnp.float32)),
        grid_spec=pltpu.PrefetchScalarGridSpec(
            num_scalar_prefetch=0,
            grid=(n,),
            in_specs=[pl.BlockSpec((1, hw, c), lambda i: (i, 0, 0)),
                      pl.BlockSpec((2, c), lambda i: (0, 0)),
                      pl.BlockSpec((1, c), lambda i: (0, 0)),
                      pl.BlockSpec((1, c), lambda i: (0, 0)),
                      pl.BlockSpec((9, c, c), lambda i: (0, 0, 0))],
            out_specs=(pl.BlockSpec((1, hw, c), lambda i: (i, 0, 0)),
                       pl.BlockSpec((1, 2, c), lambda i: (i, 0, 0)))),
        compiler_params=pltpu.CompilerParams(
            dimension_semantics=("parallel",),
            vmem_limit_bytes=_clamp_vmem(2 * io + tmp)),
    )(y1, s1, g1, b1, w2)


def _call_merge(y2f, s2, g2, b2, extra, out_dtype, identity):
    rows, c = y2f.shape
    tile = min(rows, _MERGE_ROW_TILE)                 # rows is a multiple of 8
    grid = (pl.cdiv(rows, tile),)                     # masked tail block
    inv_count = 1.0 / float(rows)

    row_spec = pl.BlockSpec((tile, c), lambda i: (i, 0))
    stat_spec = pl.BlockSpec((2, c), lambda i: (0, 0))
    vec_spec = pl.BlockSpec((1, c), lambda i: (0, 0))

    if identity:
        kern = functools.partial(_merge_identity_kernel, inv_count=inv_count)
        args = [y2f, s2, g2, b2, extra]
        in_specs = [row_spec, stat_spec, vec_spec, vec_spec, row_spec]
        io = tile * c * (y2f.dtype.itemsize + extra.dtype.itemsize
                         + _itemsize(out_dtype))
    else:
        sc, ssc, gs, bs = extra
        kern = functools.partial(_merge_shortcut_kernel, inv_count=inv_count)
        args = [y2f, s2, g2, b2, sc, ssc, gs, bs]
        in_specs = [row_spec, stat_spec, vec_spec, vec_spec,
                    row_spec, stat_spec, vec_spec, vec_spec]
        io = tile * c * (y2f.dtype.itemsize + sc.dtype.itemsize
                         + _itemsize(out_dtype))

    return pl.pallas_call(
        kern,
        out_shape=jax.ShapeDtypeStruct((rows, c), out_dtype),
        grid_spec=pltpu.PrefetchScalarGridSpec(
            num_scalar_prefetch=0,
            grid=grid,
            in_specs=in_specs,
            out_specs=row_spec),
        compiler_params=pltpu.CompilerParams(
            dimension_semantics=("parallel",),
            vmem_limit_bytes=_clamp_vmem(3 * io + 4 * tile * c * 4)),
    )(*args)


# ---------------------------------------------------------------------------
# Public forward
# ---------------------------------------------------------------------------
def basic_block_forward_nhwc(x, params, stride=1,
                             compute_dtype=jnp.bfloat16,
                             act_dtype=jnp.bfloat16):
    assert stride == 1, "only stride=1 implemented"
    n, h, w, cin = x.shape
    cout = params["w1"].shape[-1]
    assert w % 8 == 0, "W must be a multiple of 8 for aligned (8,128) tiling"

    rows = n * h * w
    xf = x.reshape(n, h * w, cin)                    # free (contiguous) reshape

    w1 = params["w1"].reshape(9, cin, cout).astype(compute_dtype)
    w2 = params["w2"].reshape(9, cout, cout).astype(compute_dtype)
    g1 = params["g1"].reshape(1, cout).astype(jnp.float32)
    b1 = params["b1"].reshape(1, cout).astype(jnp.float32)
    g2 = params["g2"].reshape(1, cout).astype(jnp.float32)
    b2 = params["b2"].reshape(1, cout).astype(jnp.float32)

    has_shortcut = stride != 1 or cin != cout
    if has_shortcut:
        ws = params["ws"].astype(compute_dtype)
        y1, s1p, sc, sscp = _call_conv1(xf, w1, ws, n, h, w, cout,
                                        compute_dtype, act_dtype)
        ssc = jnp.sum(sscp, axis=0)                  # tiny (2, C) f32 reduce
    else:
        y1, s1p = _call_conv1(xf, w1, None, n, h, w, cout,
                              compute_dtype, act_dtype)
    s1 = jnp.sum(s1p, axis=0)

    y2, s2p = _call_conv2(y1, s1, g1, b1, w2, n, h, w, compute_dtype, act_dtype)
    s2 = jnp.sum(s2p, axis=0)

    y2f = y2.reshape(rows, cout)
    if has_shortcut:
        gs = params["gs"].reshape(1, cout).astype(jnp.float32)
        bs = params["bs"].reshape(1, cout).astype(jnp.float32)
        out = _call_merge(y2f, s2, g2, b2,
                          (sc.reshape(rows, cout), ssc, gs, bs),
                          x.dtype, identity=False)
    else:
        # Residual in its original dtype; the kernel upcasts (review [9]).
        out = _call_merge(y2f, s2, g2, b2, xf.reshape(rows, cin),
                          x.dtype, identity=True)

    return out.reshape(n, h, w, cout)


def basic_block_forward(x_nchw, params, stride=1,
                        compute_dtype=jnp.bfloat16, act_dtype=jnp.bfloat16):
    """BasicBlock.forward, PyTorch NCHW in / NCHW out."""
    x = jnp.transpose(x_nchw, (0, 2, 3, 1))
    out = basic_block_forward_nhwc(x, params, stride, compute_dtype, act_dtype)
    return jnp.transpose(out, (0, 3, 1, 2))


# ---------------------------------------------------------------------------
# Pure-JAX reference (mirrors the bf16-at-MXU / act-dtype storage numerics)
# ---------------------------------------------------------------------------
def _ref_bn(y, gamma, beta):
    mean = jnp.mean(y, axis=(0, 1, 2), keepdims=True)
    var = jnp.mean(jnp.square(y - mean), axis=(0, 1, 2), keepdims=True)
    return (y - mean) * jax.lax.rsqrt(var + EPS) * gamma + beta


def reference_forward(x_nchw, params, compute_dtype=jnp.bfloat16,
                      act_dtype=jnp.bfloat16):
    x = jnp.transpose(x_nchw, (0, 2, 3, 1)).astype(jnp.float32)
    dn = ("NHWC", "HWIO", "NHWC")

    def conv3x3(hh, ww):
        return jax.lax.conv_general_dilated(
            hh.astype(compute_dtype), ww.astype(compute_dtype), (1, 1), "SAME",
            dimension_numbers=dn, preferred_element_type=jnp.float32)

    y = conv3x3(x, params["w1"]).astype(act_dtype).astype(jnp.float32)
    y = jax.nn.relu(_ref_bn(y, params["g1"], params["b1"]))
    y = conv3x3(y, params["w2"]).astype(act_dtype).astype(jnp.float32)
    y = _ref_bn(y, params["g2"], params["b2"])

    if "ws" in params:
        n, h, w, cin = x.shape
        sc = jnp.dot(x.reshape(-1, cin).astype(compute_dtype),
                     params["ws"].astype(compute_dtype),
                     preferred_element_type=jnp.float32)
        sc = sc.reshape(n, h, w, -1).astype(act_dtype).astype(jnp.float32)
        sc = _ref_bn(sc, params["gs"], params["bs"])
    else:
        sc = x
    out = jax.nn.relu(y + sc)
    return jnp.transpose(out, (0, 3, 1, 2))


# ---------------------------------------------------------------------------
if __name__ == "__main__":
    key = jax.random.PRNGKey(0)
    N, in_planes, H, W = 2, 4, 16, 16
    planes = 8  # in_planes != planes -> exercises the 1x1-conv + BN shortcut

    ks = jax.random.split(key, 12)
    x = jax.random.normal(ks[0], (N, in_planes, H, W), jnp.float32)
    params = {
        "w1": 0.1 * jax.random.normal(ks[1], (3, 3, in_planes, planes), jnp.float32),
        "g1": 1.0 + 0.1 * jax.random.normal(ks[2], (planes,), jnp.float32),
        "b1": 0.1 * jax.random.normal(ks[3], (planes,), jnp.float32),
        "w2": 0.1 * jax.random.normal(ks[4], (3, 3, planes, planes), jnp.float32),
        "g2": 1.0 + 0.1 * jax.random.normal(ks[5], (planes,), jnp.float32),
        "b2": 0.1 * jax.random.normal(ks[6], (planes,), jnp.float32),
        "ws": 0.1 * jax.random.normal(ks[7], (in_planes, planes), jnp.float32),
        "gs": 1.0 + 0.1 * jax.random.normal(ks[8], (planes,), jnp.float32),
        "bs": 0.1 * jax.random.normal(ks[9], (planes,), jnp.float32),
    }

    # --- projection-shortcut path, f32 activation storage (tight check) ---
    out32 = jax.block_until_ready(
        basic_block_forward(x, params, act_dtype=jnp.float32))
    assert out32.shape == (N, planes, H, W), out32.shape
    ref32 = jax.block_until_ready(
        reference_forward(x, params, act_dtype=jnp.float32))
    err32 = float(jnp.max(jnp.abs(out32 - ref32)))
    assert jnp.allclose(out32, ref32, atol=2e-3, rtol=2e-3), err32

    # --- projection-shortcut path, default bf16 activation storage ---
    out = jax.block_until_ready(basic_block_forward(x, params))
    ref = jax.block_until_ready(reference_forward(x, params))
    err = float(jnp.max(jnp.abs(out - ref)))
    assert jnp.allclose(out, ref, atol=2e-2, rtol=2e-2), err

    # --- identity-shortcut path (in_planes == planes) ---
    x_id = jax.random.normal(ks[10], (N, planes, H, W), jnp.float32)
    params_id = {
        "w1": 0.1 * jax.random.normal(ks[11], (3, 3, planes, planes), jnp.float32),
        "g1": params["g1"], "b1": params["b1"],
        "w2": params["w2"], "g2": params["g2"], "b2": params["b2"],
    }
    out_id = jax.block_until_ready(basic_block_forward(x_id, params_id))
    ref_id = jax.block_until_ready(reference_forward(x_id, params_id))
    err_id = float(jnp.max(jnp.abs(out_id - ref_id)))
    assert jnp.allclose(out_id, ref_id, atol=2e-2, rtol=2e-2), err_id

    print("KERNEL_OK")
</pallas_src>

<mosaic_0001>
module attributes {stable_mosaic.version = 11 : i64} {
  func.func @_conv1_kernel(%arg0: i32, %arg1: memref<1x256x4xf32, #tpu.memory_space<vmem>>, %arg2: memref<9x4x8xbf16, #tpu.memory_space<vmem>>, %arg3: memref<4x8xbf16, #tpu.memory_space<vmem>>, %arg4: memref<1x256x8xf32, #tpu.memory_space<vmem>>, %arg5: memref<1x2x8xf32, #tpu.memory_space<vmem>>, %arg6: memref<1x256x8xf32, #tpu.memory_space<vmem>>, %arg7: memref<1x2x8xf32, #tpu.memory_space<vmem>>) attributes {dimension_semantics = [#tpu.dimension_semantics<parallel>], iteration_bounds = array<i64: 2>, scalar_prefetch = 0 : i64, scratch_operands = 0 : i64, tpu.core_type = #tpu.core_type<tc>, window_params = [{transform_indices = @transform_0, window_bounds = array<i64: 1, 256, 4>}, {pipeline_mode = #tpu.pipeline_mode<synchronous>, transform_indices = @transform_1, window_bounds = array<i64: 9, 4, 8>}, {pipeline_mode = #tpu.pipeline_mode<synchronous>, transform_indices = @transform_2, window_bounds = array<i64: 4, 8>}, {transform_indices = @transform_3, window_bounds = array<i64: 1, 256, 8>}, {transform_indices = @transform_4, window_bounds = array<i64: 1, 2, 8>}, {transform_indices = @transform_5, window_bounds = array<i64: 1, 256, 8>}, {transform_indices = @transform_6, window_bounds = array<i64: 1, 2, 8>}]} {
    %c0 = arith.constant 0 : index
    %c0_0 = arith.constant 0 : index
    %c0_1 = arith.constant 0 : index
    %0 = vector.load %arg1[%c0, %c0_0, %c0_1] : memref<1x256x4xf32, #tpu.memory_space<vmem>>, vector<1x256x4xf32>
    %1 = vector.shape_cast %0 : vector<1x256x4xf32> to vector<256x4xf32>
    %cst = arith.constant 0.000000e+00 : f32
    %2 = vector.broadcast %cst : f32 to vector<16x4xf32>
    %3 = tpu.concatenate %2, %1, %2 in 0 : vector<16x4xf32>, vector<256x4xf32>, vector<16x4xf32> -> vector<288x4xf32>
    %4 = tpu.iota {dimensions = array<i32: 1>} : vector<18x16x4xi32>
    %5 = vector.shape_cast %4 : vector<18x16x4xi32> to vector<288x4xi32>
    %c0_i32 = arith.constant 0 : i32
    %6 = vector.broadcast %c0_i32 : i32 to vector<288x4xi32>
    %7 = arith.cmpi eq, %5, %6 : vector<288x4xi32>
    %c1_i32 = arith.constant 1 : i32
    %8 = tpu.dynamic_rotate %3 by %c1_i32 dim 0 : vector<288x4xf32>, i32 -> vector<288x4xf32>
    %cst_2 = arith.constant 0.000000e+00 : f32
    %9 = vector.broadcast %cst_2 : f32 to vector<288x4xf32>
    %10 = arith.select %7, %9, %8 : vector<288x4xi1>, vector<288x4xf32>
    %c15_i32 = arith.constant 15 : i32
    %11 = vector.broadcast %c15_i32 : i32 to vector<288x4xi32>
    %12 = arith.cmpi eq, %5, %11 : vector<288x4xi32>
    %c287_i32 = arith.constant 287 : i32
    %13 = tpu.dynamic_rotate %3 by %c287_i32 dim 0 : vector<288x4xf32>, i32 -> vector<288x4xf32>
    %cst_3 = arith.constant 0.000000e+00 : f32
    %14 = vector.broadcast %cst_3 : f32 to vector<288x4xf32>
    %15 = arith.select %12, %14, %13 : vector<288x4xi1>, vector<288x4xf32>
    %16 = arith.truncf %10 : vector<288x4xf32> to vector<288x4xbf16>
    %17 = arith.truncf %3 : vector<288x4xf32> to vector<288x4xbf16>
    %18 = arith.truncf %15 : vector<288x4xf32> to vector<288x4xbf16>
    %cst_4 = arith.constant 0.000000e+00 : f32
    %19 = vector.broadcast %cst_4 : f32 to vector<256x8xf32>
    %20 = vector.extract_strided_slice %16 {offsets = [0, 0], sizes = [256, 4], strides = [1, 1]} : vector<288x4xbf16> to vector<256x4xbf16>
    %c0_5 = arith.constant 0 : index
    %c0_6 = arith.constant 0 : index
    %c0_7 = arith.constant 0 : index
    %21 = vector.load %arg2[%c0_5, %c0_6, %c0_7] : memref<9x4x8xbf16, #tpu.memory_space<vmem>>, vector<1x4x8xbf16>
    %22 = vector.shape_cast %21 : vector<1x4x8xbf16> to vector<4x8xbf16>
    %cst_8 = arith.constant dense<0.000000e+00> : vector<256x8xf32>
    %23 = tpu.matmul %20, %22, %cst_8 {dimension_numbers = #tpu.dot_dimension_numbers<[1], [0], [0], [1], [0, 0, 1, 1], [], []>} : vector<256x4xbf16>, vector<4x8xbf16>, vector<256x8xf32> -> vector<256x8xf32>
    %24 = arith.addf %19, %23 : vector<256x8xf32>
    %25 = vector.extract_strided_slice %17 {offsets = [0, 0], sizes = [256, 4], strides = [1, 1]} : vector<288x4xbf16> to vector<256x4xbf16>
    %c1 = arith.constant 1 : index
    %c0_9 = arith.constant 0 : index
    %c0_10 = arith.constant 0 : index
    %26 = vector.load %arg2[%c1, %c0_9, %c0_10] : memref<9x4x8xbf16, #tpu.memory_space<vmem>>, vector<1x4x8xbf16>
    %27 = vector.shape_cast %26 : vector<1x4x8xbf16> to vector<4x8xbf16>
    %cst_11 = arith.constant dense<0.000000e+00> : vector<256x8xf32>
    %28 = tpu.matmul %25, %27, %cst_11 {dimension_numbers = #tpu.dot_dimension_numbers<[1], [0], [0], [1], [0, 0, 1, 1], [], []>} : vector<256x4xbf16>, vector<4x8xbf16>, vector<256x8xf32> -> vector<256x8xf32>
    %29 = arith.addf %24, %28 : vector<256x8xf32>
    %30 = vector.extract_strided_slice %18 {offsets = [0, 0], sizes = [256, 4], strides = [1, 1]} : vector<288x4xbf16> to vector<256x4xbf16>
    %c2 = arith.constant 2 : index
    %c0_12 = arith.constant 0 : index
    %c0_13 = arith.constant 0 : index
    %31 = vector.load %arg2[%c2, %c0_12, %c0_13] : memref<9x4x8xbf16, #tpu.memory_space<vmem>>, vector<1x4x8xbf16>
    %32 = vector.shape_cast %31 : vector<1x4x8xbf16> to vector<4x8xbf16>
    %cst_14 = arith.constant dense<0.000000e+00> : vector<256x8xf32>
    %33 = tpu.matmul %30, %32, %cst_14 {dimension_numbers = #tpu.dot_dimension_numbers<[1], [0], [0], [1], [0, 0, 1, 1], [], []>} : vector<256x4xbf16>, vector<4x8xbf16>, vector<256x8xf32> -> vector<256x8xf32>
    %34 = arith.addf %29, %33 : vector<256x8xf32>
    %35 = vector.extract_strided_slice %16 {offsets = [16, 0], sizes = [256, 4], strides = [1, 1]} : vector<288x4xbf16> to vector<256x4xbf16>
    %c3 = arith.constant 3 : index
    %c0_15 = arith.constant 0 : index
    %c0_16 = arith.constant 0 : index
    %36 = vector.load %arg2[%c3, %c0_15, %c0_16] : memref<9x4x8xbf16, #tpu.memory_space<vmem>>, vector<1x4x8xbf16>
    %37 = vector.shape_cast %36 : vector<1x4x8xbf16> to vector<4x8xbf16>
    %cst_17 = arith.constant dense<0.000000e+00> : vector<256x8xf32>
    %38 = tpu.matmul %35, %37, %cst_17 {dimension_numbers = #tpu.dot_dimension_numbers<[1], [0], [0], [1], [0, 0, 1, 1], [], []>} : vector<256x4xbf16>, vector<4x8xbf16>, vector<256x8xf32> -> vector<256x8xf32>
    %39 = arith.addf %34, %38 : vector<256x8xf32>
    %40 = vector.extract_strided_slice %17 {offsets = [16, 0], sizes = [256, 4], strides = [1, 1]} : vector<288x4xbf16> to vector<256x4xbf16>
    %c4 = arith.constant 4 : index
    %c0_18 = arith.constant 0 : index
    %c0_19 = arith.constant 0 : index
    %41 = vector.load %arg2[%c4, %c0_18, %c0_19] : memref<9x4x8xbf16, #tpu.memory_space<vmem>>, vector<1x4x8xbf16>
    %42 = vector.shape_cast %41 : vector<1x4x8xbf16> to vector<4x8xbf16>
    %cst_20 = arith.constant dense<0.000000e+00> : vector<256x8xf32>
    %43 = tpu.matmul %40, %42, %cst_20 {dimension_numbers = #tpu.dot_dimension_numbers<[1], [0], [0], [1], [0, 0, 1, 1], [], []>} : vector<256x4xbf16>, vector<4x8xbf16>, vector<256x8xf32> -> vector<256x8xf32>
    %44 = arith.addf %39, %43 : vector<256x8xf32>
    %45 = vector.extract_strided_slice %18 {offsets = [16, 0], sizes = [256, 4], strides = [1, 1]} : vector<288x4xbf16> to vector<256x4xbf16>
    %c5 = arith.constant 5 : index
    %c0_21 = arith.constant 0 : index
    %c0_22 = arith.constant 0 : index
    %46 = vector.load %arg2[%c5, %c0_21, %c0_22] : memref<9x4x8xbf16, #tpu.memory_space<vmem>>, vector<1x4x8xbf16>
    %47 = vector.shape_cast %46 : vector<1x4x8xbf16> to vector<4x8xbf16>
    %cst_23 = arith.constant dense<0.000000e+00> : vector<256x8xf32>
    %48 = tpu.matmul %45, %47, %cst_23 {dimension_numbers = #tpu.dot_dimension_numbers<[1], [0], [0], [1], [0, 0, 1, 1], [], []>} : vector<256x4xbf16>, vector<4x8xbf16>, vector<256x8xf32> -> vector<256x8xf32>
    %49 = arith.addf %44, %48 : vector<256x8xf32>
    %50 = vector.extract_strided_slice %16 {offsets = [32, 0], sizes = [256, 4], strides = [1, 1]} : vector<288x4xbf16> to vector<256x4xbf16>
    %c6 = arith.constant 6 : index
    %c0_24 = arith.constant 0 : index
    %c0_25 = arith.constant 0 : index
    %51 = vector.load %arg2[%c6, %c0_24, %c0_25] : memref<9x4x8xbf16, #tpu.memory_space<vmem>>, vector<1x4x8xbf16>
    %52 = vector.shape_cast %51 : vector<1x4x8xbf16> to vector<4x8xbf16>
    %cst_26 = arith.constant dense<0.000000e+00> : vector<256x8xf32>
    %53 = tpu.matmul %50, %52, %cst_26 {dimension_numbers = #tpu.dot_dimension_numbers<[1], [0], [0], [1], [0, 0, 1, 1], [], []>} : vector<256x4xbf16>, vector<4x8xbf16>, vector<256x8xf32> -> vector<256x8xf32>
    %54 = arith.addf %49, %53 : vector<256x8xf32>
    %55 = vector.extract_strided_slice %17 {offsets = [32, 0], sizes = [256, 4], strides = [1, 1]} : vector<288x4xbf16> to vector<256x4xbf16>
    %c7 = arith.constant 7 : index
    %c0_27 = arith.constant 0 : index
    %c0_28 = arith.constant 0 : index
    %56 = vector.load %arg2[%c7, %c0_27, %c0_28] : memref<9x4x8xbf16, #tpu.memory_space<vmem>>, vector<1x4x8xbf16>
    %57 = vector.shape_cast %56 : vector<1x4x8xbf16> to vector<4x8xbf16>
    %cst_29 = arith.constant dense<0.000000e+00> : vector<256x8xf32>
    %58 = tpu.matmul %55, %57, %cst_29 {dimension_numbers = #tpu.dot_dimension_numbers<[1], [0], [0], [1], [0, 0, 1, 1], [], []>} : vector<256x4xbf16>, vector<4x8xbf16>, vector<256x8xf32> -> vector<256x8xf32>
    %59 = arith.addf %54, %58 : vector<256x8xf32>
    %60 = vector.extract_strided_slice %18 {offsets = [32, 0], sizes = [256, 4], strides = [1, 1]} : vector<288x4xbf16> to vector<256x4xbf16>
    %c8 = arith.constant 8 : index
    %c0_30 = arith.constant 0 : index
    %c0_31 = arith.constant 0 : index
    %61 = vector.load %arg2[%c8, %c0_30, %c0_31] : memref<9x4x8xbf16, #tpu.memory_space<vmem>>, vector<1x4x8xbf16>
    %62 = vector.shape_cast %61 : vector<1x4x8xbf16> to vector<4x8xbf16>
    %cst_32 = arith.constant dense<0.000000e+00> : vector<256x8xf32>
    %63 = tpu.matmul %60, %62, %cst_32 {dimension_numbers = #tpu.dot_dimension_numbers<[1], [0], [0], [1], [0, 0, 1, 1], [], []>} : vector<256x4xbf16>, vector<4x8xbf16>, vector<256x8xf32> -> vector<256x8xf32>
    %64 = arith.addf %59, %63 : vector<256x8xf32>
    %c0_33 = arith.constant 0 : index
    %c0_34 = arith.constant 0 : index
    %c0_35 = arith.constant 0 : index
    %65 = vector.load %arg4[%c0_33, %c0_34, %c0_35] : memref<1x256x8xf32, #tpu.memory_space<vmem>>, vector<1x256x8xf32>
    %66 = vector.shape_cast %65 : vector<1x256x8xf32> to vector<256x8xf32>
    %67 = vector.shape_cast %64 : vector<256x8xf32> to vector<1x256x8xf32>
    tpu.vector_store %arg4[%c0_33, %c0_34, %c0_35], %67 {strides = array<i32>} : memref<1x256x8xf32, #tpu.memory_space<vmem>>, vector<1x256x8xf32>,
    %cst_36 = arith.constant dense<0.000000e+00> : vector<8xf32>
    %68 = vector.multi_reduction <add>, %64, %cst_36 [0] : vector<256x8xf32> to vector<8xf32>
    %69 = vector.shape_cast %68 : vector<8xf32> to vector<1x8xf32>
    %70 = arith.mulf %64, %64 : vector<256x8xf32>
    %cst_37 = arith.constant dense<0.000000e+00> : vector<8xf32>
    %71 = vector.multi_reduction <add>, %70, %cst_37 [0] : vector<256x8xf32> to vector<8xf32>
    %72 = vector.shape_cast %71 : vector<8xf32> to vector<1x8xf32>
    %73 = tpu.concatenate %69, %72 in 0 : vector<1x8xf32>, vector<1x8xf32> -> vector<2x8xf32>
    %c0_38 = arith.constant 0 : index
    %c0_39 = arith.constant 0 : index
    %c0_40 = arith.constant 0 : index
    %74 = vector.load %arg5[%c0_38, %c0_39, %c0_40] : memref<1x2x8xf32, #tpu.memory_space<vmem>>, vector<1x2x8xf32>
    %75 = vector.shape_cast %74 : vector<1x2x8xf32> to vector<2x8xf32>
    %76 = vector.shape_cast %73 : vector<2x8xf32> to vector<1x2x8xf32>
    tpu.vector_store %arg5[%c0_38, %c0_39, %c0_40], %76 {strides = array<i32>} : memref<1x2x8xf32, #tpu.memory_space<vmem>>, vector<1x2x8xf32>,
    %77 = arith.truncf %1 : vector<256x4xf32> to vector<256x4xbf16>
    %c0_41 = arith.constant 0 : index
    %c0_42 = arith.constant 0 : index
    %78 = vector.load %arg3[%c0_41, %c0_42] : memref<4x8xbf16, #tpu.memory_space<vmem>>, vector<4x8xbf16>
    %cst_43 = arith.constant dense<0.000000e+00> : vector<256x8xf32>
    %79 = tpu.matmul %77, %78, %cst_43 {dimension_numbers = #tpu.dot_dimension_numbers<[1], [0], [0], [1], [0, 0, 1, 1], [], []>} : vector<256x4xbf16>, vector<4x8xbf16>, vector<256x8xf32> -> vector<256x8xf32>
    %c0_44 = arith.constant 0 : index
    %c0_45 = arith.constant 0 : index
    %c0_46 = arith.constant 0 : index
    %80 = vector.load %arg6[%c0_44, %c0_45, %c0_46] : memref<1x256x8xf32, #tpu.memory_space<vmem>>, vector<1x256x8xf32>
    %81 = vector.shape_cast %80 : vector<1x256x8xf32> to vector<256x8xf32>
    %82 = vector.shape_cast %79 : vector<256x8xf32> to vector<1x256x8xf32>
    tpu.vector_store %arg6[%c0_44, %c0_45, %c0_46], %82 {strides = array<i32>} : memref<1x256x8xf32, #tpu.memory_space<vmem>>, vector<1x256x8xf32>,
    %cst_47 = arith.constant dense<0.000000e+00> : vector<8xf32>
    %83 = vector.multi_reduction <add>, %79, %cst_47 [0] : vector<256x8xf32> to vector<8xf32>
    %84 = vector.shape_cast %83 : vector<8xf32> to vector<1x8xf32>
    %85 = arith.mulf %79, %79 : vector<256x8xf32>
    %cst_48 = arith.constant dense<0.000000e+00> : vector<8xf32>
    %86 = vector.multi_reduction <add>, %85, %cst_48 [0] : vector<256x8xf32> to vector<8xf32>
    %87 = vector.shape_cast %86 : vector<8xf32> to vector<1x8xf32>
    %88 = tpu.concatenate %84, %87 in 0 : vector<1x8xf32>, vector<1x8xf32> -> vector<2x8xf32>
    %c0_49 = arith.constant 0 : index
    %c0_50 = arith.constant 0 : index
    %c0_51 = arith.constant 0 : index
    %89 = vector.load %arg7[%c0_49, %c0_50, %c0_51] : memref<1x2x8xf32, #tpu.memory_space<vmem>>, vector<1x2x8xf32>
    %90 = vector.shape_cast %89 : vector<1x2x8xf32> to vector<2x8xf32>
    %91 = vector.shape_cast %88 : vector<2x8xf32> to vector<1x2x8xf32>
    tpu.vector_store %arg7[%c0_49, %c0_50, %c0_51], %91 {strides = array<i32>} : memref<1x2x8xf32, #tpu.memory_space<vmem>>, vector<1x2x8xf32>,
    return
  }
  func.func @transform_0(%arg0: i32) -> (i32, i32, i32) {
    %c0_i32 = arith.constant 0 : i32
    %c0_i32_0 = arith.constant 0 : i32
    %c0_i32_1 = arith.constant 0 : i32
    return %arg0, %c0_i32, %c0_i32_0 : i32, i32, i32
  }
  func.func @transform_1(%arg0: i32) -> (i32, i32, i32) {
    %c0_i32 = arith.constant 0 : i32
    %c0_i32_0 = arith.constant 0 : i32
    %c0_i32_1 = arith.constant 0 : i32
    %c0_i32_2 = arith.constant 0 : i32
    return %c0_i32, %c0_i32_0, %c0_i32_1 : i32, i32, i32
  }
  func.func @transform_2(%arg0: i32) -> (i32, i32) {
    %c0_i32 = arith.constant 0 : i32
    %c0_i32_0 = arith.constant 0 : i32
    %c0_i32_1 = arith.constant 0 : i32
    return %c0_i32, %c0_i32_0 : i32, i32
  }
  func.func @transform_3(%arg0: i32) -> (i32, i32, i32) {
    %c0_i32 = arith.constant 0 : i32
    %c0_i32_0 = arith.constant 0 : i32
    %c0_i32_1 = arith.constant 0 : i32
    return %arg0, %c0_i32, %c0_i32_0 : i32, i32, i32
  }
  func.func @transform_4(%arg0: i32) -> (i32, i32, i32) {
    %c0_i32 = arith.constant 0 : i32
    %c0_i32_0 = arith.constant 0 : i32
    %c0_i32_1 = arith.constant 0 : i32
    return %arg0, %c0_i32, %c0_i32_0 : i32, i32, i32
  }
  func.func @transform_5(%arg0: i32) -> (i32, i32, i32) {
    %c0_i32 = arith.constant 0 : i32
    %c0_i32_0 = arith.constant 0 : i32
    %c0_i32_1 = arith.constant 0 : i32
    return %arg0, %c0_i32, %c0_i32_0 : i32, i32, i32
  }
  func.func @transform_6(%arg0: i32) -> (i32, i32, i32) {
    %c0_i32 = arith.constant 0 : i32
    %c0_i32_0 = arith.constant 0 : i32
    %c0_i32_1 = arith.constant 0 : i32
    return %arg0, %c0_i32, %c0_i32_0 : i32, i32, i32
  }
}

</mosaic_0001>

<bundles_post_ra>
// kernel: tpu_custom_call.1
= control target key start
LH: loop header
LB: loop body
LE: loop exit
PB: predicated region body
PF: predicated region fallthrough
CT: control target
= control target key end

     0   :  { %12 = vsyncpa [#allocation3], 0  ;;  %s4827_s0 = inlined_call_operand.vmem [shape: f32[2,256,4], index: 0, kind: input, shape index: {}]   ;;  %s4828_s1 = inlined_call_operand.vmem [shape: bf16[9,4,8], index: 1, kind: input, shape index: {}]   ;;  %s4829_s2 = inlined_call_operand.vmem [shape: bf16[4,8], index: 2, kind: input, shape index: {}]   ;;  %s4830_s3 = inlined_call_operand.vmem [shape: f32[2,256,8], index: 3, kind: output, shape index: {0}]   ;;  %s4831_s4 = inlined_call_operand.hbm [shape: f32[2,2,8], index: 4, kind: output, shape index: {1}]   ;;  %s4832_s5 = inlined_call_operand.vmem [shape: f32[2,256,8], index: 5, kind: output, shape index: {2}]   ;;  %s4833_s6 = inlined_call_operand.hbm [shape: f32[2,2,8], index: 6, kind: output, shape index: {3}]  }
   0x1   :  { %14 = vsyncpa [#allocation3 + $0x1], 0 }
   0x2   :  { %15 = vsyncpa [#allocation5], 0 }
   0x3   :  { %17 = vsyncpa [#allocation5 + $0x1], 0  ;;  %s3280_s21 = smov 0   ;;  %s3282_s22 = smov 0  }
   0x4   :  { %s3284_s23 = smov 0   ;;  %s3286_s24 = smov 0  }
   0x5 LB: > { %s3301_s25 = sadd.s32 4294967295, %s3242_s24   ;;  %s2880_s26 = sadd.s32 4294967294, %s3242_s24   ;;  %s3242_s24 = sphi %s3286_s24, %s4980_s24   ;;  %s3238_s23 = sphi %s3284_s23, %s4979_s23   ;;  %s3234_s22 = sphi %s3282_s22, %s4978_s22   ;;  %s3230_s21 = sphi %s3280_s21, %s4977_s21  }
   0x6   : > { %s3305_s27 = sadd.s32 1, %s3242_s24   ;;  %s124_s28 = sadd.s32 1, %s3238_s23 }
   0x7   : > { %s121_s29 = ssub.s32 %s3242_s24, %s3305_s27  ;;  %p134_p0 = scmp.ne.s32.totalorder %s3238_s23, %s3234_s22 }
   0x8   : > { %p122_p1 = scmp.eq.s32.totalorder %s121_s29, 0  ;;  %p135_p2 = scmp.eq.s32.totalorder %s3301_s25, 1 }
   0x9   : > { %p140_p3 = scmp.ne.s32.totalorder %s3234_s22, %s3230_s21  ;;  %p141_p4 = scmp.eq.s32.totalorder %s2880_s26, 1 }
   0xa   : > { %s3316_s30 = scalar_select %p122_p1, %s3238_s23, %s124_s28  }
   0xb   : > { %p3318_p5 = por %p135_p2, %p134_p0  ;;  %p3322_p6 = por %p141_p4, %p140_p3 }
   0xc   : > { %p2883_p7 = scmp.ge.s32.totalorder %s3242_s24, 1  ;;  %p225_p8 = scmp.lt.s32.totalorder %s3242_s24, 3 }
   0xe   : > { %p226_p9 = pnand %p2883_p7, %p225_p8 }
  0x10   : > { %229 = sbr.rel (%p226_p9) target bundleno = 828 (0x33c), region = 32 }
  0x15   : > { %v630_v0 = vld [vmem:[%s4828_s1] sm:$0x3]  ;;  %vm760_vm0 = vcmask 1041408   ;;  %p270_p10 = scmp.lt.s32.totalorder %s3301_s25, 1  ;;  %v318_v1 = vlaneseq  ;;  %v3244_v3 = vmov 0.0|0.0   ;;  %vm711_vm1 = vcmask 31744  }
  0x16   : > { %v982_v2 = vsel %vm760_vm0, %v630_v0, 0  ;;  %v3333_v4 = vunpack.c.l.b16 %v3244_v3  ;;  %v2892_v5 = vld [vmem:[%s4828_s1 + $0x2] sm:$0x3]  ;;  %v2925_v6 = vld [vmem:[%s4828_s1 + $0x4] sm:$0x3]  ;;  %vm2119_vm6 = vcmask 64512  }
  0x17   : > { %991 = vmatpush.bf16.msra.mxu1 %v982_v2  ;;  %v762_v7 = vsel %vm760_vm0, %v2892_v5, 0  ;;  %s271_s15 = scalar_select %p270_p10, %s3301_s25, 1  ;;  %3070 = vmatpush.bf16.msra.mxu3 %v982_v2  ;;  %v1204_v8 = vsel %vm760_vm0, %v2925_v6, 0  ;;  %v2942_v9 = vld [vmem:[%s4828_s1 + $0x6] sm:$0x3]  ;;  %v3351_v11 = vshrl.u32 %v318_v1, 7 }
  0x18   : > { %4876 = vst [vmem:[#allocation8_spill] sm:$0xff] %v3333_v4  ;;  %v3349_v10 = vpack.c.b16 %v3333_v4, %v3333_v4  ;;  %3069 = vmatpush.bf16.msra.mxu2 %v762_v7  ;;  %771 = vmatpush.bf16.msra.mxu0 %v762_v7  ;;  %v1338_v12 = vsel %vm760_vm0, %v2942_v9, 0  ;;  %v2959_v13 = vld [vmem:[%s4828_s1 + $0x8] sm:$0x3]  ;;  %v2976_v14 = vld [vmem:[%s4828_s1 + $0xa] sm:$0x3] }
  0x19   : > { %s3360_s28 = sshll.u32 %s271_s15, 8  ;;  %v1472_v15 = vsel %vm760_vm0, %v2959_v13, 0  ;;  %v1606_v16 = vsel %vm760_vm0, %v2976_v14, 0  ;;  %vm321_vm2 = vcmp.eq.s32.totalorder %v3351_v11, 0  ;;  %vm355_vm3 = vcmp.lt.s32.totalorder %v3351_v11, 1  ;;  %s3168_s13 = scalar_lea.hbm %s4833_s6, 4 }
  0x1a   : > { %4877 = vst [vmem:[#allocation9_spill] sm:$0xff] %v3349_v10  ;;  %2909 = vmatmul.msk.bf16.vlgmr.msra.gmra.mxu1 %vm711_vm1, %v3349_v10  ;;  %s3369_s10 = scalar_lea.vmem %s4827_s0, %s3360_s28  ;;  %vm458_vm4 = vcmp.lt.s32.totalorder %v3351_v11, 7  ;;  %s4333_s26 = scalar_lea.vmem %s4832_s5, %s3360_s28  ;;  %vm2322_vm7 = vcmask 1040384   ;;  %vm2324_vm8 = vcmask 58368  }
  0x1b   : > { %1347 = vmatpush.bf16.msrb.mxu3 %v1338_v12  ;;  %v3373_v17 = vld [vmem:[%s3369_s10 + $0x70] sm:$0xff]  ;;  %v3376_v18 = vld [vmem:[%s3369_s10 + $0x78] sm:$0xff]  ;;  %2893 = vmatmul.msk.bf16.vlgmr.msra.gmra.mxu0 %vm711_vm1, %v3349_v10  ;;  %v3381_v19 = vld [vmem:[%s3369_s10 + $0x68] sm:$0xff]  ;;  %s4376_s11 = scalar_lea.vmem %s4830_s3, %s3360_s28  ;;  %s4752_s28 = sand.u32 1, %s3234_s22  }
  0x1c   : > { %1213 = vmatpush.bf16.msrb.mxu2 %v1204_v8  ;;  %1481 = vmatpush.bf16.msrb.mxu0 %v1472_v15  ;;  %v577_v20 = vpack.c.bf16 %v3373_v17, %v3373_v17  ;;  %v578_v21 = vpack.c.bf16 %v3376_v18, %v3376_v18  ;;  %v3390_v22 = vld [vmem:[%s3369_s10] sm:$0xff]  ;;  %v3393_v23 = vld [vmem:[%s3369_s10 + $0x8] sm:$0xff]  ;;  %v4834_v24 = vrot.slane %v3381_v19, 7  ;;  %v337_v25 = vrot.slane %v3373_v17, 7  ;;  %v3427_v46 = vld [vmem:[%s3369_s10 + $0x10] sm:$0xff]  ;;  %s2884_s12 = sshll.u32 %s4752_s28, 1 }
  0x1d   : > { %1615 = vmatpush.bf16.msrb.mxu1 %v1606_v16  ;;  %v338_v26 = vrot.slane %v3376_v18, 7  ;;  %v323_v27 = vrot.slane %v3390_v22, 7  ;;  %v324_v30 = vrot.slane %v3393_v23, 7  ;;  %v3417_v41 = vld [vmem:[%s3369_s10 + $0x80] sm:$0xff]  ;;  %v3422_v44 = vld [vmem:[%s3369_s10 + $0x88] sm:$0xff]  ;;  %v563_v45 = vpack.c.bf16 %v3390_v22, %v3390_v22  ;;  %v3433_v53 = vld [vmem:[%s3369_s10 + $0x18] sm:$0xff] }
  0x1e   : > { %v679_v28 = vunpack.c.l.b16 %v577_v20  ;;  %v680_v29 = vunpack.c.l.b16 %v578_v21  ;;  %v374_v32 = vsel %vm355_vm3, %v4834_v24, %v337_v25  ;;  %v564_v49 = vpack.c.bf16 %v3393_v23, %v3393_v23  ;;  %v3469_v15 = vld [vmem:[%s3369_s10 + $0x90] sm:$0xff]  ;;  %s269_s16 = scalar_lea.vmem [#allocation4], %s2884_s12  ;;  %s2703_s19 = scalar_lea.sflag [#allocation5], %s4752_s28 }
  0x1f   : > { %v373_v31 = vsel %vm355_vm3, %v337_v25, %v338_v26  ;;  %v388_v33 = vsel %vm355_vm3, 0.0, %v323_v27  ;;  %v405_v35 = vsel %vm321_vm2, 0.0, %v374_v32  ;;  %v387_v37 = vsel %vm355_vm3, %v323_v27, %v324_v30  ;;  %s2735_s17 = sshll.u32 %s269_s16, 4  ;;  %s2736_s17 = int_to_ptr.vmem [resolvable:$true] %s2735_s17 }
  0x20   : > { %v3408_v34 = vpack.c.b16 %v680_v29, %v679_v28  ;;  %v544_v36 = vpack.c.bf16 %v373_v31, %v373_v31  ;;  %v543_v38 = vpack.c.bf16 %v405_v35, %v405_v35  ;;  %v391_v39 = vsel %vm321_vm2, 0.0, %v388_v33  ;;  %v3480_v28 = vld [vmem:[%s3369_s10 + $0x20] sm:$0xff] }
  0x21   : > { %v530_v40 = vpack.c.bf16 %v387_v37, %v387_v37  ;;  %v529_v43 = vpack.c.bf16 %v391_v39, %v391_v39  ;;  %v665_v51 = vunpack.c.l.b16 %v563_v45  ;;  %v339_v52 = vrot.slane %v3417_v41, 7 }
  0x22   : > { %4878 = vst [vmem:[#allocation10_spill] sm:$0xff] %v3408_v34  ;;  %2901 = vmatmul.msk.bf16.vlgmr.msra.gmra.mxu2 %vm711_vm1, %v3408_v34  ;;  %v902_v42 = vunpack.c.l.b16 %v544_v36  ;;  %v901_v47 = vunpack.c.l.b16 %v543_v38  ;;  %v666_v55 = vunpack.c.l.b16 %v564_v49  ;;  %v340_v56 = vrot.slane %v3422_v44, 7  ;;  %v3488_v36 = vld [vmem:[%s3369_s10 + $0x28] sm:$0xff] }
  0x23   : > { %v888_v48 = vunpack.c.l.b16 %v530_v40  ;;  %v887_v50 = vunpack.c.l.b16 %v529_v43  ;;  %v325_v57 = vrot.slane %v3427_v46, 7  ;;  %v579_v59 = vpack.c.bf16 %v3417_v41, %v3417_v41 }
  0x24   : > { %v3435_v54 = vpack.c.b16 %v902_v42, %v901_v47  ;;  %v580_v60 = vpack.c.bf16 %v3422_v44, %v3422_v44  ;;  %v372_v61 = vsel %vm355_vm3, %v338_v26, %v339_v52  ;;  %v3449_v62 = vpack.c.b16 %v666_v55, %v665_v51  ;;  %v3476_v26 = vld [vmem:[%s3369_s10 + $0x98] sm:$0xff] }
  0x25   : > { %v3439_v58 = vpack.c.b16 %v888_v48, %v887_v50  ;;  %v326_v63 = vrot.slane %v3433_v53, 7  ;;  %v371_v0 = vsel %vm355_vm3, %v339_v52, %v340_v56  ;;  %v407_v1 = vsel %vm321_vm2, 0.0, %v372_v61 }
  0x26   : > { %4879 = vst [vmem:[#allocation11_spill] sm:$0xff] %v3435_v54  ;;  %2917 = vmatmul.msk.bf16.vlgmr.msra.gmra.mxu3 %vm711_vm1, %v3435_v54  ;;  %v386_v2 = vsel %vm355_vm3, %v324_v30, %v325_v57  ;;  %v681_v3 = vunpack.c.l.b16 %v579_v59  ;;  %v682_v5 = vunpack.c.l.b16 %v580_v60  ;;  %v545_v6 = vpack.c.bf16 %v407_v1, %v407_v1 }
  0x27   : > { %v546_v7 = vpack.c.bf16 %v371_v0, %v371_v0  ;;  %v385_v8 = vsel %vm355_vm3, %v325_v57, %v326_v63  ;;  %v393_v9 = vsel %vm321_vm2, 0.0, %v386_v2  ;;  %v565_v21 = vpack.c.bf16 %v3427_v46, %v3427_v46 }
  0x28   : > { %v3466_v12 = vpack.c.b16 %v682_v5, %v681_v3  ;;  %v531_v13 = vpack.c.bf16 %v393_v9, %v393_v9  ;;  %v532_v14 = vpack.c.bf16 %v385_v8, %v385_v8  ;;  %v903_v16 = vunpack.c.l.b16 %v545_v6  ;;  %v3528_v5 = vld [vmem:[%s3369_s10 + $0xa8] sm:$0xff] }
  0x29   : > { %v904_v20 = vunpack.c.l.b16 %v546_v7  ;;  %v566_v25 = vpack.c.bf16 %v3433_v53, %v3433_v53  ;;  %v341_v27 = vrot.slane %v3469_v15, 7  ;;  %v667_v32 = vunpack.c.l.b16 %v565_v21  ;;  %v3532_v7 = vld [vmem:[%s3369_s10 + $0x30] sm:$0xff]  ;;  %v3540_v21 = vld [vmem:[%s3369_s10 + $0x38] sm:$0xff] }
  0x2a   : > { %2910 = vmatmul.msk.bf16.gmra.mxu1 %vm711_vm1, %v3439_v58  ;;  %4880 = vst [vmem:[#allocation12_spill] sm:$0xff] %v3466_v12  ;;  %v889_v29 = vunpack.c.l.b16 %v531_v13  ;;  %v890_v30 = vunpack.c.l.b16 %v532_v14  ;;  %v342_v35 = vrot.slane %v3476_v26, 7  ;;  %v327_v37 = vrot.slane %v3480_v28, 7 }
  0x2b   : > { %2894 = vmatmul.msk.bf16.gmra.mxu0 %vm711_vm1, %v3449_v62  ;;  %v3484_v31 = vpack.c.b16 %v904_v20, %v903_v16  ;;  %v668_v33 = vunpack.c.l.b16 %v566_v25  ;;  %v370_v38 = vsel %vm355_vm3, %v340_v56, %v341_v27  ;;  %v581_v40 = vpack.c.bf16 %v3469_v15, %v3469_v15 }
  0x2c   : > { %v3493_v39 = vpack.c.b16 %v890_v30, %v889_v29  ;;  %v582_v42 = vpack.c.bf16 %v3476_v26, %v3476_v26  ;;  %v328_v45 = vrot.slane %v3488_v36, 7  ;;  %v369_v47 = vsel %vm355_vm3, %v341_v27, %v342_v35 }
  0x2d   : > { %4881 = vst [vmem:[#allocation13_spill] sm:$0xff] %v3484_v31  ;;  %v3501_v43 = vpack.c.b16 %v668_v33, %v667_v32  ;;  %v409_v48 = vsel %vm321_vm2, 0.0, %v370_v38  ;;  %v384_v49 = vsel %vm355_vm3, %v326_v63, %v327_v37  ;;  %v683_v50 = vunpack.c.l.b16 %v581_v40  ;;  %v3521_v63 = vld [vmem:[%s3369_s10 + $0xa0] sm:$0xff] }
  0x2e   : > { %v684_v51 = vunpack.c.l.b16 %v582_v42  ;;  %v547_v52 = vpack.c.bf16 %v409_v48, %v409_v48  ;;  %v548_v55 = vpack.c.bf16 %v369_v47, %v369_v47  ;;  %v383_v56 = vsel %vm355_vm3, %v327_v37, %v328_v45 }
  0x2f   : > { %v395_v57 = vsel %vm321_vm2, 0.0, %v384_v49  ;;  %v534_v61 = vpack.c.bf16 %v383_v56, %v383_v56  ;;  %v567_v2 = vpack.c.bf16 %v3480_v28, %v3480_v28  ;;  %v568_v3 = vpack.c.bf16 %v3488_v36, %v3488_v36  ;;  %v3573_v56 = vld [vmem:[%s3369_s10 + $0xb0] sm:$0xff] }
  0x30   : > { %v3518_v59 = vpack.c.b16 %v684_v51, %v683_v50  ;;  %v533_v60 = vpack.c.bf16 %v395_v57, %v395_v57  ;;  %v905_v0 = vunpack.c.l.b16 %v547_v52  ;;  %v906_v1 = vunpack.c.l.b16 %v548_v55 }
  0x31   : > { %v343_v6 = vrot.slane %v3521_v63, 7  ;;  %v892_v9 = vunpack.c.l.b16 %v534_v61  ;;  %v669_v14 = vunpack.c.l.b16 %v567_v2  ;;  %v670_v16 = vunpack.c.l.b16 %v568_v3  ;;  %v3584_v3 = vld [vmem:[%s3369_s10 + $0x40] sm:$0xff] }
  0x32   : > { %2902 = vmatmul.msk.bf16.gmra.mxu2 %vm711_vm1, %v3466_v12  ;;  %4882 = vst [vmem:[#allocation14_spill] sm:$0xff] %v3518_v59  ;;  %v891_v8 = vunpack.c.l.b16 %v533_v60  ;;  %v3536_v13 = vpack.c.b16 %v906_v1, %v905_v0  ;;  %v344_v20 = vrot.slane %v3528_v5, 7  ;;  %v329_v25 = vrot.slane %v3532_v7, 7  ;;  %v3580_v1 = vld [vmem:[%s3369_s10 + $0xb8] sm:$0xff] }
  0x33   : > { %v368_v27 = vsel %vm355_vm3, %v342_v35, %v343_v6  ;;  %v583_v30 = vpack.c.bf16 %v3521_v63, %v3521_v63  ;;  %v584_v32 = vpack.c.bf16 %v3528_v5, %v3528_v5  ;;  %v3553_v33 = vpack.c.b16 %v670_v16, %v669_v14 }
  0x34   : > { %4883 = vst [vmem:[#allocation15_spill] sm:$0xff] %v3536_v13  ;;  %v3545_v29 = vpack.c.b16 %v892_v9, %v891_v8  ;;  %v330_v37 = vrot.slane %v3540_v21, 7  ;;  %v367_v38 = vsel %vm355_vm3, %v343_v6, %v344_v20  ;;  %v411_v35 = vsel %vm321_vm2, 0.0, %v368_v27  ;;  %v3592_v27 = vld [vmem:[%s3369_s10 + $0x48] sm:$0xff] }
  0x35   : > { %4884 = vst [vmem:[#allocation16_spill] sm:$0xff] %v3553_v33  ;;  %v382_v40 = vsel %vm355_vm3, %v328_v45, %v329_v25  ;;  %v685_v42 = vunpack.c.l.b16 %v583_v30  ;;  %v686_v47 = vunpack.c.l.b16 %v584_v32  ;;  %v549_v48 = vpack.c.bf16 %v411_v35, %v411_v35 }
  0x36   : > { %2918 = vmatmul.msk.bf16.gmra.mxu3 %vm711_vm1, %v3484_v31  ;;  %v550_v49 = vpack.c.bf16 %v367_v38, %v367_v38  ;;  %v381_v50 = vsel %vm355_vm3, %v329_v25, %v330_v37  ;;  %v397_v51 = vsel %vm321_vm2, 0.0, %v382_v40  ;;  %v569_v61 = vpack.c.bf16 %v3532_v7, %v3532_v7 }
  0x37   : > { %v3570_v52 = vpack.c.b16 %v686_v47, %v685_v42  ;;  %v535_v45 = vpack.c.bf16 %v397_v51, %v397_v51  ;;  %v536_v55 = vpack.c.bf16 %v381_v50, %v381_v50  ;;  %v907_v57 = vunpack.c.l.b16 %v549_v48 }
  0x38   : > { %v908_v60 = vunpack.c.l.b16 %v550_v49  ;;  %v570_v0 = vpack.c.bf16 %v3540_v21, %v3540_v21  ;;  %v345_v2 = vrot.slane %v3573_v56, 7  ;;  %v671_v14 = vunpack.c.l.b16 %v569_v61 }
  0x39   : > { %4885 = vst [vmem:[#allocation17_spill] sm:$0xff] %v3570_v52  ;;  %v893_v6 = vunpack.c.l.b16 %v535_v45  ;;  %v894_v8 = vunpack.c.l.b16 %v536_v55  ;;  %v346_v25 = vrot.slane %v3580_v1, 7  ;;  %v331_v30 = vrot.slane %v3584_v3, 7 }
  0x3a   : > { %2911 = vmatmul.msk.bf16.gmra.mxu1 %vm711_vm1, %v3493_v39  ;;  %v3588_v9 = vpack.c.b16 %v908_v60, %v907_v57  ;;  %v672_v16 = vunpack.c.l.b16 %v570_v0  ;;  %v366_v32 = vsel %vm355_vm3, %v344_v20, %v345_v2  ;;  %v585_v35 = vpack.c.bf16 %v3573_v56, %v3573_v56 }
  0x3b   : > { %2895 = vmatmul.msk.bf16.gmra.mxu0 %vm711_vm1, %v3501_v43  ;;  %v3597_v38 = vpack.c.b16 %v894_v8, %v893_v6  ;;  %v586_v40 = vpack.c.bf16 %v3580_v1, %v3580_v1  ;;  %v332_v47 = vrot.slane %v3592_v27, 7  ;;  %v365_v48 = vsel %vm355_vm3, %v345_v2, %v346_v25  ;;  %v3625_v2 = vld [vmem:[%s3369_s10 + $0xc0] sm:$0xff] }
  0x3c   : > { %4886 = vst [vmem:[#allocation18_spill] sm:$0xff] %v3588_v9  ;;  %v3605_v42 = vpack.c.b16 %v672_v16, %v671_v14  ;;  %v413_v20 = vsel %vm321_vm2, 0.0, %v366_v32  ;;  %v380_v49 = vsel %vm355_vm3, %v330_v37, %v331_v30  ;;  %v687_v50 = vunpack.c.l.b16 %v585_v35  ;;  %v3632_v32 = vld [vmem:[%s3369_s10 + $0xc8] sm:$0xff]  ;;  %v3636_v35 = vld [vmem:[%s3369_s10 + $0x50] sm:$0xff] }
  0x3d   : > { %v688_v51 = vunpack.c.l.b16 %v586_v40  ;;  %v551_v45 = vpack.c.bf16 %v413_v20, %v413_v20  ;;  %v552_v55 = vpack.c.bf16 %v365_v48, %v365_v48  ;;  %v379_v57 = vsel %vm355_vm3, %v331_v30, %v332_v47  ;;  %4889 = vst [vmem:[#allocation21_spill] sm:$0xff] %v3625_v2 }
  0x3e   : > { %4887 = vst [vmem:[#allocation19_spill] sm:$0xff] %v3605_v42  ;;  %v399_v60 = vsel %vm321_vm2, 0.0, %v380_v49  ;;  %v538_v0 = vpack.c.bf16 %v379_v57, %v379_v57  ;;  %v571_v14 = vpack.c.bf16 %v3584_v3, %v3584_v3  ;;  %v572_v16 = vpack.c.bf16 %v3592_v27, %v3592_v27 }
  0x3f   : > { %v3622_v61 = vpack.c.b16 %v688_v51, %v687_v50  ;;  %v537_v37 = vpack.c.bf16 %v399_v60, %v399_v60  ;;  %v909_v6 = vunpack.c.l.b16 %v551_v45  ;;  %v910_v8 = vunpack.c.l.b16 %v552_v55  ;;  %4890 = vst [vmem:[#allocation22_spill] sm:$0xff] %v3632_v32  ;;  %v3644_v45 = vld [vmem:[%s3369_s10 + $0x58] sm:$0xff] }
  0x40   : > { %v347_v30 = vrot.slane %v3625_v2, 7  ;;  %v896_v48 = vunpack.c.l.b16 %v538_v0  ;;  %v673_v49 = vunpack.c.l.b16 %v571_v14  ;;  %v674_v50 = vunpack.c.l.b16 %v572_v16 }
  0x41   : > { %4888 = vst [vmem:[#allocation20_spill] sm:$0xff] %v3622_v61  ;;  %v895_v40 = vunpack.c.l.b16 %v537_v37  ;;  %v3640_v20 = vpack.c.b16 %v910_v8, %v909_v6  ;;  %v348_v51 = vrot.slane %v3632_v32, 7  ;;  %v333_v55 = vrot.slane %v3636_v35, 7 }
  0x42   : > { %2903 = vmatmul.msk.bf16.gmra.mxu2 %vm711_vm1, %v3518_v59  ;;  %v364_v57 = vsel %vm355_vm3, %v346_v25, %v347_v30  ;;  %v587_v24 = vpack.c.bf16 %v3625_v2, %v3625_v2  ;;  %v588_v37 = vpack.c.bf16 %v3632_v32, %v3632_v32  ;;  %v3657_v0 = vpack.c.b16 %v674_v50, %v673_v49 }
  0x43   : > { %4891 = vst [vmem:[#allocation23_spill] sm:$0xff] %v3640_v20  ;;  %v3649_v60 = vpack.c.b16 %v896_v48, %v895_v40  ;;  %v334_v6 = vrot.slane %v3644_v45, 7  ;;  %v363_v8 = vsel %vm355_vm3, %v347_v30, %v348_v51  ;;  %v415_v25 = vsel %vm321_vm2, 0.0, %v364_v57  ;;  %v3675_v57 = vld [vmem:[%s3369_s10 + $0xd0] sm:$0xff] }
  0x44   : > { %4892 = vst [vmem:[#allocation24_spill] sm:$0xff] %v3657_v0  ;;  %v378_v14 = vsel %vm355_vm3, %v332_v47, %v333_v55  ;;  %v689_v16 = vunpack.c.l.b16 %v587_v24  ;;  %v690_v40 = vunpack.c.l.b16 %v588_v37  ;;  %v553_v48 = vpack.c.bf16 %v415_v25, %v415_v25  ;;  %v3684_v25 = vld [vmem:[%s3369_s10 + $0xd8] sm:$0xff] }
  0x45   : > { %v554_v49 = vpack.c.bf16 %v363_v8, %v363_v8  ;;  %v377_v30 = vsel %vm355_vm3, %v333_v55, %v334_v6  ;;  %v401_v50 = vsel %vm321_vm2, 0.0, %v378_v14  ;;  %4893 = vst [vmem:[#allocation25_spill] sm:$0xff] %v3675_v57  ;;  %v574_v8 = vpack.c.bf16 %v3644_v45, %v3644_v45 }
  0x46   : > { %2919 = vmatmul.msk.bf16.gmra.mxu3 %vm711_vm1, %v3536_v13  ;;  %v3677_v47 = vpack.c.b16 %v690_v40, %v689_v16  ;;  %v539_v10 = vpack.c.bf16 %v401_v50, %v401_v50  ;;  %v911_v24 = vunpack.c.l.b16 %v553_v48  ;;  %4895 = vst [vmem:[#allocation27_spill] sm:$0xff] %v3684_v25  ;;  %v349_v55 = vrot.slane %v3675_v57, 7 }
  0x47   : > { %v912_v37 = vunpack.c.l.b16 %v554_v49  ;;  %v676_v49 = vunpack.c.l.b16 %v574_v8  ;;  %v590_v13 = vpack.c.bf16 %v3684_v25, %v3684_v25  ;;  %v427_v2 = vrot.slane %v3393_v23, 1 }
  0x48   : > { %4894 = vst [vmem:[#allocation26_spill] sm:$0xff] %v3677_v47  ;;  %v897_v14 = vunpack.c.l.b16 %v539_v10  ;;  %v362_v50 = vsel %vm355_vm3, %v348_v51, %v349_v55 }
  0x49   : > { %v3692_v40 = vpack.c.b16 %v912_v37, %v911_v24  ;;  %v692_v37 = vunpack.c.l.b16 %v590_v13 }
  0x4a   : > { %2912 = vmatmul.msk.bf16.gmra.mxu1 %vm711_vm1, %v3545_v29 }
  0x4b   : > { %2896 = vmatmul.msk.bf16.gmra.mxu0 %vm711_vm1, %v3553_v33  ;;  %4896 = vst [vmem:[#allocation28_spill] sm:$0xff] %v3692_v40 }
  0x52   : > { %2904 = vmatmul.msk.bf16.gmra.mxu2 %vm711_vm1, %v3570_v52  ;;  %v589_v52 = vpack.c.bf16 %v3675_v57, %v3675_v57  ;;  %v3747_v57 = vadd.s32 8, %v3351_v11 }
  0x54   : > { %v691_v24 = vunpack.c.l.b16 %v589_v52  ;;  %vm425_vm5 = vcmp.eq.s32.totalorder %v3747_v57, 15 }
  0x56   : > { %2920 = vmatmul.msk.bf16.gmra.mxu3 %vm711_vm1, %v3588_v9  ;;  %v3688_v9 = vld [vmem:[%s3369_s10 + $0x60] sm:$0xff] }
  0x57   : > { %v335_v32 = vrot.slane %v3688_v9, 7 }
  0x59   : > { %v376_v51 = vsel %vm355_vm3, %v334_v6, %v335_v32  ;;  %v3724_v6 = vpack.c.b16 %v692_v37, %v691_v24 }
  0x5a   : > { %2913 = vmatmul.msk.bf16.gmra.mxu1 %vm711_vm1, %v3597_v38 }
  0x5b   : > { %2897 = vmatmul.msk.bf16.gmra.mxu0 %vm711_vm1, %v3605_v42  ;;  %4899 = vst [vmem:[#allocation30_spill] sm:$0xff] %v3724_v6 }
  0x62   : > { %2905 = vmatmul.msk.bf16.gmra.mxu2 %vm711_vm1, %v3622_v61  ;;  %v573_v61 = vpack.c.bf16 %v3636_v35, %v3636_v35 }
  0x64   : > { %v675_v48 = vunpack.c.l.b16 %v573_v61 }
  0x66   : > { %2921 = vmatmul.msk.bf16.gmra.mxu3 %vm711_vm1, %v3640_v20  ;;  %v540_v20 = vpack.c.bf16 %v377_v30, %v377_v30  ;;  %v350_v30 = vrot.slane %v3684_v25, 7  ;;  %v3706_v10 = vpack.c.b16 %v676_v49, %v675_v48  ;;  %v403_v48 = vsel %vm321_vm2, 0.0, %v376_v51  ;;  %v3734_v25 = vld [vmem:[%s3369_s10 + $0xe8] sm:$0xff] }
  0x67   : > { %v541_v49 = vpack.c.bf16 %v403_v48, %v403_v48 }
  0x68   : > { %v898_v16 = vunpack.c.l.b16 %v540_v20  ;;  %4897 = vst [vmem:[#allocation29_spill] sm:$0xff] %v3706_v10  ;;  %v361_v61 = vsel %vm355_vm3, %v349_v55, %v350_v30  ;;  %v417_v20 = vsel %vm321_vm2, 0.0, %v362_v50  ;;  %v4898_v55 = vrot.slane %v3381_v19, 7 }
  0x69   : > { %v555_v8 = vpack.c.bf16 %v417_v20, %v417_v20  ;;  %v576_v20 = vpack.c.bf16 %v3381_v19, %v3381_v19  ;;  %v899_v24 = vunpack.c.l.b16 %v541_v49 }
  0x6a   : > { %2914 = vmatmul.msk.bf16.gmra.mxu1 %vm711_vm1, %v3649_v60 }
  0x6b   : > { %2898 = vmatmul.msk.bf16.gmra.mxu0 %vm711_vm1, %v3657_v0  ;;  %v913_v52 = vunpack.c.l.b16 %v555_v8  ;;  %v2993_v8 = vld [vmem:[%s4828_s1 + $0xc] sm:$0x3] }
  0x6c   : > { %v1738_v48 = vsel %vm760_vm0, %v2993_v8, 0 }
  0x6d   : > { %1747 = vmatpush.bf16.msra.mxu2 %v1738_v48 }
  0x72   : > { %2906 = vmatmul.msk.bf16.gmra.mxu2 %vm711_vm1, %v3677_v47  ;;  %v3702_v47 = vpack.c.b16 %v898_v16, %v897_v14  ;;  %v556_v14 = vpack.c.bf16 %v361_v61, %v361_v61  ;;  %v375_v16 = vsel %vm355_vm3, %v335_v32, %v4898_v55  ;;  %v575_v61 = vpack.c.bf16 %v3688_v9, %v3688_v9 }
  0x73   : > { %v542_v50 = vpack.c.bf16 %v375_v16, %v375_v16  ;;  %v678_v55 = vunpack.c.l.b16 %v576_v20  ;;  %v4855_v16 = vrot.slane %v3734_v25, 7  ;;  %v3010_v20 = vld [vmem:[%s4828_s1 + $0xe] sm:$0x3] }
  0x74   : > { %v914_v13 = vunpack.c.l.b16 %v556_v14  ;;  %v677_v14 = vunpack.c.l.b16 %v575_v61  ;;  %v592_v61 = vpack.c.bf16 %v3734_v25, %v3734_v25  ;;  %v1864_v8 = vsel %vm760_vm0, %v3010_v20, 0  ;;  %v3027_v20 = vld [vmem:[%s4828_s1 + $0x10] sm:$0x3] }
  0x75   : > { %v900_v37 = vunpack.c.l.b16 %v542_v50  ;;  %1873 = vmatpush.bf16.msra.mxu3 %v1864_v8 }
  0x76   : > { %2922 = vmatmul.msk.bf16.gmra.mxu3 %vm711_vm1, %v3692_v40  ;;  %v3727_v40 = vld [vmem:[%s3369_s10 + $0xe0] sm:$0xff]  ;;  %v3739_v51 = vpack.c.b16 %v914_v13, %v913_v52  ;;  %v428_v52 = vrot.slane %v3427_v46, 1  ;;  %v3762_v23 = vpack.c.b16 %v678_v55, %v677_v14 }
  0x77   : > { %v351_v32 = vrot.slane %v3727_v40, 7  ;;  %v3754_v49 = vpack.c.b16 %v900_v37, %v899_v24  ;;  %v591_v50 = vpack.c.bf16 %v3727_v40, %v3727_v40 }
  0x78   : > { %4900 = vst [vmem:[#allocation31_spill] sm:$0xff] %v3739_v51  ;;  %v489_v37 = vsel %vm458_vm4, %v427_v2, %v428_v52 }
  0x79   : > { %v360_v13 = vsel %vm355_vm3, %v350_v30, %v351_v32  ;;  %4901 = vst [vmem:[#allocation32_spill] sm:$0xff] %v3754_v49  ;;  %v359_v46 = vsel %vm355_vm3, %v351_v32, %v4855_v16  ;;  %v426_v30 = vrot.slane %v3390_v22, 1  ;;  %v693_v32 = vunpack.c.l.b16 %v591_v50 }
  0x7a   : > { %2915 = vmatmul.msk.bf16.gmra.mxu1 %vm711_vm1, %v3702_v47  ;;  %4902 = vst [vmem:[#allocation33_spill] sm:$0xff] %v3762_v23  ;;  %v419_v24 = vsel %vm321_vm2, 0.0, %v360_v13  ;;  %v694_v22 = vunpack.c.l.b16 %v592_v61  ;;  %v558_v55 = vpack.c.bf16 %v359_v46, %v359_v46  ;;  %v495_v13 = vsel %vm425_vm5, 0.0, %v489_v37 }
  0x7b   : > { %2899 = vmatmul.msk.bf16.gmra.mxu0 %vm711_vm1, %v3706_v10  ;;  %v557_v14 = vpack.c.bf16 %v419_v24, %v419_v24  ;;  %v490_v48 = vsel %vm458_vm4, %v426_v30, %v427_v2  ;;  %v598_v50 = vpack.c.bf16 %v495_v13, %v495_v13  ;;  %v1996_v61 = vsel %vm760_vm0, %v3027_v20, 0  ;;  %v2342_v2 = vld [vmem:[%s4829_s2] sm:$0x3] }
  0x7c   : > { %v3789_v8 = vpack.c.b16 %v694_v22, %v693_v32  ;;  %v597_v16 = vpack.c.bf16 %v490_v48, %v490_v48  ;;  %2005 = vmatpush.bf16.msra.mxu0 %v1996_v61  ;;  %v491_v46 = vsel %vm458_vm4, 0.0, %v426_v30  ;;  %v2392_v24 = vsel %vm760_vm0, %v2342_v2, 0 }
  0x7d   : > { %2401 = vmatpush.bf16.msra.mxu1 %v2392_v24  ;;  %v1110_v32 = vunpack.c.l.b16 %v598_v50  ;;  %v430_v48 = vrot.slane %v3480_v28, 1 }
  0x7e   : > { %4903 = vst [vmem:[#allocation34_spill] sm:$0xff] %v3789_v8  ;;  %v1109_v37 = vunpack.c.l.b16 %v597_v16 }
  0x80   : > { %v1140_v13 = vpack.c.b16 %v1110_v32, %v1109_v37 }
  0x82   : > { %2907 = vmatmul.msk.bf16.gmra.mxu2 %vm711_vm1, %v3724_v6  ;;  %v916_v6 = vunpack.c.l.b16 %v558_v55  ;;  %v429_v55 = vrot.slane %v3433_v53, 1 }
  0x84   : > { %v487_v16 = vsel %vm458_vm4, %v429_v55, %v430_v48  ;;  %v488_v53 = vsel %vm458_vm4, %v428_v52, %v429_v55 }
  0x85   : > { %v497_v28 = vsel %vm425_vm5, 0.0, %v487_v16  ;;  %v599_v2 = vpack.c.bf16 %v488_v53, %v488_v53 }
  0x86   : > { %2923 = vmatmul.msk.bf16.gmra.mxu3 %vm711_vm1, %v3739_v51  ;;  %v915_v51 = vunpack.c.l.b16 %v557_v14  ;;  %v493_v14 = vsel %vm425_vm5, 0.0, %v491_v46  ;;  %v600_v46 = vpack.c.bf16 %v497_v28, %v497_v28 }
  0x87   : > { %v596_v20 = vpack.c.bf16 %v493_v14, %v493_v14  ;;  %v1111_v14 = vunpack.c.l.b16 %v599_v2 }
  0x88   : > { %v3800_v22 = vpack.c.b16 %v916_v6, %v915_v51 }
  0x89   : > { %v1108_v6 = vunpack.c.l.b16 %v596_v20  ;;  %v1112_v20 = vunpack.c.l.b16 %v600_v46 }
  0x8a   : > { %2916 = vmatmul.msk.bf16.gmra.mxu1 %vm711_vm1, %v3754_v49 }
  0x8b   : > { %2900 = vmatmul.msk.bf16.gmra.mxu0 %vm711_vm1, %v3762_v23  ;;  %v1139_v51 = vpack.c.b16 %v1108_v6, %v3333_v4  ;;  %v3825_v55 = vpack.c.b16 %v1112_v20, %v1111_v14 }
  0x92   : > { %2908 = vmatmul.msk.bf16.gmra.mxu2 %vm711_vm1, %v3789_v8 }
  0x96   : > { %2924 = vmatmul.msk.bf16.gmra.mxu3 %vm711_vm1, %v3800_v22 }
  0x97   : > { %v993_v30 = vpop.f32.mrf.mxu1 }
  0x98   : > { %v773_v61 = vpop.f32.mrf.mxu0 }
  0x99   : > { %v3810_v50 = vadd.f32 %v993_v30, %v773_v61  ;;  %v432_v30 = vrot.slane %v3532_v7, 1 }
  0x9a   : > { %2977 = vmatmul.msk.bf16.vlgmr.msrb.gmra.mxu1 %vm711_vm1, %v1140_v13 }
  0x9b   : > { %2960 = vmatmul.msk.bf16.vlgmr.msrb.gmra.mxu0 %vm711_vm1, %v3449_v62  ;;  %v431_v62 = vrot.slane %v3488_v36, 1 }
  0x9d   : > { %v485_v6 = vsel %vm458_vm4, %v431_v62, %v432_v30  ;;  %v486_v7 = vsel %vm458_vm4, %v430_v48, %v431_v62  ;;  %v434_v48 = vrot.slane %v3584_v3, 1 }
  0x9e   : > { %v601_v2 = vpack.c.bf16 %v486_v7, %v486_v7 }
  0x9f   : > { %v995_v24 = vpop.f32.mrf.mxu1 }
  0xa0   : > { %v775_v37 = vpop.f32.mrf.mxu0 }
  0xa1   : > { %v3820_v32 = vadd.f32 %v995_v24, %v775_v37 }
  0xa2   : > { %2926 = vmatmul.msk.bf16.vlgmr.msrb.gmra.mxu2 %vm711_vm1, %v1139_v51 }
  0xa5   : > { %v813_v52 = vpop.f32.mrf.mxu2 }
  0xa6   : > { %2943 = vmatmul.msk.bf16.vlgmr.msrb.gmra.mxu3 %vm711_vm1, %v3439_v58  ;;  %v499_v58 = vsel %vm425_vm5, 0.0, %v485_v6 }
  0xa7   : > { %v998_v61 = vpop.f32.mrf.mxu1  ;;  %v602_v46 = vpack.c.bf16 %v499_v58, %v499_v58 }
  0xa8   : > { %v778_v16 = vpop.f32.mrf.mxu0 }
  0xa9   : > { %v3831_v53 = vadd.f32 %v998_v61, %v778_v16  ;;  %v1033_v28 = vpop.f32.mrf.mxu3  ;;  %v1114_v61 = vunpack.c.l.b16 %v602_v46 }
  0xaa   : > { %2978 = vmatmul.msk.bf16.gmra.mxu1 %vm711_vm1, %v3825_v55  ;;  %v3835_v36 = vadd.f32 %v1033_v28, %v813_v52  ;;  %v1113_v52 = vunpack.c.l.b16 %v601_v2  ;;  %v433_v28 = vrot.slane %v3540_v21, 1 }
  0xab   : > { %2961 = vmatmul.msk.bf16.gmra.mxu0 %vm711_vm1, %v3501_v43 }
  0xac   : > { %v3850_v6 = vpack.c.b16 %v1114_v61, %v1113_v52  ;;  %v484_v3 = vsel %vm458_vm4, %v432_v30, %v433_v28  ;;  %v435_v30 = vrot.slane %v3592_v27, 1 }
  0xad   : > { %v815_v51 = vpop.f32.mrf.mxu2 }
  0xaf   : > { %v1000_v24 = vpop.f32.mrf.mxu1 }
  0xb0   : > { %v780_v37 = vpop.f32.mrf.mxu0 }
  0xb1   : > { %v3843_v14 = vadd.f32 %v1000_v24, %v780_v37  ;;  %v1035_v20 = vpop.f32.mrf.mxu3  ;;  %v483_v24 = vsel %vm458_vm4, %v433_v28, %v434_v48  ;;  %v603_v37 = vpack.c.bf16 %v484_v3, %v484_v3  ;;  %v436_v28 = vrot.slane %v3636_v35, 1 }
  0xb2   : > { %2927 = vmatmul.msk.bf16.gmra.mxu2 %vm711_vm1, %v1140_v13  ;;  %v3846_v16 = vadd.f32 %v1035_v20, %v815_v51  ;;  %v501_v51 = vsel %vm425_vm5, 0.0, %v483_v24  ;;  %v482_v35 = vsel %vm458_vm4, %v434_v48, %v435_v30  ;;  %v437_v48 = vrot.slane %v3644_v45, 1 }
  0xb3   : > { %v604_v20 = vpack.c.bf16 %v501_v51, %v501_v51 }
  0xb5   : > { %v818_v62 = vpop.f32.mrf.mxu2 }
  0xb6   : > { %2944 = vmatmul.msk.bf16.gmra.mxu3 %vm711_vm1, %v3493_v39 }
  0xb7   : > { %v1003_v7 = vpop.f32.mrf.mxu1 }
  0xb8   : > { %v783_v58 = vpop.f32.mrf.mxu0 }
  0xb9   : > { %v3856_v13 = vadd.f32 %v1003_v7, %v783_v58  ;;  %v1038_v2 = vpop.f32.mrf.mxu3 }
  0xba   : > { %2979 = vmatmul.msk.bf16.gmra.mxu1 %vm711_vm1, %v3850_v6  ;;  %v3860_v21 = vadd.f32 %v1038_v2, %v818_v62  ;;  %v1115_v62 = vunpack.c.l.b16 %v603_v37  ;;  %v1116_v2 = vunpack.c.l.b16 %v604_v20 }
  0xbb   : > { %2962 = vmatmul.msk.bf16.gmra.mxu0 %vm711_vm1, %v3553_v33 }
  0xbc   : > { %v3876_v33 = vpack.c.b16 %v1116_v2, %v1115_v62 }
  0xbd   : > { %v820_v46 = vpop.f32.mrf.mxu2 }
  0xbf   : > { %v1005_v52 = vpop.f32.mrf.mxu1 }
  0xc0   : > { %v785_v61 = vpop.f32.mrf.mxu0 }
  0xc1   : > { %v3868_v7 = vadd.f32 %v1005_v52, %v785_v61  ;;  %v1040_v58 = vpop.f32.mrf.mxu3  ;;  %v481_v52 = vsel %vm458_vm4, %v435_v30, %v436_v28  ;;  %v438_v30 = vrot.slane %v3688_v9, 1  ;;  %v480_v9 = vsel %vm458_vm4, %v436_v28, %v437_v48 }
  0xc2   : > { %2928 = vmatmul.msk.bf16.gmra.mxu2 %vm711_vm1, %v3825_v55  ;;  %v3872_v4 = vadd.f32 %v1040_v58, %v820_v46  ;;  %v503_v46 = vsel %vm425_vm5, 0.0, %v481_v52  ;;  %v605_v58 = vpack.c.bf16 %v482_v35, %v482_v35  ;;  %v440_v28 = vrot.slane %v3373_v17, 1 }
  0xc3   : > { %v606_v62 = vpack.c.bf16 %v503_v46, %v503_v46 }
  0xc4   : > { %4904 = vst [vmem:[#allocation35_spill] sm:$0xff] %v3872_v4 }
  0xc5   : > { %v823_v24 = vpop.f32.mrf.mxu2 }
  0xc6   : > { %2945 = vmatmul.msk.bf16.gmra.mxu3 %vm711_vm1, %v3545_v29 }
  0xc7   : > { %v1008_v3 = vpop.f32.mrf.mxu1 }
  0xc8   : > { %v788_v51 = vpop.f32.mrf.mxu0 }
  0xc9   : > { %v3882_v61 = vadd.f32 %v1008_v3, %v788_v51  ;;  %v1043_v37 = vpop.f32.mrf.mxu3 }
  0xca   : > { %2980 = vmatmul.msk.bf16.gmra.mxu1 %vm711_vm1, %v3876_v33  ;;  %v3886_v27 = vadd.f32 %v1043_v37, %v823_v24  ;;  %v1117_v24 = vunpack.c.l.b16 %v605_v58  ;;  %v1118_v37 = vunpack.c.l.b16 %v606_v62  ;;  %v607_v62 = vpack.c.bf16 %v480_v9, %v480_v9 }
  0xcb   : > { %2963 = vmatmul.msk.bf16.gmra.mxu0 %vm711_vm1, %v3605_v42 }
  0xcc   : > { %4905 = vst [vmem:[#allocation36_spill] sm:$0xff] %v3886_v27  ;;  %v3902_v27 = vpack.c.b16 %v1118_v37, %v1117_v24 }
  0xcd   : > { %v825_v20 = vpop.f32.mrf.mxu2 }
  0xcf   : > { %v1010_v2 = vpop.f32.mrf.mxu1 }
  0xd0   : > { %v790_v3 = vpop.f32.mrf.mxu0 }
  0xd1   : > { %v3894_v51 = vadd.f32 %v1010_v2, %v790_v3  ;;  %v1045_v4 = vpop.f32.mrf.mxu3  ;;  %v479_v2 = vsel %vm458_vm4, %v437_v48, %v438_v30  ;;  %v439_v48 = vrot.slane %v3381_v19, 1 }
  0xd2   : > { %2929 = vmatmul.msk.bf16.gmra.mxu2 %vm711_vm1, %v3850_v6  ;;  %v3898_v42 = vadd.f32 %v1045_v4, %v825_v20  ;;  %v505_v45 = vsel %vm425_vm5, 0.0, %v479_v2 }
  0xd3   : > { %v608_v24 = vpack.c.bf16 %v505_v45, %v505_v45  ;;  %v478_v19 = vsel %vm458_vm4, %v438_v30, %v439_v48  ;;  %v441_v30 = vrot.slane %v3376_v18, 1 }
  0xd4   : > { %4906 = vst [vmem:[#allocation37_spill] sm:$0xff] %v3898_v42 }
  0xd5   : > { %v828_v52 = vpop.f32.mrf.mxu2 }
  0xd6   : > { %2946 = vmatmul.msk.bf16.gmra.mxu3 %vm711_vm1, %v3597_v38 }
  0xd7   : > { %v1013_v35 = vpop.f32.mrf.mxu1 }
  0xd8   : > { %v793_v46 = vpop.f32.mrf.mxu0 }
  0xd9   : > { %v3908_v3 = vadd.f32 %v1013_v35, %v793_v46  ;;  %v1048_v58 = vpop.f32.mrf.mxu3 }
  0xda   : > { %2981 = vmatmul.msk.bf16.gmra.mxu1 %vm711_vm1, %v3902_v27  ;;  %v3912_v4 = vadd.f32 %v1048_v58, %v828_v52  ;;  %v1119_v52 = vunpack.c.l.b16 %v607_v62  ;;  %v1120_v58 = vunpack.c.l.b16 %v608_v24  ;;  %v609_v24 = vpack.c.bf16 %v478_v19, %v478_v19 }
  0xdb   : > { %2964 = vmatmul.msk.bf16.gmra.mxu0 %vm711_vm1, %v3657_v0 }
  0xdc   : > { %4907 = vst [vmem:[#allocation38_spill] sm:$0xff] %v3912_v4  ;;  %v3928_v4 = vpack.c.b16 %v1120_v58, %v1119_v52 }
  0xdd   : > { %v830_v20 = vpop.f32.mrf.mxu2 }
  0xdf   : > { %v1015_v37 = vpop.f32.mrf.mxu1 }
  0xe0   : > { %v795_v35 = vpop.f32.mrf.mxu0 }
  0xe1   : > { %v3920_v46 = vadd.f32 %v1015_v37, %v795_v35  ;;  %v1050_v42 = vpop.f32.mrf.mxu3  ;;  %v477_v37 = vsel %vm458_vm4, %v439_v48, %v440_v28  ;;  %v442_v48 = vrot.slane %v3417_v41, 1  ;;  %v476_v41 = vsel %vm458_vm4, %v440_v28, %v441_v30 }
  0xe2   : > { %2930 = vmatmul.msk.bf16.gmra.mxu2 %vm711_vm1, %v3876_v33  ;;  %v3924_v0 = vadd.f32 %v1050_v42, %v830_v20  ;;  %v507_v42 = vsel %vm425_vm5, 0.0, %v477_v37  ;;  %v443_v28 = vrot.slane %v3422_v44, 1 }
  0xe3   : > { %v610_v52 = vpack.c.bf16 %v507_v42, %v507_v42 }
  0xe4   : > { %4908 = vst [vmem:[#allocation39_spill] sm:$0xff] %v3924_v0 }
  0xe5   : > { %v833_v2 = vpop.f32.mrf.mxu2 }
  0xe6   : > { %2947 = vmatmul.msk.bf16.gmra.mxu3 %vm711_vm1, %v3649_v60 }
  0xe7   : > { %v1018_v9 = vpop.f32.mrf.mxu1 }
  0xe8   : > { %v798_v45 = vpop.f32.mrf.mxu0 }
  0xe9   : > { %v3934_v35 = vadd.f32 %v1018_v9, %v798_v45  ;;  %v1053_v62 = vpop.f32.mrf.mxu3 }
  0xea   : > { %2982 = vmatmul.msk.bf16.gmra.mxu1 %vm711_vm1, %v3928_v4  ;;  %v3938_v17 = vadd.f32 %v1053_v62, %v833_v2  ;;  %v1121_v2 = vunpack.c.l.b16 %v609_v24  ;;  %v1122_v62 = vunpack.c.l.b16 %v610_v52  ;;  %v611_v52 = vpack.c.bf16 %v476_v41, %v476_v41 }
  0xeb   : > { %2965 = vmatmul.msk.bf16.gmra.mxu0 %vm711_vm1, %v3706_v10 }
  0xec   : > { %4909 = vst [vmem:[#allocation40_spill] sm:$0xff] %v3938_v17  ;;  %v3954_v17 = vpack.c.b16 %v1122_v62, %v1121_v2 }
  0xed   : > { %v835_v20 = vpop.f32.mrf.mxu2 }
  0xef   : > { %v1020_v58 = vpop.f32.mrf.mxu1 }
  0xf0   : > { %v800_v9 = vpop.f32.mrf.mxu0 }
  0xf1   : > { %v3946_v45 = vadd.f32 %v1020_v58, %v800_v9  ;;  %v1055_v0 = vpop.f32.mrf.mxu3  ;;  %v475_v58 = vsel %vm458_vm4, %v441_v30, %v442_v48  ;;  %v444_v30 = vrot.slane %v3469_v15, 1  ;;  %v474_v15 = vsel %vm458_vm4, %v442_v48, %v443_v28 }
  0xf2   : > { %2931 = vmatmul.msk.bf16.gmra.mxu2 %vm711_vm1, %v3902_v27  ;;  %v3950_v10 = vadd.f32 %v1055_v0, %v835_v20  ;;  %v509_v0 = vsel %vm425_vm5, 0.0, %v475_v58  ;;  %v445_v48 = vrot.slane %v3476_v26, 1 }
  0xf3   : > { %v612_v2 = vpack.c.bf16 %v509_v0, %v509_v0 }
  0xf4   : > { %4910 = vst [vmem:[#allocation41_spill] sm:$0xff] %v3950_v10  ;;  %v472_v26 = vsel %vm458_vm4, %v444_v30, %v445_v48 }
  0xf5   : > { %v838_v37 = vpop.f32.mrf.mxu2 }
  0xf6   : > { %2948 = vmatmul.msk.bf16.gmra.mxu3 %vm711_vm1, %v3702_v47 }
  0xf7   : > { %v1023_v19 = vpop.f32.mrf.mxu1 }
  0xf8   : > { %v803_v42 = vpop.f32.mrf.mxu0 }
  0xf9   : > { %v3960_v9 = vadd.f32 %v1023_v19, %v803_v42  ;;  %v1058_v24 = vpop.f32.mrf.mxu3 }
  0xfa   : > { %2983 = vmatmul.msk.bf16.gmra.mxu1 %vm711_vm1, %v3954_v17  ;;  %v3964_v18 = vadd.f32 %v1058_v24, %v838_v37  ;;  %v1123_v37 = vunpack.c.l.b16 %v611_v52  ;;  %v1124_v24 = vunpack.c.l.b16 %v612_v2  ;;  %v613_v2 = vpack.c.bf16 %v474_v15, %v474_v15 }
  0xfb   : > { %2966 = vmatmul.msk.bf16.gmra.mxu0 %vm711_vm1, %v3762_v23 }
  0xfc   : > { %4911 = vst [vmem:[#allocation42_spill] sm:$0xff] %v3964_v18  ;;  %v3980_v18 = vpack.c.b16 %v1124_v24, %v1123_v37 }
  0xfd   : > { %v840_v20 = vpop.f32.mrf.mxu2 }
  0xfe   : > { %4913 = vst [vmem:[#allocation44_spill] sm:$0xff] %v3980_v18 }
  0xff   : > { %v1025_v62 = vpop.f32.mrf.mxu1 }
 0x100   : > { %v805_v19 = vpop.f32.mrf.mxu0 }
 0x101   : > { %v3972_v42 = vadd.f32 %v1025_v62, %v805_v19  ;;  %v1060_v10 = vpop.f32.mrf.mxu3  ;;  %v473_v62 = vsel %vm458_vm4, %v443_v28, %v444_v30  ;;  %v446_v28 = vrot.slane %v3521_v63, 1  ;;  %v448_v30 = vrot.slane %v3573_v56, 1 }
 0x102   : > { %2932 = vmatmul.msk.bf16.gmra.mxu2 %vm711_vm1, %v3928_v4  ;;  %v3976_v23 = vadd.f32 %v1060_v10, %v840_v20  ;;  %v511_v10 = vsel %vm425_vm5, 0.0, %v473_v62 }
 0x103   : > { %v614_v37 = vpack.c.bf16 %v511_v10, %v511_v10 }
 0x104   : > { %4912 = vst [vmem:[#allocation43_spill] sm:$0xff] %v3976_v23 }
 0x105   : > { %v843_v58 = vpop.f32.mrf.mxu2 }
 0x106   : > { %2949 = vmatmul.msk.bf16.gmra.mxu3 %vm711_vm1, %v3754_v49 }
 0x107   : > { %v1028_v41 = vpop.f32.mrf.mxu1 }
 0x108   : > { %v808_v0 = vpop.f32.mrf.mxu0 }
 0x109   : > { %v3986_v19 = vadd.f32 %v1028_v41, %v808_v0  ;;  %v1063_v52 = vpop.f32.mrf.mxu3 }
 0x10a   : > { %2984 = vmatmul.msk.bf16.gmra.mxu1 %vm711_vm1, %v3980_v18  ;;  %v3990_v44 = vadd.f32 %v1063_v52, %v843_v58  ;;  %v1125_v58 = vunpack.c.l.b16 %v613_v2  ;;  %v1126_v52 = vunpack.c.l.b16 %v614_v37  ;;  %v615_v2 = vpack.c.bf16 %v472_v26, %v472_v26 }
 0x10b   : > { %2967 = vmatmul.msk.bf16.gmra.mxu0 %vm711_vm1, %v3408_v34 }
 0x10c   : > { %4914 = vst [vmem:[#allocation45_spill] sm:$0xff] %v3990_v44  ;;  %v4006_v44 = vpack.c.b16 %v1126_v52, %v1125_v58 }
 0x10d   : > { %v845_v20 = vpop.f32.mrf.mxu2 }
 0x10f   : > { %v1030_v24 = vpop.f32.mrf.mxu1 }
 0x110   : > { %v810_v41 = vpop.f32.mrf.mxu0 }
 0x111   : > { %v3998_v0 = vadd.f32 %v1030_v24, %v810_v41  ;;  %v1065_v23 = vpop.f32.mrf.mxu3  ;;  %v471_v24 = vsel %vm458_vm4, %v445_v48, %v446_v28 }
 0x112   : > { %2933 = vmatmul.msk.bf16.gmra.mxu2 %vm711_vm1, %v3954_v17  ;;  %v4002_v34 = vadd.f32 %v1065_v23, %v845_v20  ;;  %v513_v63 = vsel %vm425_vm5, 0.0, %v471_v24 }
 0x113   : > { %v616_v37 = vpack.c.bf16 %v513_v63, %v513_v63 }
 0x114   : > { %4915 = vst [vmem:[#allocation46_spill] sm:$0xff] %v4002_v34 }
 0x115   : > { %v848_v62 = vpop.f32.mrf.mxu2 }
 0x116   : > { %2950 = vmatmul.msk.bf16.gmra.mxu3 %vm711_vm1, %v3435_v54 }
 0x117   : > { %v1617_v15 = vpop.f32.mrf.mxu1 }
 0x118   : > { %v1483_v10 = vpop.f32.mrf.mxu0 }
 0x119   : > { %v1068_v41 = vpop.f32.mrf.mxu3 }
 0x11a   : > { %2985 = vmatmul.msk.bf16.gmra.mxu1 %vm711_vm1, %v4006_v44  ;;  %v4014_v23 = vadd.f32 %v1068_v41, %v848_v62  ;;  %v1127_v62 = vunpack.c.l.b16 %v615_v2  ;;  %v1128_v41 = vunpack.c.l.b16 %v616_v37 }
 0x11b   : > { %2968 = vmatmul.msk.bf16.gmra.mxu0 %vm711_vm1, %v3466_v12  ;;  %v447_v12 = vrot.slane %v3528_v5, 1 }
 0x11c   : > { %4916 = vst [vmem:[#allocation47_spill] sm:$0xff] %v4014_v23  ;;  %v4029_v54 = vpack.c.b16 %v1128_v41, %v1127_v62 }
 0x11d   : > { %v850_v20 = vpop.f32.mrf.mxu2  ;;  %v469_v2 = vsel %vm458_vm4, %v447_v12, %v448_v30  ;;  %v470_v5 = vsel %vm458_vm4, %v446_v28, %v447_v12  ;;  %v449_v28 = vrot.slane %v3580_v1, 1 }
 0x11e   : > { %v515_v56 = vsel %vm425_vm5, 0.0, %v469_v2  ;;  %v617_v41 = vpack.c.bf16 %v470_v5, %v470_v5  ;;  %v4919_v2 = vld [vmem:[#allocation21_spill] sm:$0xff] }
 0x11f   : > { %v1619_v58 = vpop.f32.mrf.mxu1 }
 0x120   : > { %v1485_v52 = vpop.f32.mrf.mxu0 }
 0x121   : > { %v1070_v34 = vpop.f32.mrf.mxu3 }
 0x122   : > { %2934 = vmatmul.msk.bf16.gmra.mxu2 %vm711_vm1, %v3980_v18  ;;  %v4024_v23 = vadd.f32 %v1070_v34, %v850_v20 }
 0x124   : > { %4917 = vst [vmem:[#allocation48_spill] sm:$0xff] %v4024_v23 }
 0x125   : > { %v1215_v48 = vpop.f32.mrf.mxu2 }
 0x126   : > { %v1295_v24 = vadd.f32 %v1215_v48, %v3810_v50  ;;  %2951 = vmatmul.msk.bf16.gmra.mxu3 %vm711_vm1, %v3484_v31  ;;  %v618_v48 = vpack.c.bf16 %v515_v56, %v515_v56 }
 0x127   : > { %v1622_v26 = vpop.f32.mrf.mxu1 }
 0x128   : > { %v1488_v63 = vpop.f32.mrf.mxu0 }
 0x129   : > { %v1349_v37 = vpop.f32.mrf.mxu3 }
 0x12a   : > { %2986 = vmatmul.msk.bf16.gmra.mxu1 %vm711_vm1, %v4029_v54  ;;  %v1429_v34 = vadd.f32 %v1349_v37, %v1295_v24  ;;  %v1129_v37 = vunpack.c.l.b16 %v617_v41 }
 0x12b   : > { %2969 = vmatmul.msk.bf16.gmra.mxu0 %vm711_vm1, %v3518_v59  ;;  %v1130_v59 = vunpack.c.l.b16 %v618_v48 }
 0x12c   : > { %v1563_v50 = vadd.f32 %v1483_v10, %v1429_v34  ;;  %v450_v10 = vrot.slane %v4919_v2, 1 }
 0x12d   : > { %v1217_v20 = vpop.f32.mrf.mxu2  ;;  %v4051_v5 = vpack.c.b16 %v1130_v59, %v1129_v37  ;;  %v468_v59 = vsel %vm458_vm4, %v448_v30, %v449_v28 }
 0x12e   : > { %v1296_v62 = vadd.f32 %v1217_v20, %v3820_v32  ;;  %v4044_v31 = vadd.f32 %v1617_v15, %v1563_v50  ;;  %v4920_v15 = vld [vmem:[#allocation15_spill] sm:$0xff] }
 0x12f   : > { %v1624_v23 = vpop.f32.mrf.mxu1 }
 0x130   : > { %4918 = vst [vmem:[#allocation49_spill] sm:$0xff] %v4044_v31  ;;  %v1490_v18 = vpop.f32.mrf.mxu0 }
 0x131   : > { %v1351_v24 = vpop.f32.mrf.mxu3 }
 0x132   : > { %2935 = vmatmul.msk.bf16.gmra.mxu2 %vm711_vm1, %v4006_v44  ;;  %v1430_v12 = vadd.f32 %v1351_v24, %v1296_v62  ;;  %v467_v62 = vsel %vm458_vm4, %v449_v28, %v450_v10  ;;  %v619_v24 = vpack.c.bf16 %v468_v59, %v468_v59  ;;  %v4923_v28 = vld [vmem:[#allocation22_spill] sm:$0xff] }
 0x134   : > { %v1564_v34 = vadd.f32 %v1485_v52, %v1430_v12  ;;  %v4922_v52 = vld [vmem:[#allocation17_spill] sm:$0xff] }
 0x135   : > { %v1220_v49 = vpop.f32.mrf.mxu2 }
 0x136   : > { %v1297_v32 = vadd.f32 %v1220_v49, %v3831_v53  ;;  %2952 = vmatmul.msk.bf16.gmra.mxu3 %vm711_vm1, %v4920_v15  ;;  %v4055_v50 = vadd.f32 %v1619_v58, %v1564_v34  ;;  %v517_v49 = vsel %vm425_vm5, 0.0, %v467_v62  ;;  %v4924_v62 = vld [vmem:[#allocation25_spill] sm:$0xff] }
 0x137   : > { %v1627_v56 = vpop.f32.mrf.mxu1  ;;  %v620_v37 = vpack.c.bf16 %v517_v49, %v517_v49 }
 0x138   : > { %4921 = vst [vmem:[#allocation21_spill] sm:$0xff] %v4055_v50  ;;  %v1493_v20 = vpop.f32.mrf.mxu0  ;;  %v451_v50 = vrot.slane %v4923_v28, 1 }
 0x139   : > { %v1354_v41 = vpop.f32.mrf.mxu3 }
 0x13a   : > { %2987 = vmatmul.msk.bf16.gmra.mxu1 %vm711_vm1, %v4051_v5  ;;  %v1431_v1 = vadd.f32 %v1354_v41, %v1297_v32  ;;  %v1131_v41 = vunpack.c.l.b16 %v619_v24 }
 0x13b   : > { %2970 = vmatmul.msk.bf16.gmra.mxu0 %vm711_vm1, %v4922_v52  ;;  %v1132_v52 = vunpack.c.l.b16 %v620_v37  ;;  %v4927_v37 = vld [vmem:[#allocation20_spill] sm:$0xff] }
 0x13c   : > { %v1565_v53 = vadd.f32 %v1488_v63, %v1431_v1  ;;  %v452_v63 = vrot.slane %v4924_v62, 1 }
 0x13d   : > { %v1222_v58 = vpop.f32.mrf.mxu2  ;;  %v4075_v59 = vpack.c.b16 %v1132_v52, %v1131_v41 }
 0x13e   : > { %v1298_v48 = vadd.f32 %v1222_v58, %v3843_v14  ;;  %v4068_v2 = vadd.f32 %v1622_v26, %v1565_v53  ;;  %v4925_v26 = vld [vmem:[#allocation18_spill] sm:$0xff] }
 0x13f   : > { %v1629_v12 = vpop.f32.mrf.mxu1 }
 0x140   : > { %v1495_v34 = vpop.f32.mrf.mxu0 }
 0x141   : > { %v1356_v32 = vpop.f32.mrf.mxu3 }
 0x142   : > { %2936 = vmatmul.msk.bf16.gmra.mxu2 %vm711_vm1, %v4029_v54  ;;  %v1432_v30 = vadd.f32 %v1356_v32, %v1298_v48  ;;  %v465_v48 = vsel %vm458_vm4, %v451_v50, %v452_v63 }
 0x144   : > { %v1566_v1 = vadd.f32 %v1490_v18, %v1432_v30 }
 0x145   : > { %v1225_v31 = vpop.f32.mrf.mxu2 }
 0x146   : > { %v1299_v14 = vadd.f32 %v1225_v31, %v3856_v13  ;;  %2953 = vmatmul.msk.bf16.gmra.mxu3 %vm711_vm1, %v4925_v26  ;;  %v4079_v53 = vadd.f32 %v1624_v23, %v1566_v1  ;;  %v466_v31 = vsel %vm458_vm4, %v450_v10, %v451_v50  ;;  %v519_v13 = vsel %vm425_vm5, 0.0, %v465_v48  ;;  %v4928_v50 = vld [vmem:[#allocation27_spill] sm:$0xff] }
 0x147   : > { %v1632_v49 = vpop.f32.mrf.mxu1  ;;  %v621_v41 = vpack.c.bf16 %v466_v31, %v466_v31  ;;  %v622_v30 = vpack.c.bf16 %v519_v13, %v519_v13 }
 0x148   : > { %4926 = vst [vmem:[#allocation15_spill] sm:$0xff] %v4079_v53  ;;  %v1498_v58 = vpop.f32.mrf.mxu0  ;;  %v453_v53 = vrot.slane %v4928_v50, 1 }
 0x149   : > { %v1359_v24 = vpop.f32.mrf.mxu3 }
 0x14a   : > { %2988 = vmatmul.msk.bf16.gmra.mxu1 %vm711_vm1, %v4075_v59  ;;  %v1433_v18 = vadd.f32 %v1359_v24, %v1299_v14  ;;  %v1133_v24 = vunpack.c.l.b16 %v621_v41 }
 0x14b   : > { %2971 = vmatmul.msk.bf16.gmra.mxu0 %vm711_vm1, %v4927_v37  ;;  %v1134_v37 = vunpack.c.l.b16 %v622_v30 }
 0x14c   : > { %v1567_v23 = vadd.f32 %v1493_v20, %v1433_v18  ;;  %v454_v20 = vrot.slane %v3727_v40, 1 }
 0x14d   : > { %v1227_v52 = vpop.f32.mrf.mxu2  ;;  %v4099_v31 = vpack.c.b16 %v1134_v37, %v1133_v24 }
 0x14e   : > { %v1300_v32 = vadd.f32 %v1227_v52, %v3868_v7  ;;  %v4092_v62 = vadd.f32 %v1627_v56, %v1567_v23  ;;  %v4929_v56 = vld [vmem:[#allocation23_spill] sm:$0xff] }
 0x14f   : > { %v1634_v28 = vpop.f32.mrf.mxu1 }
 0x150   : > { %v1500_v1 = vpop.f32.mrf.mxu0 }
 0x151   : > { %v1361_v14 = vpop.f32.mrf.mxu3 }
 0x152   : > { %2937 = vmatmul.msk.bf16.gmra.mxu2 %vm711_vm1, %v4051_v5  ;;  %v1434_v10 = vadd.f32 %v1361_v14, %v1300_v32  ;;  %v463_v32 = vsel %vm458_vm4, %v453_v53, %v454_v20 }
 0x154   : > { %v1568_v48 = vadd.f32 %v1495_v34, %v1434_v10  ;;  %v4930_v34 = vld [vmem:[#allocation26_spill] sm:$0xff] }
 0x155   : > { %v1230_v18 = vpop.f32.mrf.mxu2 }
 0x156   : > { %v1301_v7 = vadd.f32 %v1230_v18, %v3882_v61  ;;  %2954 = vmatmul.msk.bf16.gmra.mxu3 %vm711_vm1, %v4929_v56  ;;  %v4103_v23 = vadd.f32 %v1629_v12, %v1568_v48  ;;  %v464_v61 = vsel %vm458_vm4, %v452_v63, %v453_v53  ;;  %v521_v12 = vsel %vm425_vm5, 0.0, %v463_v32 }
 0x157   : > { %v1637_v13 = vpop.f32.mrf.mxu1  ;;  %v623_v24 = vpack.c.bf16 %v464_v61, %v464_v61  ;;  %v624_v10 = vpack.c.bf16 %v521_v12, %v521_v12  ;;  %v4932_v12 = vld [vmem:[#allocation28_spill] sm:$0xff] }
 0x158   : > { %v1503_v52 = vpop.f32.mrf.mxu0 }
 0x159   : > { %v1364_v41 = vpop.f32.mrf.mxu3  ;;  %v1135_v63 = vunpack.c.l.b16 %v623_v24  ;;  %v1136_v53 = vunpack.c.l.b16 %v624_v10 }
 0x15a   : > { %2989 = vmatmul.msk.bf16.gmra.mxu1 %vm711_vm1, %v4099_v31  ;;  %v1435_v40 = vadd.f32 %v1364_v41, %v1301_v7  ;;  %v4119_v7 = vld [vmem:[%s3369_s10 + $0xf0] sm:$0xff] }
 0x15b   : > { %2972 = vmatmul.msk.bf16.gmra.mxu0 %vm711_vm1, %v4930_v34  ;;  %v456_v32 = vrot.slane %v4119_v7, 1 }
 0x15c   : > { %v1569_v37 = vadd.f32 %v1498_v58, %v1435_v40  ;;  %v455_v58 = vrot.slane %v3734_v25, 1 }
 0x15d   : > { %v1232_v30 = vpop.f32.mrf.mxu2 }
 0x15e   : > { %v1302_v14 = vadd.f32 %v1232_v30, %v3894_v51  ;;  %v4116_v48 = vadd.f32 %v1632_v49, %v1569_v37  ;;  %v4126_v49 = vpack.c.b16 %v1136_v53, %v1135_v63 }
 0x15f   : > { %v1639_v50 = vpop.f32.mrf.mxu1 }
 0x160   : > { %4931 = vst [vmem:[#allocation22_spill] sm:$0xff] %v4116_v48  ;;  %v1505_v18 = vpop.f32.mrf.mxu0 }
 0x161   : > { %v1366_v41 = vpop.f32.mrf.mxu3 }
 0x162   : > { %2938 = vmatmul.msk.bf16.gmra.mxu2 %vm711_vm1, %v4075_v59  ;;  %v1436_v34 = vadd.f32 %v1366_v41, %v1302_v14  ;;  %v461_v14 = vsel %vm458_vm4, %v455_v58, %v456_v32 }
 0x164   : > { %v1570_v51 = vadd.f32 %v1500_v1, %v1436_v34  ;;  %v4934_v34 = vld [vmem:[#allocation30_spill] sm:$0xff] }
 0x165   : > { %v1235_v40 = vpop.f32.mrf.mxu2 }
 0x166   : > { %v1303_v61 = vadd.f32 %v1235_v40, %v3908_v3  ;;  %2955 = vmatmul.msk.bf16.gmra.mxu3 %vm711_vm1, %v4932_v12  ;;  %v4130_v30 = vadd.f32 %v1634_v28, %v1570_v51  ;;  %v462_v3 = vsel %vm458_vm4, %v454_v20, %v455_v58  ;;  %v523_v28 = vsel %vm425_vm5, 0.0, %v461_v14 }
 0x167   : > { %v1642_v37 = vpop.f32.mrf.mxu1  ;;  %v625_v53 = vpack.c.bf16 %v462_v3, %v462_v3  ;;  %v626_v51 = vpack.c.bf16 %v523_v28, %v523_v28 }
 0x168   : > { %4933 = vst [vmem:[#allocation25_spill] sm:$0xff] %v4130_v30  ;;  %v1508_v48 = vpop.f32.mrf.mxu0 }
 0x169   : > { %v1369_v24 = vpop.f32.mrf.mxu3  ;;  %v1137_v20 = vunpack.c.l.b16 %v625_v53  ;;  %v1138_v58 = vunpack.c.l.b16 %v626_v51 }
 0x16a   : > { %2990 = vmatmul.msk.bf16.gmra.mxu1 %vm711_vm1, %v4126_v49  ;;  %v1437_v1 = vadd.f32 %v1369_v24, %v1303_v61  ;;  %v4146_v61 = vld [vmem:[%s3369_s10 + $0xf8] sm:$0xff] }
 0x16b   : > { %2973 = vmatmul.msk.bf16.gmra.mxu0 %vm711_vm1, %v4934_v34  ;;  %v4152_v3 = vpack.c.b16 %v1138_v58, %v1137_v20 }
 0x16c   : > { %v1571_v10 = vadd.f32 %v1503_v52, %v1437_v1  ;;  %v457_v52 = vrot.slane %v4146_v61, 1 }
 0x16d   : > { %v1237_v41 = vpop.f32.mrf.mxu2 }
 0x16e   : > { %v1304_v63 = vadd.f32 %v1237_v41, %v3920_v46  ;;  %v4143_v30 = vadd.f32 %v1637_v13, %v1571_v10  ;;  %v4935_v13 = vld [vmem:[#allocation31_spill] sm:$0xff]  ;;  %v459_v53 = vsel %vm458_vm4, %v457_v52, 0.0 }
 0x16f   : > { %v1644_v40 = vpop.f32.mrf.mxu1 }
 0x170   : > { %v1510_v12 = vpop.f32.mrf.mxu0 }
 0x171   : > { %v1371_v24 = vpop.f32.mrf.mxu3 }
 0x172   : > { %2939 = vmatmul.msk.bf16.gmra.mxu2 %vm711_vm1, %v4099_v31  ;;  %v1438_v34 = vadd.f32 %v1371_v24, %v1304_v63 }
 0x174   : > { %v1572_v14 = vadd.f32 %v1505_v18, %v1438_v34  ;;  %v525_v34 = vsel %vm425_vm5, 0.0, %v459_v53 }
 0x175   : > { %v1240_v1 = vpop.f32.mrf.mxu2  ;;  %v628_v58 = vpack.c.bf16 %v525_v34, %v525_v34 }
 0x176   : > { %v1305_v46 = vadd.f32 %v1240_v1, %v3934_v35  ;;  %2956 = vmatmul.msk.bf16.gmra.mxu3 %vm711_vm1, %v4935_v13  ;;  %v4156_v10 = vadd.f32 %v1639_v50, %v1572_v14  ;;  %v460_v35 = vsel %vm458_vm4, %v456_v32, %v457_v52  ;;  %v593_v1 = vpack.c.bf16 %v4119_v7, %v4119_v7 }
 0x177   : > { %v1647_v28 = vpop.f32.mrf.mxu1  ;;  %v627_v20 = vpack.c.bf16 %v460_v35, %v460_v35  ;;  %v353_v32 = vrot.slane %v4119_v7, 7  ;;  %v354_v35 = vrot.slane %v4146_v61, 7 }
 0x178   : > { %4936 = vst [vmem:[#allocation18_spill] sm:$0xff] %v4156_v10  ;;  %v1513_v41 = vpop.f32.mrf.mxu0  ;;  %v1465_v53 = vunpack.c.l.b16 %v593_v1  ;;  %v4937_v10 = vrot.slane %v3734_v25, 7 }
 0x179   : > { %v1374_v51 = vpop.f32.mrf.mxu3  ;;  %v357_v25 = vsel %vm355_vm3, %v353_v32, %v354_v35 }
 0x17a   : > { %2991 = vmatmul.msk.bf16.gmra.mxu1 %vm711_vm1, %v4152_v3  ;;  %v1439_v18 = vadd.f32 %v1374_v51, %v1305_v46  ;;  %v594_v46 = vpack.c.bf16 %v4146_v61, %v4146_v61 }
 0x17b   : > { %2974 = vmatmul.msk.bf16.gmra.mxu0 %vm711_vm1, %v3789_v8 }
 0x17c   : > { %v1573_v50 = vadd.f32 %v1508_v48, %v1439_v18  ;;  %v1599_v48 = vunpack.c.l.b16 %v627_v20  ;;  %v1466_v18 = vunpack.c.l.b16 %v594_v46 }
 0x17d   : > { %v1242_v63 = vpop.f32.mrf.mxu2 }
 0x17e   : > { %v1306_v24 = vadd.f32 %v1242_v63, %v3946_v45  ;;  %v4173_v51 = vadd.f32 %v1642_v37, %v1573_v50  ;;  %v1600_v45 = vunpack.c.l.b16 %v628_v58  ;;  %v358_v37 = vsel %vm355_vm3, %v4937_v10, %v353_v32 }
 0x17f   : > { %v1649_v14 = vpop.f32.mrf.mxu1 }
 0x180   : > { %v1515_v8 = vpop.f32.mrf.mxu0  ;;  %v4184_v50 = vpack.c.b16 %v1600_v45, %v1599_v48 }
 0x181   : > { %v1376_v57 = vpop.f32.mrf.mxu3 }
 0x182   : > { %2940 = vmatmul.msk.bf16.gmra.mxu2 %vm711_vm1, %v4126_v49  ;;  %v1440_v52 = vadd.f32 %v1376_v57, %v1306_v24  ;;  %v4188_v24 = vpack.c.b16 %v1466_v18, %v1465_v53  ;;  %v560_v57 = vpack.c.bf16 %v357_v25, %v357_v25 }
 0x184   : > { %v1574_v34 = vadd.f32 %v1510_v12, %v1440_v52  ;;  %v421_v12 = vsel %vm321_vm2, 0.0, %v358_v37  ;;  %v1332_v53 = vunpack.c.l.b16 %v560_v57 }
 0x185   : > { %v1245_v63 = vpop.f32.mrf.mxu2  ;;  %v559_v46 = vpack.c.bf16 %v421_v12, %v421_v12 }
 0x186   : > { %v1307_v7 = vadd.f32 %v1245_v63, %v3960_v9  ;;  %2957 = vmatmul.msk.bf16.gmra.mxu3 %vm711_vm1, %v3800_v22  ;;  %v4190_v58 = vadd.f32 %v1644_v40, %v1574_v34 }
 0x187   : > { %v1652_v20 = vpop.f32.mrf.mxu1  ;;  %v1331_v52 = vunpack.c.l.b16 %v559_v46 }
 0x188   : > { %v1518_v1 = vpop.f32.mrf.mxu0 }
 0x189   : > { %v1379_v9 = vpop.f32.mrf.mxu3 }
 0x18a   : > { %2992 = vmatmul.msk.bf16.gmra.mxu1 %vm711_vm1, %v4184_v50  ;;  %v1441_v10 = vadd.f32 %v1379_v9, %v1307_v7  ;;  %v4207_v7 = vpack.c.b16 %v1332_v53, %v1331_v52  ;;  %v3116_v9 = vld [vmem:[%s3369_s10] sm:$0xff] }
 0x18b   : > { %2975 = vmatmul.msk.bf16.gmra.mxu0 %vm711_vm1, %v4188_v24 }
 0x18c   : > { %v1575_v40 = vadd.f32 %v1513_v41, %v1441_v10  ;;  %v3117_v10 = vld [vmem:[%s3369_s10 + $0x8] sm:$0xff] }
 0x18d   : > { %v1247_v48 = vpop.f32.mrf.mxu2 }
 0x18e   : > { %v1308_v45 = vadd.f32 %v1247_v48, %v3972_v42  ;;  %v4203_v18 = vadd.f32 %v1647_v28, %v1575_v40  ;;  %v2326_v42 = vpack.c.bf16 %v3117_v10, %v3116_v9  ;;  %v3118_v9 = vld [vmem:[%s3369_s10 + $0x10] sm:$0xff]  ;;  %v3119_v10 = vld [vmem:[%s3369_s10 + $0x18] sm:$0xff] }
 0x18f   : > { %v1654_v32 = vpop.f32.mrf.mxu1 }
 0x190   : > { %v1520_v34 = vpop.f32.mrf.mxu0 }
 0x191   : > { %v1381_v63 = vpop.f32.mrf.mxu3 }
 0x192   : > { %2941 = vmatmul.msk.bf16.gmra.mxu2 %vm711_vm1, %v4152_v3  ;;  %v1442_v37 = vadd.f32 %v1381_v63, %v1308_v45 }
 0x194   : > { %v1576_v25 = vadd.f32 %v1515_v8, %v1442_v37 }
 0x195   : > { %v1250_v12 = vpop.f32.mrf.mxu2 }
 0x196   : > { %v1309_v41 = vadd.f32 %v1250_v12, %v3986_v19  ;;  %2958 = vmatmul.msk.bf16.gmra.mxu3 %vm711_vm1, %v4207_v7  ;;  %v4214_v46 = vadd.f32 %v1649_v14, %v1576_v25 }
 0x197   : > { %v1657_v28 = vpop.f32.mrf.mxu1 }
 0x198   : > { %v1523_v57 = vpop.f32.mrf.mxu0 }
 0x199   : > { %v1384_v40 = vpop.f32.mrf.mxu3 }
 0x19a   : > { %3044 = vmatmul.msk.bf16.vlgmr.msra.gmra.mxu1 %vm711_vm1, %v2326_v42  ;;  %v1443_v48 = vadd.f32 %v1384_v40, %v1309_v41 }
 0x19b   : > { %3028 = vmatmul.msk.bf16.vlgmr.msra.gmra.mxu0 %vm711_vm1, %v3825_v55  ;;  %v2327_v55 = vpack.c.bf16 %v3119_v10, %v3118_v9  ;;  %v4939_v10 = vld [vmem:[#allocation35_spill] sm:$0xff] }
 0x19c   : > { %v1577_v8 = vadd.f32 %v1518_v1, %v1443_v48 }
 0x19d   : > { %v1252_v19 = vpop.f32.mrf.mxu2 }
 0x19e   : > { %v1310_v45 = vadd.f32 %v1252_v19, %v3998_v0  ;;  %v4220_v53 = vadd.f32 %v1652_v20, %v1577_v8 }
 0x19f   : > { %v1659_v52 = vpop.f32.mrf.mxu1 }
 0x1a0   : > { %v1525_v63 = vpop.f32.mrf.mxu0 }
 0x1a1   : > { %v1386_v14 = vpop.f32.mrf.mxu3 }
 0x1a2   : > { %2994 = vmatmul.msk.bf16.vlgmr.msra.gmra.mxu2 %vm711_vm1, %v3493_v39  ;;  %v1444_v37 = vadd.f32 %v1386_v14, %v1310_v45 }
 0x1a4   : > { %v1578_v25 = vadd.f32 %v1520_v34, %v1444_v37 }
 0x1a5   : > { %v1255_v12 = vpop.f32.mrf.mxu2 }
 0x1a6   : > { %v1311_v41 = vadd.f32 %v1255_v12, %v3835_v36  ;;  %3011 = vmatmul.msk.bf16.vlgmr.msra.gmra.mxu3 %vm711_vm1, %v3501_v43  ;;  %v4229_v1 = vadd.f32 %v1654_v32, %v1578_v25  ;;  %v3120_v25 = vld [vmem:[%s3369_s10 + $0x20] sm:$0xff]  ;;  %v3121_v12 = vld [vmem:[%s3369_s10 + $0x28] sm:$0xff] }
 0x1a7   : > { %v1662_v0 = vpop.f32.mrf.mxu1 }
 0x1a8   : > { %v1528_v20 = vpop.f32.mrf.mxu0 }
 0x1a9   : > { %v1389_v42 = vpop.f32.mrf.mxu3 }
 0x1aa   : > { %3045 = vmatmul.msk.bf16.gmra.mxu1 %vm711_vm1, %v2327_v55  ;;  %v1445_v39 = vadd.f32 %v1389_v42, %v1311_v41 }
 0x1ab   : > { %3029 = vmatmul.msk.bf16.gmra.mxu0 %vm711_vm1, %v3850_v6  ;;  %v2328_v6 = vpack.c.bf16 %v3121_v12, %v3120_v25 }
 0x1ac   : > { %v1579_v36 = vadd.f32 %v1523_v57, %v1445_v39  ;;  %v4938_v57 = vld [vmem:[#allocation16_spill] sm:$0xff] }
 0x1ad   : > { %v1257_v34 = vpop.f32.mrf.mxu2 }
 0x1ae   : > { %v1312_v40 = vadd.f32 %v1257_v34, %v3846_v16  ;;  %v4235_v8 = vadd.f32 %v1657_v28, %v1579_v36 }
 0x1af   : > { %v1664_v48 = vpop.f32.mrf.mxu1 }
 0x1b0   : > { %v1530_v43 = vpop.f32.mrf.mxu0 }
 0x1b1   : > { %v1391_v32 = vpop.f32.mrf.mxu3 }
 0x1b2   : > { %2995 = vmatmul.msk.bf16.gmra.mxu2 %vm711_vm1, %v3545_v29  ;;  %v1446_v19 = vadd.f32 %v1391_v32, %v1312_v40 }
 0x1b4   : > { %v1580_v45 = vadd.f32 %v1525_v63, %v1446_v19  ;;  %v4940_v19 = vld [vmem:[#allocation36_spill] sm:$0xff] }
 0x1b5   : > { %v1260_v14 = vpop.f32.mrf.mxu2 }
 0x1b6   : > { %v1313_v37 = vadd.f32 %v1260_v14, %v3860_v21  ;;  %3012 = vmatmul.msk.bf16.gmra.mxu3 %vm711_vm1, %v4938_v57  ;;  %v4244_v41 = vadd.f32 %v1659_v52, %v1580_v45  ;;  %v3122_v14 = vld [vmem:[%s3369_s10 + $0x30] sm:$0xff] }
 0x1b7   : > { %v1667_v16 = vpop.f32.mrf.mxu1 }
 0x1b8   : > { %v1533_v28 = vpop.f32.mrf.mxu0 }
 0x1b9   : > { %v1394_v9 = vpop.f32.mrf.mxu3 }
 0x1ba   : > { %3046 = vmatmul.msk.bf16.gmra.mxu1 %vm711_vm1, %v2328_v6  ;;  %v1447_v29 = vadd.f32 %v1394_v9, %v1313_v37  ;;  %v3123_v37 = vld [vmem:[%s3369_s10 + $0x38] sm:$0xff]  ;;  %v4942_v9 = vld [vmem:[#allocation37_spill] sm:$0xff] }
 0x1bb   : > { %3030 = vmatmul.msk.bf16.gmra.mxu0 %vm711_vm1, %v3876_v33  ;;  %v2329_v33 = vpack.c.bf16 %v3123_v37, %v3122_v14 }
 0x1bc   : > { %v1581_v21 = vadd.f32 %v1528_v20, %v1447_v29  ;;  %v4941_v20 = vld [vmem:[#allocation19_spill] sm:$0xff] }
 0x1bd   : > { %v1262_v63 = vpop.f32.mrf.mxu2 }
 0x1be   : > { %v1314_v55 = vadd.f32 %v1262_v63, %v4939_v10  ;;  %v4250_v39 = vadd.f32 %v1662_v0, %v1581_v21 }
 0x1bf   : > { %v1669_v42 = vpop.f32.mrf.mxu1 }
 0x1c0   : > { %v1535_v36 = vpop.f32.mrf.mxu0 }
 0x1c1   : > { %v1396_v52 = vpop.f32.mrf.mxu3 }
 0x1c2   : > { %2996 = vmatmul.msk.bf16.gmra.mxu2 %vm711_vm1, %v3597_v38  ;;  %v1448_v34 = vadd.f32 %v1396_v52, %v1314_v55 }
 0x1c4   : > { %v1582_v40 = vadd.f32 %v1530_v43, %v1448_v34 }
 0x1c5   : > { %v1265_v32 = vpop.f32.mrf.mxu2 }
 0x1c6   : > { %v1315_v45 = vadd.f32 %v1265_v32, %v4940_v19  ;;  %3013 = vmatmul.msk.bf16.gmra.mxu3 %vm711_vm1, %v4941_v20  ;;  %v4259_v12 = vadd.f32 %v1664_v48, %v1582_v40  ;;  %v4943_v40 = vld [vmem:[#allocation38_spill] sm:$0xff]  ;;  %v3124_v19 = vld [vmem:[%s3369_s10 + $0x40] sm:$0xff] }
 0x1c7   : > { %v1672_v25 = vpop.f32.mrf.mxu1 }
 0x1c8   : > { %v1538_v0 = vpop.f32.mrf.mxu0 }
 0x1c9   : > { %v1399_v6 = vpop.f32.mrf.mxu3 }
 0x1ca   : > { %3047 = vmatmul.msk.bf16.gmra.mxu1 %vm711_vm1, %v2329_v33  ;;  %v1449_v38 = vadd.f32 %v1399_v6, %v1315_v45  ;;  %v3125_v45 = vld [vmem:[%s3369_s10 + $0x48] sm:$0xff]  ;;  %v4945_v6 = vld [vmem:[#allocation39_spill] sm:$0xff] }
 0x1cb   : > { %3031 = vmatmul.msk.bf16.gmra.mxu0 %vm711_vm1, %v3902_v27  ;;  %v2330_v27 = vpack.c.bf16 %v3125_v45, %v3124_v19 }
 0x1cc   : > { %v1583_v43 = vadd.f32 %v1533_v28, %v1449_v38  ;;  %v4944_v28 = vld [vmem:[#allocation24_spill] sm:$0xff] }
 0x1cd   : > { %v1267_v57 = vpop.f32.mrf.mxu2 }
 0x1ce   : > { %v1316_v29 = vadd.f32 %v1267_v57, %v4942_v9  ;;  %v4265_v63 = vadd.f32 %v1667_v16, %v1583_v43 }
 0x1cf   : > { %v1674_v21 = vpop.f32.mrf.mxu1 }
 0x1d0   : > { %v1540_v10 = vpop.f32.mrf.mxu0 }
 0x1d1   : > { %v1401_v48 = vpop.f32.mrf.mxu3 }
 0x1d2   : > { %2997 = vmatmul.msk.bf16.gmra.mxu2 %vm711_vm1, %v3649_v60  ;;  %v1450_v55 = vadd.f32 %v1401_v48, %v1316_v29 }
 0x1d4   : > { %v1584_v52 = vadd.f32 %v1535_v36, %v1450_v55 }
 0x1d5   : > { %v1270_v34 = vpop.f32.mrf.mxu2 }
 0x1d6   : > { %v1317_v32 = vadd.f32 %v1270_v34, %v4943_v40  ;;  %3014 = vmatmul.msk.bf16.gmra.mxu3 %vm711_vm1, %v4944_v28  ;;  %v4274_v37 = vadd.f32 %v1669_v42, %v1584_v52  ;;  %v4946_v52 = vld [vmem:[#allocation40_spill] sm:$0xff]  ;;  %v3126_v40 = vld [vmem:[%s3369_s10 + $0x50] sm:$0xff] }
 0x1d7   : > { %v1677_v14 = vpop.f32.mrf.mxu1 }
 0x1d8   : > { %v1543_v16 = vpop.f32.mrf.mxu0 }
 0x1d9   : > { %v1404_v33 = vpop.f32.mrf.mxu3 }
 0x1da   : > { %3048 = vmatmul.msk.bf16.gmra.mxu1 %vm711_vm1, %v2330_v27  ;;  %v1451_v60 = vadd.f32 %v1404_v33, %v1317_v32  ;;  %v3127_v32 = vld [vmem:[%s3369_s10 + $0x58] sm:$0xff]  ;;  %v4948_v33 = vld [vmem:[#allocation41_spill] sm:$0xff] }
 0x1db   : > { %3032 = vmatmul.msk.bf16.gmra.mxu0 %vm711_vm1, %v3928_v4  ;;  %v2331_v4 = vpack.c.bf16 %v3127_v32, %v3126_v40  ;;  %v3129_v40 = vld [vmem:[%s3369_s10 + $0x60] sm:$0xff] }
 0x1dc   : > { %v1585_v36 = vadd.f32 %v1538_v0, %v1451_v60  ;;  %v4947_v0 = vld [vmem:[#allocation29_spill] sm:$0xff] }
 0x1dd   : > { %v1272_v20 = vpop.f32.mrf.mxu2 }
 0x1de   : > { %v1318_v38 = vadd.f32 %v1272_v20, %v4945_v6  ;;  %v4280_v57 = vadd.f32 %v1672_v25, %v1585_v36 }
 0x1df   : > { %v1679_v43 = vpop.f32.mrf.mxu1 }
 0x1e0   : > { %v1545_v9 = vpop.f32.mrf.mxu0 }
 0x1e1   : > { %v1406_v42 = vpop.f32.mrf.mxu3 }
 0x1e2   : > { %2998 = vmatmul.msk.bf16.gmra.mxu2 %vm711_vm1, %v3702_v47  ;;  %v1452_v29 = vadd.f32 %v1406_v42, %v1318_v38  ;;  %v4949_v38 = vld [vmem:[#allocation32_spill] sm:$0xff] }
 0x1e4   : > { %v1586_v48 = vadd.f32 %v1540_v10, %v1452_v29 }
 0x1e5   : > { %v1275_v55 = vpop.f32.mrf.mxu2 }
 0x1e6   : > { %v1319_v34 = vadd.f32 %v1275_v55, %v4946_v52  ;;  %3015 = vmatmul.msk.bf16.gmra.mxu3 %vm711_vm1, %v4947_v0  ;;  %v4289_v45 = vadd.f32 %v1674_v21, %v1586_v48  ;;  %v4950_v55 = vld [vmem:[#allocation42_spill] sm:$0xff] }
 0x1e7   : > { %v1682_v19 = vpop.f32.mrf.mxu1 }
 0x1e8   : > { %v1548_v25 = vpop.f32.mrf.mxu0 }
 0x1e9   : > { %v1409_v27 = vpop.f32.mrf.mxu3 }
 0x1ea   : > { %3049 = vmatmul.msk.bf16.gmra.mxu1 %vm711_vm1, %v2331_v4  ;;  %v1453_v47 = vadd.f32 %v1409_v27, %v1319_v34  ;;  %v3128_v34 = vld [vmem:[%s3369_s10 + $0x68] sm:$0xff] }
 0x1eb   : > { %3033 = vmatmul.msk.bf16.gmra.mxu0 %vm711_vm1, %v3954_v17  ;;  %v2332_v17 = vpack.c.bf16 %v3128_v34, %v3129_v40  ;;  %v4955_v34 = vld [vmem:[#allocation45_spill] sm:$0xff] }
 0x1ec   : > { %v1587_v10 = vadd.f32 %v1543_v16, %v1453_v47  ;;  %v4951_v16 = vld [vmem:[#allocation33_spill] sm:$0xff] }
 0x1ed   : > { %v1277_v28 = vpop.f32.mrf.mxu2  ;;  %v3130_v40 = vld [vmem:[%s3369_s10 + $0x70] sm:$0xff] }
 0x1ee   : > { %v1320_v60 = vadd.f32 %v1277_v28, %v4948_v33  ;;  %v4295_v20 = vadd.f32 %v1677_v14, %v1587_v10  ;;  %v4953_v28 = vld [vmem:[#allocation43_spill] sm:$0xff] }
 0x1ef   : > { %v1684_v36 = vpop.f32.mrf.mxu1 }
 0x1f0   : > { %v1550_v6 = vpop.f32.mrf.mxu0 }
 0x1f1   : > { %v1411_v21 = vpop.f32.mrf.mxu3 }
 0x1f2   : > { %2999 = vmatmul.msk.bf16.gmra.mxu2 %vm711_vm1, %v4949_v38  ;;  %v1454_v42 = vadd.f32 %v1411_v21, %v1320_v60 }
 0x1f4   : > { %v1588_v29 = vadd.f32 %v1545_v9, %v1454_v42  ;;  %v4952_v9 = vld [vmem:[#allocation44_spill] sm:$0xff]  ;;  %v4954_v42 = vld [vmem:[#allocation11_spill] sm:$0xff] }
 0x1f5   : > { %v1280_v48 = vpop.f32.mrf.mxu2 }
 0x1f6   : > { %v1321_v52 = vadd.f32 %v1280_v48, %v4950_v55  ;;  %3016 = vmatmul.msk.bf16.gmra.mxu3 %vm711_vm1, %v4951_v16  ;;  %v4304_v4 = vadd.f32 %v1679_v43, %v1588_v29 }
 0x1f7   : > { %v1687_v32 = vpop.f32.mrf.mxu1 }
 0x1f8   : > { %v1553_v14 = vpop.f32.mrf.mxu0 }
 0x1f9   : > { %v1414_v0 = vpop.f32.mrf.mxu3 }
 0x1fa   : > { %3050 = vmatmul.msk.bf16.gmra.mxu1 %vm711_vm1, %v2332_v17  ;;  %v1455_v27 = vadd.f32 %v1414_v0, %v1321_v52  ;;  %v3131_v17 = vld [vmem:[%s3369_s10 + $0x78] sm:$0xff] }
 0x1fb   : > { %3034 = vmatmul.msk.bf16.gmra.mxu0 %vm711_vm1, %v4952_v9  ;;  %v2333_v16 = vpack.c.bf16 %v3131_v17, %v3130_v40  ;;  %v3132_v40 = vld [vmem:[%s3369_s10 + $0x80] sm:$0xff] }
 0x1fc   : > { %v1589_v47 = vadd.f32 %v1548_v25, %v1455_v27  ;;  %v4956_v25 = vld [vmem:[#allocation10_spill] sm:$0xff] }
 0x1fd   : > { %v1282_v10 = vpop.f32.mrf.mxu2 }
 0x1fe   : > { %v1322_v33 = vadd.f32 %v1282_v10, %v4953_v28  ;;  %v4310_v21 = vadd.f32 %v1682_v19, %v1589_v47  ;;  %v4957_v28 = vld [vmem:[#allocation46_spill] sm:$0xff] }
 0x1ff   : > { %v1689_v60 = vpop.f32.mrf.mxu1 }
 0x200   : > { %v1555_v38 = vpop.f32.mrf.mxu0 }
 0x201   : > { %v1416_v43 = vpop.f32.mrf.mxu3 }
 0x202   : > { %3000 = vmatmul.msk.bf16.gmra.mxu2 %vm711_vm1, %v4954_v42  ;;  %v1456_v29 = vadd.f32 %v1416_v43, %v1322_v33 }
 0x204   : > { %v1590_v48 = vadd.f32 %v1550_v6, %v1456_v29 }
 0x205   : > { %v1285_v55 = vpop.f32.mrf.mxu2 }
 0x206   : > { %v1323_v52 = vadd.f32 %v1285_v55, %v4955_v34  ;;  %3017 = vmatmul.msk.bf16.gmra.mxu3 %vm711_vm1, %v4956_v25  ;;  %v4319_v27 = vadd.f32 %v1684_v36, %v1590_v48  ;;  %v4958_v48 = vld [vmem:[#allocation13_spill] sm:$0xff] }
 0x207   : > { %v1692_v0 = vpop.f32.mrf.mxu1 }
 0x208   : > { %v1558_v19 = vpop.f32.mrf.mxu0 }
 0x209   : > { %v1419_v9 = vpop.f32.mrf.mxu3 }
 0x20a   : > { %3051 = vmatmul.msk.bf16.gmra.mxu1 %vm711_vm1, %v2333_v16  ;;  %v1457_v47 = vadd.f32 %v1419_v9, %v1323_v52  ;;  %v4960_v16 = vld [vmem:[#allocation12_spill] sm:$0xff] }
 0x20b   : > { %3035 = vmatmul.msk.bf16.gmra.mxu0 %vm711_vm1, %v4006_v44  ;;  %v4959_v44 = vld [vmem:[#allocation47_spill] sm:$0xff] }
 0x20c   : > { %v1591_v6 = vadd.f32 %v1553_v14, %v1457_v47 }
 0x20d   : > { %v1287_v10 = vpop.f32.mrf.mxu2 }
 0x20e   : > { %v1324_v33 = vadd.f32 %v1287_v10, %v4957_v28  ;;  %v4325_v42 = vadd.f32 %v1687_v32, %v1591_v6  ;;  %v3133_v32 = vld [vmem:[%s3369_s10 + $0x88] sm:$0xff] }
 0x20f   : > { %v1694_v43 = vpop.f32.mrf.mxu1  ;;  %v2334_v17 = vpack.c.bf16 %v3133_v32, %v3132_v40 }
 0x210   : > { %v1560_v36 = vpop.f32.mrf.mxu0 }
 0x211   : > { %v1421_v29 = vpop.f32.mrf.mxu3 }
 0x212   : > { %3001 = vmatmul.msk.bf16.gmra.mxu2 %vm711_vm1, %v4958_v48  ;;  %v1458_v55 = vadd.f32 %v1421_v29, %v1324_v33  ;;  %v4961_v48 = vld [vmem:[#allocation48_spill] sm:$0xff] }
 0x214   : > { %v1592_v34 = vadd.f32 %v1555_v38, %v1458_v55 }
 0x215   : > { %v1290_v52 = vpop.f32.mrf.mxu2 }
 0x216   : > { %v1325_v14 = vadd.f32 %v1290_v52, %v4959_v44  ;;  %3018 = vmatmul.msk.bf16.gmra.mxu3 %vm711_vm1, %v4960_v16  ;;  %v4340_v9 = vadd.f32 %v1689_v60, %v1592_v34 }
 0x217   : > { %v2403_v25 = vpop.f32.mrf.mxu1 }
 0x218   : > { %2483 = vst.msk [vmem:[%s4333_s26] sm:$0xff] %vm2119_vm6, %v2403_v25  ;;  %v2007_v38 = vpop.f32.mrf.mxu0  ;;  %v2584_v10 = vmul.f32 %v2403_v25, %v2403_v25  ;;  %v2515_v29 = vsel %vm2119_vm6, %v2403_v25, 0.0 }
 0x219   : > { %v1424_v47 = vpop.f32.mrf.mxu3 }
 0x21a   : > { %3052 = vmatmul.msk.bf16.gmra.mxu1 %vm711_vm1, %v2334_v17  ;;  %v1459_v6 = vadd.f32 %v1424_v47, %v1325_v14  ;;  %v2616_v52 = vsel %vm2119_vm6, %v2584_v10, 0.0  ;;  %v3134_v47 = vld [vmem:[%s3369_s10 + $0x90] sm:$0xff] }
 0x21b   : > { %3036 = vmatmul.msk.bf16.gmra.mxu0 %vm711_vm1, %v4029_v54 }
 0x21c   : > { %v1593_v28 = vadd.f32 %v1558_v19, %v1459_v6  ;;  %v3135_v6 = vld [vmem:[%s3369_s10 + $0x98] sm:$0xff] }
 0x21d   : > { %v1292_v33 = vpop.f32.mrf.mxu2  ;;  %v2335_v10 = vpack.c.bf16 %v3135_v6, %v3134_v47 }
 0x21e   : > { %v1326_v55 = vadd.f32 %v1292_v33, %v4961_v48  ;;  %v4349_v34 = vadd.f32 %v1692_v0, %v1593_v28  ;;  %v4962_v28 = vld [vmem:[#allocation14_spill] sm:$0xff] }
 0x21f   : > { %v2405_v60 = vpop.f32.mrf.mxu1 }
 0x220   : > { %2484 = vst.msk [vmem:[%s4333_s26 + $0x8] sm:$0xff] %vm2119_vm6, %v2405_v60  ;;  %v2516_v44 = vsel %vm2119_vm6, %v2405_v60, 0.0  ;;  %v2585_v14 = vmul.f32 %v2405_v60, %v2405_v60  ;;  %v2009_v54 = vpop.f32.mrf.mxu0  ;;  %v4963_v60 = vld [vmem:[#allocation49_spill] sm:$0xff] }
 0x221   : > { %v2517_v19 = vadd.f32 %v2516_v44, %v2515_v29  ;;  %v1426_v32 = vpop.f32.mrf.mxu3 }
 0x222   : > { %v2617_v40 = vsel %vm2119_vm6, %v2585_v14, 0.0  ;;  %3002 = vmatmul.msk.bf16.gmra.mxu2 %vm711_vm1, %v4920_v15  ;;  %v1460_v17 = vadd.f32 %v1426_v32, %v1326_v55 }
 0x223   : > { %v2618_v16 = vadd.f32 %v2617_v40, %v2616_v52 }
 0x224   : > { %v1594_v0 = vadd.f32 %v1560_v36, %v1460_v17 }
 0x225   : > { %v1749_v25 = vpop.f32.mrf.mxu2 }
 0x226   : > { %3019 = vmatmul.msk.bf16.gmra.mxu3 %vm711_vm1, %v4962_v28  ;;  %v4362_v48 = vadd.f32 %v1694_v43, %v1594_v0  ;;  %v1829_v36 = vadd.f32 %v1749_v25, %v4963_v60  ;;  %v4964_v25 = vld [vmem:[#allocation21_spill] sm:$0xff] }
 0x227   : > { %v2408_v33 = vpop.f32.mrf.mxu1 }
 0x228   : > { %2485 = vst.msk [vmem:[%s4333_s26 + $0x10] sm:$0xff] %vm2119_vm6, %v2408_v33  ;;  %v2518_v29 = vsel %vm2119_vm6, %v2408_v33, 0.0  ;;  %v2586_v15 = vmul.f32 %v2408_v33, %v2408_v33  ;;  %v2012_v55 = vpop.f32.mrf.mxu0 }
 0x229   : > { %v2519_v52 = vadd.f32 %v2518_v29, %v2517_v19  ;;  %v1875_v14 = vpop.f32.mrf.mxu3 }
 0x22a   : > { %v2619_v44 = vsel %vm2119_vm6, %v2586_v15, 0.0  ;;  %3053 = vmatmul.msk.bf16.gmra.mxu1 %vm711_vm1, %v2335_v10  ;;  %v1955_v32 = vadd.f32 %v1875_v14, %v1829_v36  ;;  %v3136_v36 = vld [vmem:[%s3369_s10 + $0xa0] sm:$0xff] }
 0x22b   : > { %v2620_v40 = vadd.f32 %v2619_v44, %v2618_v16  ;;  %3037 = vmatmul.msk.bf16.gmra.mxu0 %vm711_vm1, %v4051_v5  ;;  %v3137_v44 = vld [vmem:[%s3369_s10 + $0xa8] sm:$0xff] }
 0x22c   : > { %v2087_v43 = vadd.f32 %v2007_v38, %v1955_v32  ;;  %v2336_v14 = vpack.c.bf16 %v3137_v44, %v3136_v36 }
 0x22d   : > { %v1751_v17 = vpop.f32.mrf.mxu2 }
 0x22e   : > { %2120 = vst.msk [vmem:[%s4376_s11] sm:$0xff] %vm2119_vm6, %v2087_v43  ;;  %v1830_v47 = vadd.f32 %v1751_v17, %v4964_v25  ;;  %v2221_v29 = vmul.f32 %v2087_v43, %v2087_v43  ;;  %v2152_v32 = vsel %vm2119_vm6, %v2087_v43, 0.0 }
 0x22f   : > { %v2410_v19 = vpop.f32.mrf.mxu1 }
 0x230   : > { %2486 = vst.msk [vmem:[%s4333_s26 + $0x18] sm:$0xff] %vm2119_vm6, %v2410_v19  ;;  %v2520_v16 = vsel %vm2119_vm6, %v2410_v19, 0.0  ;;  %v2587_v0 = vmul.f32 %v2410_v19, %v2410_v19  ;;  %v2014_v5 = vpop.f32.mrf.mxu0  ;;  %v4965_v19 = vld [vmem:[#allocation17_spill] sm:$0xff]  ;;  %v2253_v25 = vsel %vm2119_vm6, %v2221_v29, 0.0 }
 0x231   : > { %v2521_v6 = vadd.f32 %v2520_v16, %v2519_v52  ;;  %v1877_v28 = vpop.f32.mrf.mxu3 }
 0x232   : > { %v2621_v10 = vsel %vm2119_vm6, %v2587_v0, 0.0  ;;  %3003 = vmatmul.msk.bf16.gmra.mxu2 %vm711_vm1, %v4925_v26  ;;  %v1956_v38 = vadd.f32 %v1877_v28, %v1830_v47 }
 0x233   : > { %v2622_v33 = vadd.f32 %v2621_v10, %v2620_v40 }
 0x234   : > { %v2088_v15 = vadd.f32 %v2009_v54, %v1956_v38 }
 0x235   : > { %v1754_v60 = vpop.f32.mrf.mxu2 }
 0x236   : > { %2121 = vst.msk [vmem:[%s4376_s11 + $0x8] sm:$0xff] %vm2119_vm6, %v2088_v15  ;;  %v2153_v52 = vsel %vm2119_vm6, %v2088_v15, 0.0  ;;  %v2222_v17 = vmul.f32 %v2088_v15, %v2088_v15  ;;  %3020 = vmatmul.msk.bf16.gmra.mxu3 %vm711_vm1, %v4965_v19  ;;  %v1831_v47 = vadd.f32 %v1754_v60, %v4068_v2 }
 0x237   : > { %v2413_v26 = vpop.f32.mrf.mxu1  ;;  %v2154_v16 = vadd.f32 %v2153_v52, %v2152_v32 }
 0x238   : > { %2487 = vst.msk [vmem:[%s4333_s26 + $0x20] sm:$0xff] %vm2119_vm6, %v2413_v26  ;;  %v2522_v54 = vsel %vm2119_vm6, %v2413_v26, 0.0  ;;  %v2588_v40 = vmul.f32 %v2413_v26, %v2413_v26  ;;  %v2017_v0 = vpop.f32.mrf.mxu0  ;;  %v2254_v43 = vsel %vm2119_vm6, %v2222_v17, 0.0 }
 0x239   : > { %v2523_v10 = vadd.f32 %v2522_v54, %v2521_v6  ;;  %v2255_v28 = vadd.f32 %v2254_v43, %v2253_v25  ;;  %v1880_v15 = vpop.f32.mrf.mxu3 }
 0x23a   : > { %v2623_v38 = vsel %vm2119_vm6, %v2588_v40, 0.0  ;;  %3054 = vmatmul.msk.bf16.gmra.mxu1 %vm711_vm1, %v2336_v14  ;;  %v1957_v44 = vadd.f32 %v1880_v15, %v1831_v47  ;;  %v3138_v15 = vld [vmem:[%s3369_s10 + $0xb0] sm:$0xff] }
 0x23b   : > { %v2624_v36 = vadd.f32 %v2623_v38, %v2622_v33  ;;  %3038 = vmatmul.msk.bf16.gmra.mxu0 %vm711_vm1, %v4075_v59 }
 0x23c   : > { %v2089_v32 = vadd.f32 %v2012_v55, %v1957_v44  ;;  %v4966_v55 = vld [vmem:[#allocation15_spill] sm:$0xff]  ;;  %v3139_v44 = vld [vmem:[%s3369_s10 + $0xb8] sm:$0xff] }
 0x23d   : > { %v1756_v52 = vpop.f32.mrf.mxu2 }
 0x23e   : > { %2122 = vst.msk [vmem:[%s4376_s11 + $0x10] sm:$0xff] %vm2119_vm6, %v2089_v32  ;;  %v2155_v29 = vsel %vm2119_vm6, %v2089_v32, 0.0  ;;  %v2223_v2 = vmul.f32 %v2089_v32, %v2089_v32  ;;  %v1832_v19 = vadd.f32 %v1756_v52, %v4966_v55  ;;  %v2337_v32 = vpack.c.bf16 %v3139_v44, %v3138_v15 }
 0x23f   : > { %v2415_v60 = vpop.f32.mrf.mxu1  ;;  %v2156_v6 = vadd.f32 %v2155_v29, %v2154_v16 }
 0x240   : > { %2488 = vst.msk [vmem:[%s4333_s26 + $0x28] sm:$0xff] %vm2119_vm6, %v2415_v60  ;;  %v2524_v14 = vsel %vm2119_vm6, %v2415_v60, 0.0  ;;  %v2589_v33 = vmul.f32 %v2415_v60, %v2415_v60  ;;  %v2019_v17 = vpop.f32.mrf.mxu0  ;;  %v2256_v59 = vsel %vm2119_vm6, %v2223_v2, 0.0 }
 0x241   : > { %v2525_v26 = vadd.f32 %v2524_v14, %v2523_v10  ;;  %v2257_v54 = vadd.f32 %v2256_v59, %v2255_v28  ;;  %v1882_v25 = vpop.f32.mrf.mxu3  ;;  %v4967_v28 = vld [vmem:[#allocation20_spill] sm:$0xff] }
 0x242   : > { %v2625_v40 = vsel %vm2119_vm6, %v2589_v33, 0.0  ;;  %3004 = vmatmul.msk.bf16.gmra.mxu2 %vm711_vm1, %v4929_v56  ;;  %v1958_v16 = vadd.f32 %v1882_v25, %v1832_v19 }
 0x243   : > { %v2626_v43 = vadd.f32 %v2625_v40, %v2624_v36 }
 0x244   : > { %v2090_v47 = vadd.f32 %v2014_v5, %v1958_v16 }
 0x245   : > { %v1759_v38 = vpop.f32.mrf.mxu2 }
 0x246   : > { %2123 = vst.msk [vmem:[%s4376_s11 + $0x18] sm:$0xff] %vm2119_vm6, %v2090_v47  ;;  %v2157_v52 = vsel %vm2119_vm6, %v2090_v47, 0.0  ;;  %v2224_v10 = vmul.f32 %v2090_v47, %v2090_v47  ;;  %3021 = vmatmul.msk.bf16.gmra.mxu3 %vm711_vm1, %v4967_v28  ;;  %v1833_v14 = vadd.f32 %v1759_v38, %v4092_v62  ;;  %v4968_v28 = vld [vmem:[#allocation28_spill] sm:$0xff] }
 0x247   : > { %v2418_v29 = vpop.f32.mrf.mxu1  ;;  %v2158_v2 = vadd.f32 %v2157_v52, %v2156_v6 }
 0x248   : > { %2489 = vst.msk [vmem:[%s4333_s26 + $0x30] sm:$0xff] %vm2119_vm6, %v2418_v29  ;;  %v2526_v56 = vsel %vm2119_vm6, %v2418_v29, 0.0  ;;  %v2590_v5 = vmul.f32 %v2418_v29, %v2418_v29  ;;  %v2022_v36 = vpop.f32.mrf.mxu0  ;;  %v2258_v60 = vsel %vm2119_vm6, %v2224_v10, 0.0 }
 0x249   : > { %v2527_v33 = vadd.f32 %v2526_v56, %v2525_v26  ;;  %v2259_v59 = vadd.f32 %v2258_v60, %v2257_v54  ;;  %v1885_v19 = vpop.f32.mrf.mxu3  ;;  %v3140_v60 = vld [vmem:[%s3369_s10 + $0xc0] sm:$0xff] }
 0x24a   : > { %v2627_v55 = vsel %vm2119_vm6, %v2590_v5, 0.0  ;;  %3055 = vmatmul.msk.bf16.gmra.mxu1 %vm711_vm1, %v2337_v32  ;;  %v1959_v40 = vadd.f32 %v1885_v19, %v1833_v14  ;;  %v3141_v14 = vld [vmem:[%s3369_s10 + $0xc8] sm:$0xff] }
 0x24b   : > { %v2628_v6 = vadd.f32 %v2627_v55, %v2626_v43  ;;  %3039 = vmatmul.msk.bf16.gmra.mxu0 %vm711_vm1, %v4099_v31  ;;  %v2338_v55 = vpack.c.bf16 %v3141_v14, %v3140_v60 }
 0x24c   : > { %v2091_v25 = vadd.f32 %v2017_v0, %v1959_v40 }
 0x24d   : > { %v1761_v16 = vpop.f32.mrf.mxu2 }
 0x24e   : > { %2124 = vst.msk [vmem:[%s4376_s11 + $0x20] sm:$0xff] %vm2119_vm6, %v2091_v25  ;;  %v2159_v47 = vsel %vm2119_vm6, %v2091_v25, 0.0  ;;  %v2225_v62 = vmul.f32 %v2091_v25, %v2091_v25  ;;  %v1834_v0 = vadd.f32 %v1761_v16, %v4103_v23 }
 0x24f   : > { %v2420_v38 = vpop.f32.mrf.mxu1  ;;  %v2160_v26 = vadd.f32 %v2159_v47, %v2158_v2  ;;  %v4970_v47 = vld [vmem:[#allocation22_spill] sm:$0xff] }
 0x250   : > { %2490 = vst.msk [vmem:[%s4333_s26 + $0x38] sm:$0xff] %vm2119_vm6, %v2420_v38  ;;  %v2528_v54 = vsel %vm2119_vm6, %v2420_v38, 0.0  ;;  %v2591_v43 = vmul.f32 %v2420_v38, %v2420_v38  ;;  %v2024_v15 = vpop.f32.mrf.mxu0  ;;  %v2260_v31 = vsel %vm2119_vm6, %v2225_v62, 0.0 }
 0x251   : > { %v2529_v44 = vadd.f32 %v2528_v54, %v2527_v33  ;;  %v2261_v32 = vadd.f32 %v2260_v31, %v2259_v59  ;;  %v1887_v10 = vpop.f32.mrf.mxu3  ;;  %v4969_v59 = vld [vmem:[#allocation26_spill] sm:$0xff] }
 0x252   : > { %v2629_v52 = vsel %vm2119_vm6, %v2591_v43, 0.0  ;;  %3005 = vmatmul.msk.bf16.gmra.mxu2 %vm711_vm1, %v4968_v28  ;;  %v1960_v29 = vadd.f32 %v1887_v10, %v1834_v0 }
 0x253   : > { %v2630_v2 = vadd.f32 %v2629_v52, %v2628_v6 }
 0x254   : > { %v2092_v56 = vadd.f32 %v2019_v17, %v1960_v29 }
 0x255   : > { %v1764_v5 = vpop.f32.mrf.mxu2 }
 0x256   : > { %2125 = vst.msk [vmem:[%s4376_s11 + $0x28] sm:$0xff] %vm2119_vm6, %v2092_v56  ;;  %v2161_v23 = vsel %vm2119_vm6, %v2092_v56, 0.0  ;;  %v2226_v33 = vmul.f32 %v2092_v56, %v2092_v56  ;;  %3022 = vmatmul.msk.bf16.gmra.mxu3 %vm711_vm1, %v4969_v59  ;;  %v1835_v62 = vadd.f32 %v1764_v5, %v4970_v47 }
 0x257   : > { %v2423_v19 = vpop.f32.mrf.mxu1  ;;  %v2162_v40 = vadd.f32 %v2161_v23, %v2160_v26 }
 0x258   : > { %2491 = vst.msk [vmem:[%s4333_s26 + $0x40] sm:$0xff] %vm2119_vm6, %v2423_v19  ;;  %v2530_v6 = vsel %vm2119_vm6, %v2423_v19, 0.0  ;;  %v2592_v17 = vmul.f32 %v2423_v19, %v2423_v19  ;;  %v2027_v25 = vpop.f32.mrf.mxu0  ;;  %v2262_v16 = vsel %vm2119_vm6, %v2226_v33, 0.0 }
 0x259   : > { %v2531_v38 = vadd.f32 %v2530_v6, %v2529_v44  ;;  %v2263_v54 = vadd.f32 %v2262_v16, %v2261_v32  ;;  %v1890_v31 = vpop.f32.mrf.mxu3  ;;  %v3143_v16 = vld [vmem:[%s3369_s10 + $0xd8] sm:$0xff] }
 0x25a   : > { %v2631_v43 = vsel %vm2119_vm6, %v2592_v17, 0.0  ;;  %3056 = vmatmul.msk.bf16.gmra.mxu1 %vm711_vm1, %v2338_v55  ;;  %v1961_v0 = vadd.f32 %v1890_v31, %v1835_v62  ;;  %v3142_v17 = vld [vmem:[%s3369_s10 + $0xd0] sm:$0xff] }
 0x25b   : > { %v2632_v26 = vadd.f32 %v2631_v43, %v2630_v2  ;;  %3040 = vmatmul.msk.bf16.gmra.mxu0 %vm711_vm1, %v4126_v49  ;;  %v2339_v47 = vpack.c.bf16 %v3143_v16, %v3142_v17 }
 0x25c   : > { %v2093_v52 = vadd.f32 %v2022_v36, %v1961_v0  ;;  %v4971_v36 = vld [vmem:[#allocation25_spill] sm:$0xff] }
 0x25d   : > { %v1766_v10 = vpop.f32.mrf.mxu2 }
 0x25e   : > { %2126 = vst.msk [vmem:[%s4376_s11 + $0x30] sm:$0xff] %vm2119_vm6, %v2093_v52  ;;  %v2163_v28 = vsel %vm2119_vm6, %v2093_v52, 0.0  ;;  %v2227_v29 = vmul.f32 %v2093_v52, %v2093_v52  ;;  %v1836_v60 = vadd.f32 %v1766_v10, %v4971_v36 }
 0x25f   : > { %v2425_v56 = vpop.f32.mrf.mxu1  ;;  %v2164_v44 = vadd.f32 %v2163_v28, %v2162_v40 }
 0x260   : > { %2492 = vst.msk [vmem:[%s4333_s26 + $0x48] sm:$0xff] %vm2119_vm6, %v2425_v56  ;;  %v2532_v32 = vsel %vm2119_vm6, %v2425_v56, 0.0  ;;  %v2593_v2 = vmul.f32 %v2425_v56, %v2425_v56  ;;  %v2029_v5 = vpop.f32.mrf.mxu0  ;;  %v2264_v49 = vsel %vm2119_vm6, %v2227_v29, 0.0 }
 0x261   : > { %v2533_v14 = vadd.f32 %v2532_v32, %v2531_v38  ;;  %v2265_v55 = vadd.f32 %v2264_v49, %v2263_v54  ;;  %v1892_v33 = vpop.f32.mrf.mxu3  ;;  %v4972_v54 = vld [vmem:[#allocation30_spill] sm:$0xff] }
 0x262   : > { %v2633_v23 = vsel %vm2119_vm6, %v2593_v2, 0.0  ;;  %3006 = vmatmul.msk.bf16.gmra.mxu2 %vm711_vm1, %v4935_v13  ;;  %v1962_v19 = vadd.f32 %v1892_v33, %v1836_v60 }
 0x263   : > { %v2634_v59 = vadd.f32 %v2633_v23, %v2632_v26 }
 0x264   : > { %v2094_v40 = vadd.f32 %v2024_v15, %v1962_v19 }
 0x265   : > { %v1769_v6 = vpop.f32.mrf.mxu2 }
 0x266   : > { %2127 = vst.msk [vmem:[%s4376_s11 + $0x38] sm:$0xff] %vm2119_vm6, %v2094_v40  ;;  %v2165_v62 = vsel %vm2119_vm6, %v2094_v40, 0.0  ;;  %v2228_v38 = vmul.f32 %v2094_v40, %v2094_v40  ;;  %3023 = vmatmul.msk.bf16.gmra.mxu3 %vm711_vm1, %v4972_v54  ;;  %v1837_v52 = vadd.f32 %v1769_v6, %v4143_v30  ;;  %v3144_v54 = vld [vmem:[%s3369_s10 + $0xe0] sm:$0xff] }
 0x267   : > { %v2428_v43 = vpop.f32.mrf.mxu1  ;;  %v2166_v31 = vadd.f32 %v2165_v62, %v2164_v44 }
 0x268   : > { %2493 = vst.msk [vmem:[%s4333_s26 + $0x50] sm:$0xff] %vm2119_vm6, %v2428_v43  ;;  %v2534_v13 = vsel %vm2119_vm6, %v2428_v43, 0.0  ;;  %v2594_v15 = vmul.f32 %v2428_v43, %v2428_v43  ;;  %v2032_v26 = vpop.f32.mrf.mxu0  ;;  %v2266_v0 = vsel %vm2119_vm6, %v2228_v38, 0.0  ;;  %v3145_v43 = vld [vmem:[%s3369_s10 + $0xe8] sm:$0xff] }
 0x269   : > { %v2535_v10 = vadd.f32 %v2534_v13, %v2533_v14  ;;  %v2267_v28 = vadd.f32 %v2266_v0, %v2265_v55  ;;  %v1895_v56 = vpop.f32.mrf.mxu3  ;;  %v4974_v0 = vld [vmem:[#allocation34_spill] sm:$0xff] }
 0x26a   : > { %v2635_v29 = vsel %vm2119_vm6, %v2594_v15, 0.0  ;;  %3057 = vmatmul.msk.bf16.gmra.mxu1 %vm711_vm1, %v2339_v47  ;;  %v1963_v32 = vadd.f32 %v1895_v56, %v1837_v52 }
 0x26b   : > { %v2636_v44 = vadd.f32 %v2635_v29, %v2634_v59  ;;  %3041 = vmatmul.msk.bf16.gmra.mxu0 %vm711_vm1, %v4152_v3 }
 0x26c   : > { %v2095_v2 = vadd.f32 %v2027_v25, %v1963_v32  ;;  %v4973_v25 = vld [vmem:[#allocation18_spill] sm:$0xff] }
 0x26d   : > { %v1771_v49 = vpop.f32.mrf.mxu2 }
 0x26e   : > { %2128 = vst.msk [vmem:[%s4376_s11 + $0x40] sm:$0xff] %vm2119_vm6, %v2095_v2  ;;  %v2167_v36 = vsel %vm2119_vm6, %v2095_v2, 0.0  ;;  %v2229_v30 = vmul.f32 %v2095_v2, %v2095_v2  ;;  %v1838_v59 = vadd.f32 %v1771_v49, %v4973_v25 }
 0x26f   : > { %v2430_v60 = vpop.f32.mrf.mxu1  ;;  %v2168_v14 = vadd.f32 %v2167_v36, %v2166_v31  ;;  %v2340_v31 = vpack.c.bf16 %v3145_v43, %v3144_v54  ;;  %v3146_v43 = vld [vmem:[%s3369_s10 + $0xf0] sm:$0xff] }
 0x270   : > { %2494 = vst.msk [vmem:[%s4333_s26 + $0x58] sm:$0xff] %vm2119_vm6, %v2430_v60  ;;  %v2536_v55 = vsel %vm2119_vm6, %v2430_v60, 0.0  ;;  %v2595_v23 = vmul.f32 %v2430_v60, %v2430_v60  ;;  %v2034_v33 = vpop.f32.mrf.mxu0  ;;  %v2268_v3 = vsel %vm2119_vm6, %v2229_v30, 0.0 }
 0x271   : > { %v2537_v19 = vadd.f32 %v2536_v55, %v2535_v10  ;;  %v2269_v40 = vadd.f32 %v2268_v3, %v2267_v28  ;;  %v1897_v17 = vpop.f32.mrf.mxu3 }
 0x272   : > { %v2637_v6 = vsel %vm2119_vm6, %v2595_v23, 0.0  ;;  %3007 = vmatmul.msk.bf16.gmra.mxu2 %vm711_vm1, %v3800_v22  ;;  %v1964_v47 = vadd.f32 %v1897_v17, %v1838_v59 }
 0x273   : > { %v2638_v16 = vadd.f32 %v2637_v6, %v2636_v44 }
 0x274   : > { %v2096_v62 = vadd.f32 %v2029_v5, %v1964_v47 }
 0x275   : > { %v1774_v38 = vpop.f32.mrf.mxu2 }
 0x276   : > { %2129 = vst.msk [vmem:[%s4376_s11 + $0x48] sm:$0xff] %vm2119_vm6, %v2096_v62  ;;  %v2169_v13 = vsel %vm2119_vm6, %v2096_v62, 0.0  ;;  %v2230_v15 = vmul.f32 %v2096_v62, %v2096_v62  ;;  %3024 = vmatmul.msk.bf16.gmra.mxu3 %vm711_vm1, %v4974_v0  ;;  %v1839_v56 = vadd.f32 %v1774_v38, %v4173_v51 }
 0x277   : > { %v2433_v52 = vpop.f32.mrf.mxu1  ;;  %v2170_v10 = vadd.f32 %v2169_v13, %v2168_v14 }
 0x278   : > { %2495 = vst.msk [vmem:[%s4333_s26 + $0x60] sm:$0xff] %vm2119_vm6, %v2433_v52  ;;  %v2538_v22 = vsel %vm2119_vm6, %v2433_v52, 0.0  ;;  %v2596_v5 = vmul.f32 %v2433_v52, %v2433_v52  ;;  %v2037_v28 = vpop.f32.mrf.mxu0  ;;  %v2270_v29 = vsel %vm2119_vm6, %v2230_v15, 0.0 }
 0x279   : > { %v2539_v44 = vadd.f32 %v2538_v22, %v2537_v19  ;;  %v2271_v32 = vadd.f32 %v2270_v29, %v2269_v40  ;;  %v1900_v49 = vpop.f32.mrf.mxu3 }
 0x27a   : > { %v2639_v2 = vsel %vm2119_vm6, %v2596_v5, 0.0  ;;  %3058 = vmatmul.msk.bf16.gmra.mxu1 %vm711_vm1, %v2340_v31  ;;  %v1965_v30 = vadd.f32 %v1900_v49, %v1839_v56  ;;  %v3147_v31 = vld [vmem:[%s3369_s10 + $0xf8] sm:$0xff]  ;;  %s3062_s10 = sshll.u32 %s3301_s25, 1 }
 0x27b   : > { %v2640_v36 = vadd.f32 %v2639_v2, %v2638_v16  ;;  %3042 = vmatmul.msk.bf16.gmra.mxu0 %vm711_vm1, %v4184_v50  ;;  %v356_v50 = vsel %vm355_vm3, %v354_v35, 0.0  ;;  %v2341_v13 = vpack.c.bf16 %v3147_v31, %v3146_v43  ;;  %s2733_s15 = scalar_lea.hbm %s4833_s6, %s3062_s10 }
 0x27c   : > { %v2097_v60 = vadd.f32 %v2032_v26, %v1965_v30  ;;  %v423_v61 = vsel %vm321_vm2, 0.0, %v356_v50  ;;  %s2737_s18 = sshll.u32 %s2733_s15, 4  ;;  %s2738_s18 = int_to_ptr.hbm [resolvable:$true] %s2737_s18 }
 0x27d   : > { %v1776_v14 = vpop.f32.mrf.mxu2  ;;  %s3162_s20 = sshra.s32 %s2738_s18, 4  ;;  %s3163_s20 = int_to_ptr.hbm [resolvable:$true] %s3162_s20 }
 0x27e   : > { %2130 = vst.msk [vmem:[%s4376_s11 + $0x50] sm:$0xff] %vm2119_vm6, %v2097_v60  ;;  %v2171_v55 = vsel %vm2119_vm6, %v2097_v60, 0.0  ;;  %v2231_v51 = vmul.f32 %v2097_v60, %v2097_v60  ;;  %v1840_v40 = vadd.f32 %v1776_v14, %v4190_v58  ;;  %v561_v58 = vpack.c.bf16 %v423_v61, %v423_v61  ;;  %v4976_v14 = vld [vmem:[#allocation8_spill] sm:$0xff]  ;;  %p3169_p0 = scmp.lt.s32.totalorder %s3163_s20, %s4833_s6 }
 0x27f   : > { %v2435_v23 = vpop.f32.mrf.mxu1  ;;  %v2172_v3 = vadd.f32 %v2171_v55, %v2170_v10 }
 0x280   : > { %2496 = vst.msk [vmem:[%s4333_s26 + $0x68] sm:$0xff] %vm2119_vm6, %v2435_v23  ;;  %v2540_v25 = vsel %vm2119_vm6, %v2435_v23, 0.0  ;;  %v2597_v59 = vmul.f32 %v2435_v23, %v2435_v23  ;;  %v2039_v19 = vpop.f32.mrf.mxu0  ;;  %v2272_v26 = vsel %vm2119_vm6, %v2231_v51, 0.0 }
 0x281   : > { %v2541_v6 = vadd.f32 %v2540_v25, %v2539_v44  ;;  %v2273_v17 = vadd.f32 %v2272_v26, %v2271_v32  ;;  %v1902_v47 = vpop.f32.mrf.mxu3 }
 0x282   : > { %v2641_v16 = vsel %vm2119_vm6, %v2597_v59, 0.0  ;;  %3008 = vmatmul.msk.bf16.gmra.mxu2 %vm711_vm1, %v4207_v7  ;;  %v1966_v38 = vadd.f32 %v1902_v47, %v1840_v40 }
 0x283   : > { %v2642_v62 = vadd.f32 %v2641_v16, %v2640_v36  ;;  %v4975_v36 = vld [vmem:[#allocation9_spill] sm:$0xff] }
 0x284   : > { %v2098_v35 = vadd.f32 %v2034_v33, %v1966_v38 }
 0x285   : > { %v1779_v54 = vpop.f32.mrf.mxu2 }
 0x286   : > { %2131 = vst.msk [vmem:[%s4376_s11 + $0x58] sm:$0xff] %vm2119_vm6, %v2098_v35  ;;  %v2173_v15 = vsel %vm2119_vm6, %v2098_v35, 0.0  ;;  %v2232_v0 = vmul.f32 %v2098_v35, %v2098_v35  ;;  %3025 = vmatmul.msk.bf16.gmra.mxu3 %vm711_vm1, %v4188_v24  ;;  %v1841_v5 = vadd.f32 %v1779_v54, %v4203_v18  ;;  %v1732_v24 = vunpack.c.l.b16 %v561_v58 }
 0x287   : > { %v2438_v7 = vpop.f32.mrf.mxu1  ;;  %v2174_v52 = vadd.f32 %v2173_v15, %v2172_v3 }
 0x288   : > { %2497 = vst.msk [vmem:[%s4333_s26 + $0x70] sm:$0xff] %vm2119_vm6, %v2438_v7  ;;  %v2542_v11 = vsel %vm2119_vm6, %v2438_v7, 0.0  ;;  %v2598_v33 = vmul.f32 %v2438_v7, %v2438_v7  ;;  %v2042_v10 = vpop.f32.mrf.mxu0  ;;  %v2274_v22 = vsel %vm2119_vm6, %v2232_v0, 0.0  ;;  %v1733_v55 = vpack.c.b16 %v4976_v14, %v1732_v24 }
 0x289   : > { %v2543_v29 = vadd.f32 %v2542_v11, %v2541_v6  ;;  %v2275_v56 = vadd.f32 %v2274_v22, %v2273_v17  ;;  %v1905_v32 = vpop.f32.mrf.mxu3 }
 0x28a   : > { %v2643_v44 = vsel %vm2119_vm6, %v2598_v33, 0.0  ;;  %3059 = vmatmul.msk.bf16.gmra.mxu1 %vm711_vm1, %v2341_v13  ;;  %v1967_v49 = vadd.f32 %v1905_v32, %v1841_v5 }
 0x28b   : > { %v2644_v2 = vadd.f32 %v2643_v44, %v2642_v62  ;;  %3043 = vmatmul.msk.bf16.gmra.mxu0 %vm711_vm1, %v4975_v36 }
 0x28c   : > { %v2099_v30 = vadd.f32 %v2037_v28, %v1967_v49 }
 0x28d   : > { %v1781_v60 = vpop.f32.mrf.mxu2 }
 0x28e   : > { %2132 = vst.msk [vmem:[%s4376_s11 + $0x60] sm:$0xff] %vm2119_vm6, %v2099_v30  ;;  %v2175_v18 = vsel %vm2119_vm6, %v2099_v30, 0.0  ;;  %v2233_v51 = vmul.f32 %v2099_v30, %v2099_v30  ;;  %v1842_v28 = vadd.f32 %v1781_v60, %v4214_v46 }
 0x28f   : > { %v2440_v23 = vpop.f32.mrf.mxu1  ;;  %v2176_v3 = vadd.f32 %v2175_v18, %v2174_v52 }
 0x290   : > { %2498 = vst.msk [vmem:[%s4333_s26 + $0x78] sm:$0xff] %vm2119_vm6, %v2440_v23  ;;  %v2544_v25 = vsel %vm2119_vm6, %v2440_v23, 0.0  ;;  %v2599_v59 = vmul.f32 %v2440_v23, %v2440_v23  ;;  %v2044_v50 = vpop.f32.mrf.mxu0  ;;  %v2276_v26 = vsel %vm2119_vm6, %v2233_v51, 0.0 }
 0x291   : > { %v2545_v40 = vadd.f32 %v2544_v25, %v2543_v29  ;;  %v2277_v6 = vadd.f32 %v2276_v26, %v2275_v56  ;;  %v1907_v16 = vpop.f32.mrf.mxu3 }
 0x292   : > { %v2645_v17 = vsel %vm2119_vm6, %v2599_v59, 0.0  ;;  %3009 = vmatmul.msk.bf16.gmra.mxu2 %vm711_vm1, %v1733_v55  ;;  %v1968_v62 = vadd.f32 %v1907_v16, %v1842_v28 }
 0x293   : > { %v2646_v47 = vadd.f32 %v2645_v17, %v2644_v2 }
 0x294   : > { %v2100_v38 = vadd.f32 %v2039_v19, %v1968_v62 }
 0x295   : > { %v1784_v61 = vpop.f32.mrf.mxu2 }
 0x296   : > { %2133 = vst.msk [vmem:[%s4376_s11 + $0x68] sm:$0xff] %vm2119_vm6, %v2100_v38  ;;  %v2177_v35 = vsel %vm2119_vm6, %v2100_v38, 0.0  ;;  %v2234_v54 = vmul.f32 %v2100_v38, %v2100_v38  ;;  %3026 = vmatmul.msk.bf16.gmra.mxu3 %vm711_vm1, %v4975_v36  ;;  %v1843_v15 = vadd.f32 %v1784_v61, %v4220_v53 }
 0x297   : > { %v2443_v46 = vpop.f32.mrf.mxu1  ;;  %v2178_v43 = vadd.f32 %v2177_v35, %v2176_v3 }
 0x298   : > { %2499 = vst.msk [vmem:[%s4333_s26 + $0x80] sm:$0xff] %vm2119_vm6, %v2443_v46  ;;  %v2546_v31 = vsel %vm2119_vm6, %v2443_v46, 0.0  ;;  %v2600_v13 = vmul.f32 %v2443_v46, %v2443_v46  ;;  %v2047_v58 = vpop.f32.mrf.mxu0  ;;  %v2278_v19 = vsel %vm2119_vm6, %v2234_v54, 0.0 }
 0x299   : > { %v2547_v0 = vadd.f32 %v2546_v31, %v2545_v40  ;;  %v2279_v7 = vadd.f32 %v2278_v19, %v2277_v6  ;;  %v1910_v11 = vpop.f32.mrf.mxu3 }
 0x29a   : > { %v2647_v52 = vsel %vm2119_vm6, %v2600_v13, 0.0  ;;  %v1969_v22 = vadd.f32 %v1910_v11, %v1843_v15 }
 0x29b   : > { %v2648_v33 = vadd.f32 %v2647_v52, %v2646_v47 }
 0x29c   : > { %v2101_v5 = vadd.f32 %v2042_v10, %v1969_v22 }
 0x29d   : > { %v1786_v29 = vpop.f32.mrf.mxu2 }
 0x29e   : > { %2134 = vst.msk [vmem:[%s4376_s11 + $0x70] sm:$0xff] %vm2119_vm6, %v2101_v5  ;;  %v2179_v56 = vsel %vm2119_vm6, %v2101_v5, 0.0  ;;  %v2235_v44 = vmul.f32 %v2101_v5, %v2101_v5  ;;  %v1844_v10 = vadd.f32 %v1786_v29, %v4229_v1 }
 0x29f   : > { %v2445_v32 = vpop.f32.mrf.mxu1  ;;  %v2180_v24 = vadd.f32 %v2179_v56, %v2178_v43 }
 0x2a0   : > { %2500 = vst.msk [vmem:[%s4333_s26 + $0x88] sm:$0xff] %vm2119_vm6, %v2445_v32  ;;  %v2548_v53 = vsel %vm2119_vm6, %v2445_v32, 0.0  ;;  %v2601_v2 = vmul.f32 %v2445_v32, %v2445_v32  ;;  %v2049_v49 = vpop.f32.mrf.mxu0  ;;  %v2280_v36 = vsel %vm2119_vm6, %v2235_v44, 0.0 }
 0x2a1   : > { %v2549_v30 = vadd.f32 %v2548_v53, %v2547_v0  ;;  %v2281_v60 = vadd.f32 %v2280_v36, %v2279_v7  ;;  %v1912_v55 = vpop.f32.mrf.mxu3 }
 0x2a2   : > { %v2649_v14 = vsel %vm2119_vm6, %v2601_v2, 0.0  ;;  %v1970_v51 = vadd.f32 %v1912_v55, %v1844_v10 }
 0x2a3   : > { %v2650_v18 = vadd.f32 %v2649_v14, %v2648_v33 }
 0x2a4   : > { %v2102_v23 = vadd.f32 %v2044_v50, %v1970_v51 }
 0x2a5   : > { %v1789_v3 = vpop.f32.mrf.mxu2 }
 0x2a6   : > { %2135 = vst.msk [vmem:[%s4376_s11 + $0x78] sm:$0xff] %vm2119_vm6, %v2102_v23  ;;  %v2181_v25 = vsel %vm2119_vm6, %v2102_v23, 0.0  ;;  %v2236_v59 = vmul.f32 %v2102_v23, %v2102_v23  ;;  %v1845_v50 = vadd.f32 %v1789_v3, %v4235_v8 }
 0x2a7   : > { %v2448_v26 = vpop.f32.mrf.mxu1  ;;  %v2182_v28 = vadd.f32 %v2181_v25, %v2180_v24 }
 0x2a8   : > { %2501 = vst.msk [vmem:[%s4333_s26 + $0x90] sm:$0xff] %vm2119_vm6, %v2448_v26  ;;  %v2550_v1 = vsel %vm2119_vm6, %v2448_v26, 0.0  ;;  %v2602_v40 = vmul.f32 %v2448_v26, %v2448_v26  ;;  %v2052_v6 = vpop.f32.mrf.mxu0  ;;  %v2282_v17 = vsel %vm2119_vm6, %v2236_v59, 0.0 }
 0x2a9   : > { %v2551_v16 = vadd.f32 %v2550_v1, %v2549_v30  ;;  %v2283_v47 = vadd.f32 %v2282_v17, %v2281_v60  ;;  %v1915_v38 = vpop.f32.mrf.mxu3 }
 0x2aa   : > { %v2651_v62 = vsel %vm2119_vm6, %v2602_v40, 0.0  ;;  %v1971_v35 = vadd.f32 %v1915_v38, %v1845_v50 }
 0x2ab   : > { %v2652_v61 = vadd.f32 %v2651_v62, %v2650_v18 }
 0x2ac   : > { %v2103_v54 = vadd.f32 %v2047_v58, %v1971_v35 }
 0x2ad   : > { %v1791_v46 = vpop.f32.mrf.mxu2 }
 0x2ae   : > { %2136 = vst.msk [vmem:[%s4376_s11 + $0x80] sm:$0xff] %vm2119_vm6, %v2103_v54  ;;  %v2183_v43 = vsel %vm2119_vm6, %v2103_v54, 0.0  ;;  %v2237_v31 = vmul.f32 %v2103_v54, %v2103_v54  ;;  %v1846_v58 = vadd.f32 %v1791_v46, %v4244_v41 }
 0x2af   : > { %v2450_v13 = vpop.f32.mrf.mxu1  ;;  %v2184_v19 = vadd.f32 %v2183_v43, %v2182_v28 }
 0x2b0   : > { %2502 = vst.msk [vmem:[%s4333_s26 + $0x98] sm:$0xff] %vm2119_vm6, %v2450_v13  ;;  %v2552_v8 = vsel %vm2119_vm6, %v2450_v13, 0.0  ;;  %v2603_v15 = vmul.f32 %v2450_v13, %v2450_v13  ;;  %v2054_v0 = vpop.f32.mrf.mxu0  ;;  %v2284_v7 = vsel %vm2119_vm6, %v2237_v31, 0.0 }
 0x2b1   : > { %v2553_v52 = vadd.f32 %v2552_v8, %v2551_v16  ;;  %v2285_v11 = vadd.f32 %v2284_v7, %v2283_v47  ;;  %v1917_v22 = vpop.f32.mrf.mxu3 }
 0x2b2   : > { %v2653_v33 = vsel %vm2119_vm6, %v2603_v15, 0.0  ;;  %v1972_v29 = vadd.f32 %v1917_v22, %v1846_v58 }
 0x2b3   : > { %v2654_v5 = vadd.f32 %v2653_v33, %v2652_v61 }
 0x2b4   : > { %v2104_v56 = vadd.f32 %v2049_v49, %v1972_v29 }
 0x2b5   : > { %v1794_v44 = vpop.f32.mrf.mxu2 }
 0x2b6   : > { %2137 = vst.msk [vmem:[%s4376_s11 + $0x88] sm:$0xff] %vm2119_vm6, %v2104_v56  ;;  %v2185_v32 = vsel %vm2119_vm6, %v2104_v56, 0.0  ;;  %v2238_v24 = vmul.f32 %v2104_v56, %v2104_v56  ;;  %v1847_v49 = vadd.f32 %v1794_v44, %v4250_v39 }
 0x2b7   : > { %v2453_v53 = vpop.f32.mrf.mxu1  ;;  %v2186_v2 = vadd.f32 %v2185_v32, %v2184_v19 }
 0x2b8   : > { %2503 = vst.msk [vmem:[%s4333_s26 + $0xa0] sm:$0xff] %vm2119_vm6, %v2453_v53  ;;  %v2554_v41 = vsel %vm2119_vm6, %v2453_v53, 0.0  ;;  %v2604_v36 = vmul.f32 %v2453_v53, %v2453_v53  ;;  %v2057_v10 = vpop.f32.mrf.mxu0  ;;  %v2286_v30 = vsel %vm2119_vm6, %v2238_v24, 0.0 }
 0x2b9   : > { %v4603_v60 = vadd.f32 %v2554_v41, %v2553_v52  ;;  %v2287_v14 = vadd.f32 %v2286_v30, %v2285_v11  ;;  %v1920_v18 = vpop.f32.mrf.mxu3 }
 0x2ba   : > { %v2655_v55 = vsel %vm2119_vm6, %v2604_v36, 0.0  ;;  %v1973_v23 = vadd.f32 %v1920_v18, %v1847_v49 }
 0x2bb   : > { %v4606_v51 = vadd.f32 %v2655_v55, %v2654_v5 }
 0x2bc   : > { %v2105_v3 = vadd.f32 %v2052_v6, %v1973_v23 }
 0x2bd   : > { %v1796_v25 = vpop.f32.mrf.mxu2 }
 0x2be   : > { %2138 = vst.msk [vmem:[%s4376_s11 + $0x90] sm:$0xff] %vm2119_vm6, %v2105_v3  ;;  %v2187_v59 = vsel %vm2119_vm6, %v2105_v3, 0.0  ;;  %v2239_v26 = vmul.f32 %v2105_v3, %v2105_v3  ;;  %v1848_v17 = vadd.f32 %v1796_v25, %v4259_v12 }
 0x2bf   : > { %v4611_v28 = vpop.f32.mrf.mxu1  ;;  %v2188_v39 = vadd.f32 %v2187_v59, %v2186_v2 }
 0x2c0   : > { %2504 = vst.msk [vmem:[%s4333_s26 + $0xa8] sm:$0xff] %vm2119_vm6, %v4611_v28  ;;  %v2059_v1 = vpop.f32.mrf.mxu0  ;;  %v2288_v40 = vsel %vm2119_vm6, %v2239_v26, 0.0 }
 0x2c1   : > { %v2289_v6 = vadd.f32 %v2288_v40, %v2287_v14  ;;  %v1922_v50 = vpop.f32.mrf.mxu3 }
 0x2c2   : > { %v1974_v16 = vadd.f32 %v1922_v50, %v1848_v17 }
 0x2c4   : > { %v2106_v47 = vadd.f32 %v2054_v0, %v1974_v16 }
 0x2c5   : > { %v1799_v62 = vpop.f32.mrf.mxu2 }
 0x2c6   : > { %2139 = vst.msk [vmem:[%s4376_s11 + $0x98] sm:$0xff] %vm2119_vm6, %v2106_v47  ;;  %v2189_v38 = vsel %vm2119_vm6, %v2106_v47, 0.0  ;;  %v2240_v61 = vmul.f32 %v2106_v47, %v2106_v47  ;;  %v1849_v46 = vadd.f32 %v1799_v62, %v4265_v63 }
 0x2c7   : > { %v4621_v35 = vpop.f32.mrf.mxu1  ;;  %v2190_v54 = vadd.f32 %v2189_v38, %v2188_v39 }
 0x2c8   : > { %2505 = vst.msk [vmem:[%s4333_s26 + $0xb0] sm:$0xff] %vm2119_vm6, %v4621_v35  ;;  %v2290_v12 = vsel %vm2119_vm6, %v2240_v61, 0.0  ;;  %v2062_v13 = vpop.f32.mrf.mxu0 }
 0x2c9   : > { %v2291_v43 = vadd.f32 %v2290_v12, %v2289_v6  ;;  %v1925_v31 = vpop.f32.mrf.mxu3 }
 0x2ca   : > { %v1975_v19 = vadd.f32 %v1925_v31, %v1849_v46 }
 0x2cc   : > { %v2107_v8 = vadd.f32 %v2057_v10, %v1975_v19 }
 0x2cd   : > { %v1801_v15 = vpop.f32.mrf.mxu2 }
 0x2ce   : > { %2140 = vst.msk [vmem:[%s4376_s11 + $0xa0] sm:$0xff] %vm2119_vm6, %v2107_v8  ;;  %v2191_v0 = vsel %vm2119_vm6, %v2107_v8, 0.0  ;;  %v2241_v7 = vmul.f32 %v2107_v8, %v2107_v8  ;;  %v1850_v11 = vadd.f32 %v1801_v15, %v4274_v37 }
 0x2cf   : > { %v4631_v58 = vpop.f32.mrf.mxu1  ;;  %v2192_v52 = vadd.f32 %v2191_v0, %v2190_v54 }
 0x2d0   : > { %2506 = vst.msk [vmem:[%s4333_s26 + $0xb8] sm:$0xff] %vm2119_vm6, %v4631_v58  ;;  %v2292_v63 = vsel %vm2119_vm6, %v2241_v7, 0.0  ;;  %v2064_v29 = vpop.f32.mrf.mxu0 }
 0x2d1   : > { %v2293_v33 = vadd.f32 %v2292_v63, %v2291_v43  ;;  %v1927_v22 = vpop.f32.mrf.mxu3 }
 0x2d2   : > { %v1976_v5 = vadd.f32 %v1927_v22, %v1850_v11 }
 0x2d4   : > { %v2108_v56 = vadd.f32 %v2059_v1, %v1976_v5 }
 0x2d5   : > { %v1804_v44 = vpop.f32.mrf.mxu2 }
 0x2d6   : > { %2141 = vst.msk [vmem:[%s4376_s11 + $0xa8] sm:$0xff] %vm2119_vm6, %v2108_v56  ;;  %v2193_v32 = vsel %vm2119_vm6, %v2108_v56, 0.0  ;;  %v2242_v24 = vmul.f32 %v2108_v56, %v2108_v56  ;;  %v1851_v41 = vadd.f32 %v1804_v44, %v4280_v57  ;;  %v2605_v56 = vmul.f32 %v4611_v28, %v4611_v28 }
 0x2d7   : > { %v4641_v53 = vpop.f32.mrf.mxu1  ;;  %v2194_v2 = vadd.f32 %v2193_v32, %v2192_v52 }
 0x2d8   : > { %2507 = vst.msk [vmem:[%s4333_s26 + $0xc0] sm:$0xff] %vm2119_vm6, %v4641_v53  ;;  %v2294_v37 = vsel %vm2119_vm6, %v2242_v24, 0.0  ;;  %v2067_v55 = vpop.f32.mrf.mxu0  ;;  %v2556_v24 = vsel %vm2119_vm6, %v4611_v28, 0.0 }
 0x2d9   : > { %v2295_v36 = vadd.f32 %v2294_v37, %v2293_v33  ;;  %v1930_v10 = vpop.f32.mrf.mxu3 }
 0x2da   : > { %v1977_v30 = vadd.f32 %v1930_v10, %v1851_v41  ;;  %v2657_v10 = vsel %vm2119_vm6, %v2605_v56, 0.0 }
 0x2dc   : > { %v2109_v49 = vadd.f32 %v2062_v13, %v1977_v30  ;;  %v2558_v30 = vsel %vm2119_vm6, %v4621_v35, 0.0 }
 0x2dd   : > { %v1806_v14 = vpop.f32.mrf.mxu2 }
 0x2de   : > { %2142 = vst.msk [vmem:[%s4376_s11 + $0xb0] sm:$0xff] %vm2119_vm6, %v2109_v49  ;;  %v2195_v18 = vsel %vm2119_vm6, %v2109_v49, 0.0  ;;  %v2243_v23 = vmul.f32 %v2109_v49, %v2109_v49  ;;  %v1852_v59 = vadd.f32 %v1806_v14, %v4289_v45  ;;  %v2607_v49 = vmul.f32 %v4631_v58, %v4631_v58 }
 0x2df   : > { %v4651_v3 = vpop.f32.mrf.mxu1  ;;  %v2196_v25 = vadd.f32 %v2195_v18, %v2194_v2  ;;  %v2606_v2 = vmul.f32 %v4621_v35, %v4621_v35 }
 0x2e0   : > { %2508 = vst.msk [vmem:[%s4333_s26 + $0xc8] sm:$0xff] %vm2119_vm6, %v4651_v3  ;;  %v2296_v57 = vsel %vm2119_vm6, %v2243_v23, 0.0  ;;  %v2069_v62 = vpop.f32.mrf.mxu0  ;;  %v2560_v23 = vsel %vm2119_vm6, %v4631_v58, 0.0  ;;  %v2609_v58 = vmul.f32 %v4651_v3, %v4651_v3 }
 0x2e1   : > { %v2297_v26 = vadd.f32 %v2296_v57, %v2295_v36  ;;  %v1932_v39 = vpop.f32.mrf.mxu3  ;;  %v2659_v18 = vsel %vm2119_vm6, %v2606_v2, 0.0  ;;  %v2658_v57 = vadd.f32 %v2657_v10, %v4606_v51 }
 0x2e2   : > { %v1978_v1 = vadd.f32 %v1932_v39, %v1852_v59  ;;  %v2661_v39 = vsel %vm2119_vm6, %v2607_v49, 0.0 }
 0x2e4   : > { %v2110_v40 = vadd.f32 %v2064_v29, %v1978_v1  ;;  %v2562_v1 = vsel %vm2119_vm6, %v4641_v53, 0.0 }
 0x2e5   : > { %v1809_v17 = vpop.f32.mrf.mxu2 }
 0x2e6   : > { %2143 = vst.msk [vmem:[%s4376_s11 + $0xb8] sm:$0xff] %vm2119_vm6, %v2110_v40  ;;  %v2197_v6 = vsel %vm2119_vm6, %v2110_v40, 0.0  ;;  %v2244_v50 = vmul.f32 %v2110_v40, %v2110_v40  ;;  %v1853_v38 = vadd.f32 %v1809_v17, %v4295_v20  ;;  %v2660_v17 = vadd.f32 %v2659_v18, %v2658_v57 }
 0x2e7   : > { %v4661_v16 = vpop.f32.mrf.mxu1  ;;  %v2198_v47 = vadd.f32 %v2197_v6, %v2196_v25  ;;  %v2608_v25 = vmul.f32 %v4641_v53, %v4641_v53 }
 0x2e8   : > { %2509 = vst.msk [vmem:[%s4333_s26 + $0xd0] sm:$0xff] %vm2119_vm6, %v4661_v16  ;;  %v2298_v45 = vsel %vm2119_vm6, %v2244_v50, 0.0  ;;  %v2072_v52 = vpop.f32.mrf.mxu0  ;;  %v2610_v53 = vmul.f32 %v4661_v16, %v4661_v16 }
 0x2e9   : > { %v2299_v61 = vadd.f32 %v2298_v45, %v2297_v26  ;;  %v1935_v54 = vpop.f32.mrf.mxu3 }
 0x2ea   : > { %v1979_v12 = vadd.f32 %v1935_v54, %v1853_v38 }
 0x2ec   : > { %v2111_v46 = vadd.f32 %v2067_v55, %v1979_v12 }
 0x2ed   : > { %v1811_v43 = vpop.f32.mrf.mxu2 }
 0x2ee   : > { %2144 = vst.msk [vmem:[%s4376_s11 + $0xc0] sm:$0xff] %vm2119_vm6, %v2111_v46  ;;  %v2199_v31 = vsel %vm2119_vm6, %v2111_v46, 0.0  ;;  %v2245_v13 = vmul.f32 %v2111_v46, %v2111_v46  ;;  %v1854_v15 = vadd.f32 %v1811_v43, %v4304_v4  ;;  %v2665_v46 = vsel %vm2119_vm6, %v2609_v58, 0.0 }
 0x2ef   : > { %v4671_v19 = vpop.f32.mrf.mxu1  ;;  %v2200_v8 = vadd.f32 %v2199_v31, %v2198_v47  ;;  %v2663_v47 = vsel %vm2119_vm6, %v2608_v25, 0.0  ;;  %v2566_v43 = vsel %vm2119_vm6, %v4661_v16, 0.0 }
 0x2f0   : > { %2510 = vst.msk [vmem:[%s4333_s26 + $0xd8] sm:$0xff] %vm2119_vm6, %v4671_v19  ;;  %v2300_v20 = vsel %vm2119_vm6, %v2245_v13, 0.0  ;;  %v2074_v14 = vpop.f32.mrf.mxu0 }
 0x2f1   : > { %v2301_v0 = vadd.f32 %v2300_v20, %v2299_v61  ;;  %v1937_v7 = vpop.f32.mrf.mxu3  ;;  %v2662_v61 = vadd.f32 %v2661_v39, %v2660_v17  ;;  %v2667_v20 = vsel %vm2119_vm6, %v2610_v53, 0.0 }
 0x2f2   : > { %v1980_v63 = vadd.f32 %v1937_v7, %v1854_v15  ;;  %v2568_v15 = vsel %vm2119_vm6, %v4671_v19, 0.0 }
 0x2f3   : > { %v2664_v31 = vadd.f32 %v2663_v47, %v2662_v61 }
 0x2f4   : > { %v2112_v11 = vadd.f32 %v2069_v62, %v1980_v63  ;;  %v2564_v62 = vsel %vm2119_vm6, %v4651_v3, 0.0 }
 0x2f5   : > { %v1814_v33 = vpop.f32.mrf.mxu2 }
 0x2f6   : > { %2145 = vst.msk [vmem:[%s4376_s11 + $0xc8] sm:$0xff] %vm2119_vm6, %v2112_v11  ;;  %v2201_v22 = vsel %vm2119_vm6, %v2112_v11, 0.0  ;;  %v2246_v5 = vmul.f32 %v2112_v11, %v2112_v11  ;;  %v1855_v32 = vadd.f32 %v1814_v33, %v4310_v21  ;;  %v2557_v21 = vadd.f32 %v2556_v24, %v4603_v60 }
 0x2f7   : > { %v2473_v29 = vpop.f32.mrf.mxu1  ;;  %v2202_v44 = vadd.f32 %v2201_v22, %v2200_v8 }
 0x2f8   : > { %2511 = vst.msk [vmem:[%s4333_s26 + $0xe0] sm:$0xff] %vm2119_vm6, %v2473_v29  ;;  %v2302_v4 = vsel %vm2119_vm6, %v2246_v5, 0.0  ;;  %v2559_v35 = vadd.f32 %v2558_v30, %v2557_v21  ;;  %v2077_v7 = vpop.f32.mrf.mxu0  ;;  %v2570_v5 = vsel %vm2119_vm6, %v2473_v29, 0.0 }
 0x2f9   : > { %v2303_v37 = vadd.f32 %v2302_v4, %v2301_v0  ;;  %v1940_v41 = vpop.f32.mrf.mxu3  ;;  %v2612_v0 = vmul.f32 %v2473_v29, %v2473_v29 }
 0x2fa   : > { %v1981_v36 = vadd.f32 %v1940_v41, %v1855_v32  ;;  %v2561_v51 = vadd.f32 %v2560_v23, %v2559_v35 }
 0x2fb   : > { %v2671_v2 = vsel %vm2119_vm6, %v2612_v0, 0.0 }
 0x2fc   : > { %v2113_v28 = vadd.f32 %v2072_v52, %v1981_v36  ;;  %v2563_v54 = vadd.f32 %v2562_v1, %v2561_v51  ;;  %v2666_v52 = vadd.f32 %v2665_v46, %v2664_v31 }
 0x2fd   : > { %v1816_v55 = vpop.f32.mrf.mxu2 }
 0x2fe   : > { %2146 = vst.msk [vmem:[%s4376_s11 + $0xd0] sm:$0xff] %vm2119_vm6, %v2113_v28  ;;  %v2203_v59 = vsel %vm2119_vm6, %v2113_v28, 0.0  ;;  %v2247_v26 = vmul.f32 %v2113_v28, %v2113_v28  ;;  %v1856_v50 = vadd.f32 %v1816_v55, %v4319_v27  ;;  %v2611_v27 = vmul.f32 %v4671_v19, %v4671_v19 }
 0x2ff   : > { %v2475_v60 = vpop.f32.mrf.mxu1  ;;  %v2204_v40 = vadd.f32 %v2203_v59, %v2202_v44  ;;  %v2565_v13 = vadd.f32 %v2564_v62, %v2563_v54  ;;  %v2668_v4 = vadd.f32 %v2667_v20, %v2666_v52 }
 0x300   : > { %2512 = vst.msk [vmem:[%s4333_s26 + $0xe8] sm:$0xff] %vm2119_vm6, %v2475_v60  ;;  %v2304_v6 = vsel %vm2119_vm6, %v2247_v26, 0.0  ;;  %v2669_v22 = vsel %vm2119_vm6, %v2611_v27, 0.0  ;;  %v2613_v56 = vmul.f32 %v2475_v60, %v2475_v60  ;;  %v2079_v39 = vpop.f32.mrf.mxu0 }
 0x301   : > { %v2305_v45 = vadd.f32 %v2304_v6, %v2303_v37  ;;  %v1942_v38 = vpop.f32.mrf.mxu3  ;;  %v2567_v63 = vadd.f32 %v2566_v43, %v2565_v13  ;;  %v2572_v37 = vsel %vm2119_vm6, %v2475_v60, 0.0  ;;  %v2670_v30 = vadd.f32 %v2669_v22, %v2668_v4 }
 0x302   : > { %v1982_v12 = vadd.f32 %v1942_v38, %v1856_v50 }
 0x303   : > { %v2569_v19 = vadd.f32 %v2568_v15, %v2567_v63  ;;  %v2672_v28 = vadd.f32 %v2671_v2, %v2670_v30 }
 0x304   : > { %v2114_v3 = vadd.f32 %v2074_v14, %v1982_v12  ;;  %v2673_v14 = vsel %vm2119_vm6, %v2613_v56, 0.0 }
 0x305   : > { %v1819_v8 = vpop.f32.mrf.mxu2  ;;  %v2571_v29 = vadd.f32 %v2570_v5, %v2569_v19  ;;  %v2674_v25 = vadd.f32 %v2673_v14, %v2672_v28 }
 0x306   : > { %2147 = vst.msk [vmem:[%s4376_s11 + $0xd8] sm:$0xff] %vm2119_vm6, %v2114_v3  ;;  %v2205_v16 = vsel %vm2119_vm6, %v2114_v3, 0.0  ;;  %v2248_v11 = vmul.f32 %v2114_v3, %v2114_v3  ;;  %v1857_v24 = vadd.f32 %v1819_v8, %v4325_v42 }
 0x307   : > { %v2478_v33 = vpop.f32.mrf.mxu1  ;;  %v2206_v44 = vadd.f32 %v2205_v16, %v2204_v40  ;;  %v2573_v55 = vadd.f32 %v2572_v37, %v2571_v29 }
 0x308   : > { %2513 = vst.msk [vmem:[%s4333_s26 + $0xf0] sm:$0xff] %vm2119_vm6, %v2478_v33  ;;  %v2306_v32 = vsel %vm2119_vm6, %v2248_v11, 0.0  ;;  %v2614_v36 = vmul.f32 %v2478_v33, %v2478_v33  ;;  %v2574_v21 = vsel %vm2119_vm6, %v2478_v33, 0.0 }
 0x309   : > { %v2307_v41 = vadd.f32 %v2306_v32, %v2305_v45  ;;  %v1945_v10 = vpop.f32.mrf.mxu3  ;;  %v2575_v57 = vadd.f32 %v2574_v21, %v2573_v55 }
 0x30a   : > { %v1983_v49 = vadd.f32 %v1945_v10, %v1857_v24  ;;  %v2675_v23 = vsel %vm2119_vm6, %v2614_v36, 0.0 }
 0x30b   : > { %v2676_v40 = vadd.f32 %v2675_v23, %v2674_v25 }
 0x30c   : > { %v2115_v18 = vadd.f32 %v2077_v7, %v1983_v49  ;;  %v2082_v7 = vpop.f32.mrf.mxu0 }
 0x30d   : > { %v1821_v42 = vpop.f32.mrf.mxu2 }
 0x30e   : > { %2148 = vst.msk [vmem:[%s4376_s11 + $0xe0] sm:$0xff] %vm2119_vm6, %v2115_v18  ;;  %v2207_v35 = vsel %vm2119_vm6, %v2115_v18, 0.0  ;;  %v2249_v59 = vmul.f32 %v2115_v18, %v2115_v18  ;;  %v1858_v51 = vadd.f32 %v1821_v42, %v4340_v9 }
 0x30f   : > { %v2480_v26 = vpop.f32.mrf.mxu1  ;;  %v2208_v60 = vadd.f32 %v2207_v35, %v2206_v44 }
 0x310   : > { %2514 = vst.msk [vmem:[%s4333_s26 + $0xf8] sm:$0xff] %vm2119_vm6, %v2480_v26  ;;  %v2576_v1 = vsel %vm2119_vm6, %v2480_v26, 0.0  ;;  %v2615_v58 = vmul.f32 %v2480_v26, %v2480_v26  ;;  %v2308_v17 = vsel %vm2119_vm6, %v2249_v59, 0.0  ;;  %s3164_s26 = scalar_lea.hbm %s3163_s20, 2 }
 0x311   : > { %v2577_v6 = vadd.f32 %v2576_v1, %v2575_v57  ;;  %v2309_v50 = vadd.f32 %v2308_v17, %v2307_v41  ;;  %v1947_v62 = vpop.f32.mrf.mxu3  ;;  %p3165_p11 = scmp.ne.s32.totalorder %s3163_s20, %s3164_s26  ;;  %p3170_p1 = scmp.lt.s32.totalorder %s3168_s13, %s3164_s26 }
 0x312   : > { %v2677_v47 = vsel %vm2119_vm6, %v2615_v58, 0.0  ;;  %v1984_v38 = vadd.f32 %v1947_v62, %v1858_v51 }
 0x313   : > { %v2578_v53 = vrot.slane %v2577_v6, 4  ;;  %v2678_v45 = vadd.f32 %v2677_v47, %v2676_v40  ;;  %p3166_p12 = pnand %p3165_p11, %p3318_p5  ;;  %p3171_p2 = por %p3170_p1, %p3169_p0 }
 0x314   : > { %v2116_v12 = vadd.f32 %v2079_v39, %v1984_v38 }
 0x315   : > { %v2579_v61 = vadd.f32 %v2578_v53, %v2577_v6  ;;  %v2679_v54 = vrot.slane %v2678_v45, 4  ;;  %v1824_v46 = vpop.f32.mrf.mxu2  ;;  %p3167_p13 = pneg %p3166_p12 }
 0x316   : > { %2149 = vst.msk [vmem:[%s4376_s11 + $0xe8] sm:$0xff] %vm2119_vm6, %v2116_v12  ;;  %v2209_v9 = vsel %vm2119_vm6, %v2116_v12, 0.0  ;;  %v2250_v31 = vmul.f32 %v2116_v12, %v2116_v12  ;;  %v1859_v15 = vadd.f32 %v1824_v46, %v4349_v34 }
 0x317   : > { %v2580_v43 = vrot.slane %v2579_v61, 2  ;;  %v2680_v27 = vadd.f32 %v2679_v54, %v2678_v45  ;;  %v2210_v13 = vadd.f32 %v2209_v9, %v2208_v60  ;;  %p3172_p3 = pnand %p3171_p2, %p3167_p13 }
 0x318   : > { %v2310_v20 = vsel %vm2119_vm6, %v2250_v31, 0.0 }
 0x319   : > { %v2581_v3 = vadd.f32 %v2580_v43, %v2579_v61  ;;  %v2681_v8 = vrot.slane %v2680_v27, 2  ;;  %v2311_v0 = vadd.f32 %v2310_v20, %v2309_v50  ;;  %v1950_v52 = vpop.f32.mrf.mxu3 }
 0x31a   : > { %v1985_v11 = vadd.f32 %v1950_v52, %v1859_v15 }
 0x31b   : > { %v2582_v63 = vrot.slane %v2581_v3, 1  ;;  %v2682_v16 = vadd.f32 %v2681_v8, %v2680_v27 }
 0x31c   : > { %v2117_v22 = vadd.f32 %v2082_v7, %v1985_v11 }
 0x31d   : > { %v2683_v33 = vrot.slane %v2682_v16, 1  ;;  %v1826_v34 = vpop.f32.mrf.mxu2  ;;  %v2583_v5 = vadd.f32 %v2582_v63, %v2581_v3 }
 0x31e   : > { %2150 = vst.msk [vmem:[%s4376_s11 + $0xf0] sm:$0xff] %vm2119_vm6, %v2117_v22  ;;  %v2211_v56 = vsel %vm2119_vm6, %v2117_v22, 0.0  ;;  %v2251_v44 = vmul.f32 %v2117_v22, %v2117_v22  ;;  %v1860_v24 = vadd.f32 %v1826_v34, %v4362_v48 }
 0x31f   : > { %v2684_v4 = vadd.f32 %v2683_v33, %v2682_v16  ;;  %v2212_v19 = vadd.f32 %v2211_v56, %v2210_v13 }
 0x320   : > { %v2312_v32 = vsel %vm2119_vm6, %v2251_v44, 0.0 }
 0x321   : > { %v2685_v2 = vsel %vm2322_vm7, %v2583_v5, %v2684_v4  ;;  %v2313_v37 = vadd.f32 %v2312_v32, %v2311_v0  ;;  %v1952_v41 = vpop.f32.mrf.mxu3 }
 0x322   : > { %2686 = vst.msk [vmem:[%s269_s16] sm:$0x3] %vm2324_vm8, %v2685_v2  ;;  %v1986_v36 = vadd.f32 %v1952_v41, %v1860_v24 }
 0x323   : > { %3175 = shalt.err (!%p3172_p3)
}
 0x324   : > { %3072 = dma.vmem_to_hbm [thread:$0]  (%p3318_p5), %s2736_s17, 32, %s2738_s18, %s2703_s19   ;;  %v2084_v48 = vpop.f32.mrf.mxu0 }
 0x325   : > { %v2118_v10 = vadd.f32 %v2084_v48, %v1986_v36  ;;  %s255_s18 = scalar_lea.vmem [#allocation2], %s2884_s12  ;;  %s2693_s25 = scalar_lea.sflag [#allocation3], %s4752_s28 }
 0x326   : > { %s2718_s19 = sshll.u32 %s255_s18, 4  ;;  %s3196_s9 = scalar_lea.hbm %s4831_s4, 4  ;;  %s2719_s19 = int_to_ptr.vmem [resolvable:$true] %s2718_s19 }
 0x327   : > { %2151 = vst.msk [vmem:[%s4376_s11 + $0xf8] sm:$0xff] %vm2119_vm6, %v2118_v10  ;;  %v2213_v30 = vsel %vm2119_vm6, %v2118_v10, 0.0  ;;  %v2252_v29 = vmul.f32 %v2118_v10, %v2118_v10  ;;  %s2716_s11 = scalar_lea.hbm %s4831_s4, %s3062_s10 }
 0x328   : > { %v2214_v49 = vadd.f32 %v2213_v30, %v2212_v19  ;;  %s2720_s20 = sshll.u32 %s2716_s11, 4  ;;  %s2721_s20 = int_to_ptr.hbm [resolvable:$true] %s2720_s20 }
 0x329   : > { %v2314_v14 = vsel %vm2119_vm6, %v2252_v29, 0.0  ;;  %s3190_s26 = sshra.s32 %s2721_s20, 4  ;;  %s3191_s26 = int_to_ptr.hbm [resolvable:$true] %s3190_s26 }
 0x32a   : > { %v2215_v21 = vrot.slane %v2214_v49, 4  ;;  %v2315_v28 = vadd.f32 %v2314_v14, %v2313_v37  ;;  %s3192_s10 = scalar_lea.hbm %s3191_s26, 2  ;;  %p3197_p9 = scmp.lt.s32.totalorder %s3191_s26, %s4831_s4 }
 0x32b   : > { %p3193_p4 = scmp.ne.s32.totalorder %s3191_s26, %s3192_s10  ;;  %p3198_p10 = scmp.lt.s32.totalorder %s3196_s9, %s3192_s10 }
 0x32c   : > { %v2216_v55 = vadd.f32 %v2215_v21, %v2214_v49  ;;  %v2316_v18 = vrot.slane %v2315_v28, 4 }
 0x32d   : > { %p3194_p7 = pnand %p3193_p4, %p3318_p5  ;;  %p3199_p11 = por %p3198_p10, %p3197_p9 }
 0x32e   : > { %v2217_v42 = vrot.slane %v2216_v55, 2  ;;  %v2317_v23 = vadd.f32 %v2316_v18, %v2315_v28 }
 0x32f   : > { %p3195_p8 = pneg %p3194_p7 }
 0x330   : > { %v2218_v25 = vadd.f32 %v2217_v42, %v2216_v55  ;;  %v2318_v57 = vrot.slane %v2317_v23, 2 }
 0x331   : > { %p3200_p12 = pnand %p3199_p11, %p3195_p8 }
 0x332   : > { %v2219_v35 = vrot.slane %v2218_v25, 1  ;;  %v2319_v59 = vadd.f32 %v2318_v57, %v2317_v23 }
 0x334   : > { %v2320_v26 = vrot.slane %v2319_v59, 1  ;;  %v2220_v60 = vadd.f32 %v2219_v35, %v2218_v25 }
 0x336   : > { %v2321_v39 = vadd.f32 %v2320_v26, %v2319_v59 }
 0x338   : > { %v2323_v1 = vsel %vm2322_vm7, %v2220_v60, %v2321_v39 }
 0x339   : > { %2325 = vst.msk [vmem:[%s255_s18] sm:$0x3] %vm2324_vm8, %v2323_v1 }
 0x33a   : > { %3203 = shalt.err (!%p3200_p12)
}
 0x33b   : > { %3071 = dma.vmem_to_hbm [thread:$0]  (%p3318_p5), %s2719_s19, 32, %s2721_s20, %s2693_s25  }
 0x33c PF: > { %p3082_p13 = scmp.ge.s32.totalorder %s3242_s24, 2  ;;  %s2757_s28 = sand.u32 1, %s3230_s21  }
 0x33d   : > { %s2758_s15 = scalar_lea.sflag [#allocation3], %s2757_s28 }
 0x33e   : > { %p3076_p0 = pnand %p3082_p13, %p3322_p6 }
 0x340   : > { %p3077_p1 = pneg %p3076_p0 }
 0x342   : > { %3221 = dma.done.wait (%p3077_p1), %s2758_s15, 32  }
 0x343   : > { %3223 = vsyncadd (%p3077_p1), %s2758_s15, 4294967264  ;;  %s2776_s16 = scalar_lea.sflag [#allocation5], %s2757_s28 }
 0x344   : > { %3225 = dma.done.wait (%p3077_p1), %s2776_s16, 32  }
 0x345   : > { %3227 = vsyncadd (%p3077_p1), %s2776_s16, 4294967264  ;;  %p20_p5 = scmp.ge.s32.totalorder %s3305_s27, 4   ;;  %s4977_s21 = smov %s3234_s22 }
 0x346   : > { %s4978_s22 = smov %s3238_s23  ;;  %s4979_s23 = smov %s3316_s30 }
 0x347   : > { %s4980_s24 = smov %s3305_s27  ;;  %22 = sbr.rel (!%p20_p5) target bundleno = 5 (0x5), region = 116 }
 0x34c   :  { %2782 = vsyncpa [#allocation3], 1 }
 0x34d   :  { %2784 = vsyncpa [#allocation3 + $0x1], 1 }
 0x34e   :  { %2785 = vsyncpa [#allocation5], 1 }
 0x34f   :  { %2787 = vsyncpa [#allocation5 + $0x1], 1 }

</bundles_post_ra>
